<compile_context>
chip_gen: v6e
topology: v6e:2x2x1
jax: 0.10.0
libtpu: 0.0.40
codegen_flags: <defaults>
</compile_context>

<pallas_src>
import jax
import jax.numpy as jnp
from jax.experimental import pallas as pl
from jax.experimental.pallas import tpu as pltpu

# ---- model / shape config ----
B = 256        # graphs in the batch
N = 16         # nodes per graph (padded/fixed)
F = 32         # gnn_rgcn_out_feats
H = 32         # ffn_hidden_feats
T = 1          # n_tasks
NUM_FC = 3     # num_fc_layers
BN_EPS = 1e-5
NF = N * F     # 512 lanes: flat node-feature width

assert F == H, "parameter packing below assumes gnn_rgcn_out_feats == ffn_hidden_feats"

# ---- packed parameter table layout: one f32 array of shape (N_ROWS, H) ----
#   rows [i*H, (i+1)*H)        : folded Linear_i weight (H x H), i = 0..NUM_FC-1
#   rows ROW_BIAS  .. +NUM_FC  : folded Linear_i biases
#   rows ROW_ALPHA .. +NUM_FC  : PReLU slopes (per-channel rows)
#   rows ROW_WOUT  .. +T       : folded predict weight, stored as (T, H)
#   row  ROW_SCAL              : scalars [wb, bout_0..bout_{T-1}]
ROW_BIAS = NUM_FC * H
ROW_ALPHA = ROW_BIAS + NUM_FC
ROW_WOUT = ROW_ALPHA + NUM_FC
ROW_SCAL = ROW_WOUT + T
N_ROWS = ROW_SCAL + 1
COL_WB = 0
COL_BOUT = 1
assert COL_BOUT + T <= H


def _tensorcores_per_chip():
    """v7x exposes 2 TensorCores to one Pallas grid; v5e/v6e have 1."""
    try:
        kind = jax.devices()[0].device_kind.lower()
    except Exception:
        return 1
    return 2 if "7" in kind else 1


NUM_TC = _tensorcores_per_chip()


def basegnn_kernel(feats_ref, smask_ref, wgate_ref, e_ref, r_ref, p_ref,
                   out_ref, weight_ref):
    feats = feats_ref[...]                         # (BT, N*F) lane-dense
    smask = smask_ref[...]                         # (BT, N)
    p = p_ref[...]                                 # (N_ROWS, H) packed params

    scal = p[ROW_SCAL:ROW_SCAL + 1, :]             # (1, H)
    wb = scal[:, COL_WB:COL_WB + 1]                # (1, 1)

    # --- WeightAndSum gate: one dense MXU matmul (BT,512)x(512,N) ---
    logits = jnp.dot(feats, wgate_ref[...],
                     preferred_element_type=jnp.float32) + wb      # (BT, N)
    w = jax.nn.sigmoid(logits) * smask                             # (BT, N)
    weight_ref[...] = w.T                          # (N, BT): lane-dense unmasked store

    # --- weighted node readout, all lane-dense:
    #     h[b,f] = sum_n w[b,n] * feats[b,n,f]  ==  (feats * (w @ E)) @ R
    w_exp = jnp.dot(w, e_ref[...],
                    preferred_element_type=jnp.float32)            # (BT, N*F)
    h = jnp.dot(feats * w_exp, r_ref[...],
                preferred_element_type=jnp.float32)                # (BT, F)

    # --- project layers: Linear (eval-BN already folded) -> PReLU, x NUM_FC ---
    for i in range(NUM_FC):                        # static unroll
        w_i = p[i * H:(i + 1) * H, :]              # (H, H)
        b_i = p[ROW_BIAS + i:ROW_BIAS + i + 1, :]  # (1, H)
        a_i = p[ROW_ALPHA + i:ROW_ALPHA + i + 1, :]  # (1, H) per-channel PReLU slope
        h = jnp.dot(h, w_i, preferred_element_type=jnp.float32) + b_i
        h = jnp.where(h > 0, h, a_i * h)

    # --- predict (last BN folded into it); lane-dense (T, BT) output block ---
    wout_t = p[ROW_WOUT:ROW_WOUT + T, :]                           # (T, H)
    bout = scal[:, COL_BOUT:COL_BOUT + T].reshape(T, 1)            # (T, 1)
    out_ref[...] = jnp.einsum('th,bh->tb', wout_t, h,
                              preferred_element_type=jnp.float32) + bout


def basegnn_forward(node_feats, smask, params):
    """Returns (out [B, n_tasks], weight [B, N, 1], None) like BaseGNN.forward."""
    wgate, emat, rmat, ptab = params
    nb = node_feats.shape[0]

    # Per-generation tiling: 1 grid step per TensorCore; keep BT a multiple of 128
    # so the transposed weight store stays lane-dense.
    if NUM_TC > 1 and nb % (NUM_TC * 128) == 0:
        bt = nb // NUM_TC                          # v7x: both TCs get one step
    else:
        bt = nb                                    # v5e / v6e: single grid step
    grid = nb // bt

    feats_flat = node_feats.reshape(nb, NF)        # free contiguous view -> 512 lanes
    smask2 = smask.reshape(nb, N)

    grid_spec = pltpu.PrefetchScalarGridSpec(
        num_scalar_prefetch=0,
        grid=(grid,),
        in_specs=[
            pl.BlockSpec((bt, NF), lambda i: (i, 0)),      # feats tile, lane-dense
            pl.BlockSpec((bt, N), lambda i: (i, 0)),       # smask tile
            pl.BlockSpec((NF, N), lambda i: (0, 0)),       # Wgate (resident)
            pl.BlockSpec((N, NF), lambda i: (0, 0)),       # E expand matrix (resident)
            pl.BlockSpec((NF, F), lambda i: (0, 0)),       # R reduce matrix (resident)
            pl.BlockSpec((N_ROWS, H), lambda i: (0, 0)),   # packed params (resident)
        ],
        out_specs=[
            pl.BlockSpec((T, bt), lambda i: (0, i)),       # out, lane-dense
            pl.BlockSpec((N, bt), lambda i: (0, i)),       # node weights, lane-dense
        ],
    )

    out_tb, weight_nb = pl.pallas_call(
        basegnn_kernel,
        out_shape=(jax.ShapeDtypeStruct((T, nb), jnp.float32),
                   jax.ShapeDtypeStruct((N, nb), jnp.float32)),
        grid_spec=grid_spec,
        compiler_params=pltpu.CompilerParams(
            dimension_semantics=("parallel",)),            # v7x: 2 TCs split the grid
    )(feats_flat, smask2, wgate, emat, rmat, ptab)

    return out_tb.T, weight_nb.T[..., None], None


# ---------------- host-side parameter construction ----------------

def init_raw_params(key):
    """Raw (PyTorch-layout-equivalent) parameters; Linear weights stored as [in, out]."""
    ks = jax.random.split(key, 4)
    return {
        "ww": jax.random.normal(ks[0], (F,), jnp.float32) * 0.1,   # WeightAndSum Linear(F->1)
        "wb": jnp.zeros((), jnp.float32),
        "wproj": jax.random.normal(ks[1], (NUM_FC, H, H), jnp.float32) * (H ** -0.5),
        "bproj": jax.random.normal(ks[2], (NUM_FC, H), jnp.float32) * 0.01,
        "alpha": jnp.full((NUM_FC,), 0.25, jnp.float32),           # PReLU default slope
        # BatchNorm1d running stats / affine (deterministic init; works for trained stats too)
        "bn_mean": jnp.zeros((NUM_FC, H), jnp.float32),
        "bn_var": jnp.ones((NUM_FC, H), jnp.float32),
        "bn_gamma": jnp.ones((NUM_FC, H), jnp.float32),
        "bn_beta": jnp.zeros((NUM_FC, H), jnp.float32),
        "wout": jax.random.normal(ks[3], (H, T), jnp.float32) * (H ** -0.5),
        "bout": jnp.zeros((T,), jnp.float32),
    }


def fold_and_pack_params(raw):
    """Fold eval BatchNorm into the following Linear; pack params + layout matrices."""
    scale = raw["bn_gamma"] / jnp.sqrt(raw["bn_var"] + BN_EPS)          # (NUM_FC, H)
    shift = raw["bn_beta"] - raw["bn_mean"] * scale                     # (NUM_FC, H)

    w_f, b_f = [raw["wproj"][0]], [raw["bproj"][0]]
    for i in range(1, NUM_FC):
        w_f.append(scale[i - 1][:, None] * raw["wproj"][i])             # diag(s) @ W
        b_f.append(shift[i - 1] @ raw["wproj"][i] + raw["bproj"][i])    # t @ W + b
    wout_f = scale[-1][:, None] * raw["wout"]                           # (H, T)
    bout_f = shift[-1] @ raw["wout"] + raw["bout"]                      # (T,)

    # PReLU slopes as per-channel rows (replicates a scalar slope; also accepts (NUM_FC,H))
    alpha_rows = jnp.broadcast_to(jnp.reshape(raw["alpha"], (NUM_FC, -1)), (NUM_FC, H))

    scal_row = jnp.zeros((H,), jnp.float32)
    scal_row = scal_row.at[COL_WB].set(raw["wb"])
    scal_row = scal_row.at[COL_BOUT:COL_BOUT + T].set(bout_f)

    ptab = jnp.concatenate([
        jnp.concatenate(w_f, axis=0),        # (NUM_FC*H, H) folded Linear weights
        jnp.stack(b_f, axis=0),              # ROW_BIAS..  folded biases
        alpha_rows,                          # ROW_ALPHA.. PReLU slopes
        wout_f.T,                            # ROW_WOUT (T, H) folded predict weight
        scal_row.reshape(1, H),              # ROW_SCAL
    ], axis=0)
    assert ptab.shape == (N_ROWS, H)

    # Constant layout matrices for the flat (N*F)-lane formulation.
    node_ids = jnp.arange(NF) // F                                       # (NF,)
    feat_ids = jnp.arange(NF) % F                                        # (NF,)
    node_onehot = (node_ids[:, None] == jnp.arange(N)[None, :]).astype(jnp.float32)  # (NF, N)
    wgate = node_onehot * raw["ww"][feat_ids][:, None]                   # (NF, N) block-diag ww
    emat = node_onehot.T                                                 # (N, NF) expand w -> lanes
    rmat = (feat_ids[:, None] == jnp.arange(F)[None, :]).astype(jnp.float32)  # (NF, F) reduce nodes
    return wgate, emat, rmat, ptab


def basegnn_reference(node_feats, smask, raw):
    """Pure-JAX reference of the (unfolded) eval-mode forward."""
    feats = node_feats
    logits = feats @ raw["ww"].reshape(F, 1) + raw["wb"]        # (B, N, 1)
    w = jax.nn.sigmoid(logits) * smask                          # (B, N, 1)
    h = jnp.sum(feats * w, axis=1)                              # (B, F)
    scale = raw["bn_gamma"] / jnp.sqrt(raw["bn_var"] + BN_EPS)
    shift = raw["bn_beta"] - raw["bn_mean"] * scale
    for i in range(NUM_FC):
        h = h @ raw["wproj"][i] + raw["bproj"][i]
        h = jnp.where(h > 0, h, raw["alpha"][i] * h)
        h = h * scale[i] + shift[i]
    out = h @ raw["wout"] + raw["bout"]
    return out, w


if __name__ == "__main__":
    key = jax.random.PRNGKey(0)
    k_feat, k_mask, k_param = jax.random.split(key, 3)

    node_feats = jax.random.normal(k_feat, (B, N, F), jnp.float32)
    smask = jax.random.bernoulli(k_mask, 0.8, (B, N, 1)).astype(jnp.float32)

    raw = init_raw_params(k_param)
    params = fold_and_pack_params(raw)

    out, weight, extra = jax.jit(basegnn_forward)(node_feats, smask, params)
    (out, weight) = jax.block_until_ready((out, weight))

    assert out.shape == (B, T) and weight.shape == (B, N, 1) and extra is None
    assert bool(jnp.all(jnp.isfinite(out))) and bool(jnp.all(jnp.isfinite(weight)))

    with jax.default_matmul_precision("highest"):
        out_ref, w_ref = basegnn_reference(node_feats, smask, raw)
    (out_ref, w_ref) = jax.block_until_ready((out_ref, w_ref))

    assert jnp.allclose(weight, w_ref, atol=1e-5, rtol=1e-5), "weight mismatch vs reference"
    assert jnp.allclose(out, out_ref, atol=1e-4, rtol=1e-4), "out mismatch vs reference"

    print("KERNEL_OK")
</pallas_src>

<mosaic_0001>
module attributes {stable_mosaic.version = 11 : i64} {
  func.func @basegnn_kernel(%arg0: i32, %arg1: memref<256x512xf32, #tpu.memory_space<vmem>>, %arg2: memref<256x16xf32, #tpu.memory_space<vmem>>, %arg3: memref<512x16xf32, #tpu.memory_space<vmem>>, %arg4: memref<16x512xf32, #tpu.memory_space<vmem>>, %arg5: memref<512x32xf32, #tpu.memory_space<vmem>>, %arg6: memref<104x32xf32, #tpu.memory_space<vmem>>, %arg7: memref<1x256xf32, #tpu.memory_space<vmem>>, %arg8: memref<16x256xf32, #tpu.memory_space<vmem>>) attributes {dimension_semantics = [#tpu.dimension_semantics<parallel>], iteration_bounds = array<i64: 1>, scalar_prefetch = 0 : i64, scratch_operands = 0 : i64, tpu.core_type = #tpu.core_type<tc>, window_params = [{transform_indices = @transform_0, window_bounds = array<i64: 256, 512>}, {transform_indices = @transform_1, window_bounds = array<i64: 256, 16>}, {pipeline_mode = #tpu.pipeline_mode<synchronous>, transform_indices = @transform_2, window_bounds = array<i64: 512, 16>}, {pipeline_mode = #tpu.pipeline_mode<synchronous>, transform_indices = @transform_3, window_bounds = array<i64: 16, 512>}, {pipeline_mode = #tpu.pipeline_mode<synchronous>, transform_indices = @transform_4, window_bounds = array<i64: 512, 32>}, {pipeline_mode = #tpu.pipeline_mode<synchronous>, transform_indices = @transform_5, window_bounds = array<i64: 104, 32>}, {transform_indices = @transform_6, window_bounds = array<i64: 1, 256>}, {transform_indices = @transform_7, window_bounds = array<i64: 16, 256>}]} {
    %c0 = arith.constant 0 : index
    %c0_0 = arith.constant 0 : index
    %0 = vector.load %arg1[%c0, %c0_0] : memref<256x512xf32, #tpu.memory_space<vmem>>, vector<256x512xf32>
    %c0_1 = arith.constant 0 : index
    %c0_2 = arith.constant 0 : index
    %1 = vector.load %arg2[%c0_1, %c0_2] : memref<256x16xf32, #tpu.memory_space<vmem>>, vector<256x16xf32>
    %c0_3 = arith.constant 0 : index
    %c0_4 = arith.constant 0 : index
    %2 = vector.load %arg6[%c0_3, %c0_4] : memref<104x32xf32, #tpu.memory_space<vmem>>, vector<104x32xf32>
    %3 = vector.extract_strided_slice %2 {offsets = [103, 0], sizes = [1, 32], strides = [1, 1]} : vector<104x32xf32> to vector<1x32xf32>
    %4 = vector.extract_strided_slice %3 {offsets = [0, 0], sizes = [1, 1], strides = [1, 1]} : vector<1x32xf32> to vector<1x1xf32>
    %c0_5 = arith.constant 0 : index
    %c0_6 = arith.constant 0 : index
    %5 = vector.load %arg3[%c0_5, %c0_6] : memref<512x16xf32, #tpu.memory_space<vmem>>, vector<512x16xf32>
    %cst = arith.constant dense<0.000000e+00> : vector<256x16xf32>
    %6 = tpu.matmul %0, %5, %cst {dimension_numbers = #tpu.dot_dimension_numbers<[1], [0], [0], [1], [0, 0, 1, 1], [], []>} : vector<256x512xf32>, vector<512x16xf32>, vector<256x16xf32> -> vector<256x16xf32>
    %7 = vector.broadcast %4 : vector<1x1xf32> to vector<256x16xf32>
    %8 = arith.addf %6, %7 : vector<256x16xf32>
    %9 = arith.negf %8 : vector<256x16xf32>
    %10 = math.exp %9 : vector<256x16xf32>
    %cst_7 = arith.constant 1.000000e+00 : f32
    %11 = vector.broadcast %cst_7 : f32 to vector<256x16xf32>
    %12 = arith.addf %11, %10 : vector<256x16xf32>
    %13 = arith.divf %11, %12 : vector<256x16xf32>
    %14 = arith.mulf %13, %1 : vector<256x16xf32>
    %15 = tpu.transpose %14, [1, 0] : vector<256x16xf32> -> vector<16x256xf32>
    %c0_8 = arith.constant 0 : index
    %c0_9 = arith.constant 0 : index
    %16 = vector.load %arg8[%c0_8, %c0_9] : memref<16x256xf32, #tpu.memory_space<vmem>>, vector<16x256xf32>
    tpu.vector_store %arg8[%c0_8, %c0_9], %15 {strides = array<i32>} : memref<16x256xf32, #tpu.memory_space<vmem>>, vector<16x256xf32>,
    %c0_10 = arith.constant 0 : index
    %c0_11 = arith.constant 0 : index
    %17 = vector.load %arg4[%c0_10, %c0_11] : memref<16x512xf32, #tpu.memory_space<vmem>>, vector<16x512xf32>
    %cst_12 = arith.constant dense<0.000000e+00> : vector<256x512xf32>
    %18 = tpu.matmul %14, %17, %cst_12 {dimension_numbers = #tpu.dot_dimension_numbers<[1], [0], [0], [1], [0, 0, 1, 1], [], []>} : vector<256x16xf32>, vector<16x512xf32>, vector<256x512xf32> -> vector<256x512xf32>
    %19 = arith.mulf %0, %18 : vector<256x512xf32>
    %c0_13 = arith.constant 0 : index
    %c0_14 = arith.constant 0 : index
    %20 = vector.load %arg5[%c0_13, %c0_14] : memref<512x32xf32, #tpu.memory_space<vmem>>, vector<512x32xf32>
    %cst_15 = arith.constant dense<0.000000e+00> : vector<256x32xf32>
    %21 = tpu.matmul %19, %20, %cst_15 {dimension_numbers = #tpu.dot_dimension_numbers<[1], [0], [0], [1], [0, 0, 1, 1], [], []>} : vector<256x512xf32>, vector<512x32xf32>, vector<256x32xf32> -> vector<256x32xf32>
    %22 = vector.extract_strided_slice %2 {offsets = [0, 0], sizes = [32, 32], strides = [1, 1]} : vector<104x32xf32> to vector<32x32xf32>
    %23 = vector.extract_strided_slice %2 {offsets = [96, 0], sizes = [1, 32], strides = [1, 1]} : vector<104x32xf32> to vector<1x32xf32>
    %24 = vector.extract_strided_slice %2 {offsets = [99, 0], sizes = [1, 32], strides = [1, 1]} : vector<104x32xf32> to vector<1x32xf32>
    %cst_16 = arith.constant dense<0.000000e+00> : vector<256x32xf32>
    %25 = tpu.matmul %21, %22, %cst_16 {dimension_numbers = #tpu.dot_dimension_numbers<[1], [0], [0], [1], [0, 0, 1, 1], [], []>} : vector<256x32xf32>, vector<32x32xf32>, vector<256x32xf32> -> vector<256x32xf32>
    %26 = vector.broadcast %23 : vector<1x32xf32> to vector<256x32xf32>
    %27 = arith.addf %25, %26 : vector<256x32xf32>
    %cst_17 = arith.constant 0.000000e+00 : f32
    %28 = vector.broadcast %cst_17 : f32 to vector<256x32xf32>
    %29 = arith.cmpf ogt, %27, %28 : vector<256x32xf32>
    %30 = vector.broadcast %24 : vector<1x32xf32> to vector<256x32xf32>
    %31 = arith.mulf %30, %27 : vector<256x32xf32>
    %32 = arith.select %29, %27, %31 : vector<256x32xi1>, vector<256x32xf32>
    %33 = vector.extract_strided_slice %2 {offsets = [32, 0], sizes = [32, 32], strides = [1, 1]} : vector<104x32xf32> to vector<32x32xf32>
    %34 = vector.extract_strided_slice %2 {offsets = [97, 0], sizes = [1, 32], strides = [1, 1]} : vector<104x32xf32> to vector<1x32xf32>
    %35 = vector.extract_strided_slice %2 {offsets = [100, 0], sizes = [1, 32], strides = [1, 1]} : vector<104x32xf32> to vector<1x32xf32>
    %cst_18 = arith.constant dense<0.000000e+00> : vector<256x32xf32>
    %36 = tpu.matmul %32, %33, %cst_18 {dimension_numbers = #tpu.dot_dimension_numbers<[1], [0], [0], [1], [0, 0, 1, 1], [], []>} : vector<256x32xf32>, vector<32x32xf32>, vector<256x32xf32> -> vector<256x32xf32>
    %37 = vector.broadcast %34 : vector<1x32xf32> to vector<256x32xf32>
    %38 = arith.addf %36, %37 : vector<256x32xf32>
    %cst_19 = arith.constant 0.000000e+00 : f32
    %39 = vector.broadcast %cst_19 : f32 to vector<256x32xf32>
    %40 = arith.cmpf ogt, %38, %39 : vector<256x32xf32>
    %41 = vector.broadcast %35 : vector<1x32xf32> to vector<256x32xf32>
    %42 = arith.mulf %41, %38 : vector<256x32xf32>
    %43 = arith.select %40, %38, %42 : vector<256x32xi1>, vector<256x32xf32>
    %44 = vector.extract_strided_slice %2 {offsets = [64, 0], sizes = [32, 32], strides = [1, 1]} : vector<104x32xf32> to vector<32x32xf32>
    %45 = vector.extract_strided_slice %2 {offsets = [98, 0], sizes = [1, 32], strides = [1, 1]} : vector<104x32xf32> to vector<1x32xf32>
    %46 = vector.extract_strided_slice %2 {offsets = [101, 0], sizes = [1, 32], strides = [1, 1]} : vector<104x32xf32> to vector<1x32xf32>
    %cst_20 = arith.constant dense<0.000000e+00> : vector<256x32xf32>
    %47 = tpu.matmul %43, %44, %cst_20 {dimension_numbers = #tpu.dot_dimension_numbers<[1], [0], [0], [1], [0, 0, 1, 1], [], []>} : vector<256x32xf32>, vector<32x32xf32>, vector<256x32xf32> -> vector<256x32xf32>
    %48 = vector.broadcast %45 : vector<1x32xf32> to vector<256x32xf32>
    %49 = arith.addf %47, %48 : vector<256x32xf32>
    %cst_21 = arith.constant 0.000000e+00 : f32
    %50 = vector.broadcast %cst_21 : f32 to vector<256x32xf32>
    %51 = arith.cmpf ogt, %49, %50 : vector<256x32xf32>
    %52 = vector.broadcast %46 : vector<1x32xf32> to vector<256x32xf32>
    %53 = arith.mulf %52, %49 : vector<256x32xf32>
    %54 = arith.select %51, %49, %53 : vector<256x32xi1>, vector<256x32xf32>
    %55 = vector.extract_strided_slice %2 {offsets = [102, 0], sizes = [1, 32], strides = [1, 1]} : vector<104x32xf32> to vector<1x32xf32>
    %56 = vector.extract_strided_slice %3 {offsets = [0, 1], sizes = [1, 1], strides = [1, 1]} : vector<1x32xf32> to vector<1x1xf32>
    "tpu.trace_start"() <{level = 10 : i32, message = "th,bh->tb"}> : () -> ()
    %cst_22 = arith.constant dense<0.000000e+00> : vector<1x256xf32>
    %57 = tpu.matmul %55, %54, %cst_22 {dimension_numbers = #tpu.dot_dimension_numbers<[1], [1], [0], [0], [0, 0, 1, 0], [], []>} : vector<1x32xf32>, vector<256x32xf32>, vector<1x256xf32> -> vector<1x256xf32>
    "tpu.trace_stop"() : () -> ()
    %58 = vector.broadcast %56 : vector<1x1xf32> to vector<1x256xf32>
    %59 = arith.addf %57, %58 : vector<1x256xf32>
    %c0_23 = arith.constant 0 : index
    %c0_24 = arith.constant 0 : index
    %60 = vector.load %arg7[%c0_23, %c0_24] : memref<1x256xf32, #tpu.memory_space<vmem>>, vector<1x256xf32>
    tpu.vector_store %arg7[%c0_23, %c0_24], %59 {strides = array<i32>} : memref<1x256xf32, #tpu.memory_space<vmem>>, vector<1x256xf32>,
    return
  }
  func.func @transform_0(%arg0: i32) -> (i32, i32) {
    %c0_i32 = arith.constant 0 : i32
    %c0_i32_0 = arith.constant 0 : i32
    return %arg0, %c0_i32 : i32, i32
  }
  func.func @transform_1(%arg0: i32) -> (i32, i32) {
    %c0_i32 = arith.constant 0 : i32
    %c0_i32_0 = arith.constant 0 : i32
    return %arg0, %c0_i32 : i32, i32
  }
  func.func @transform_2(%arg0: i32) -> (i32, i32) {
    %c0_i32 = arith.constant 0 : i32
    %c0_i32_0 = arith.constant 0 : i32
    %c0_i32_1 = arith.constant 0 : i32
    return %c0_i32, %c0_i32_0 : i32, i32
  }
  func.func @transform_3(%arg0: i32) -> (i32, i32) {
    %c0_i32 = arith.constant 0 : i32
    %c0_i32_0 = arith.constant 0 : i32
    %c0_i32_1 = arith.constant 0 : i32
    return %c0_i32, %c0_i32_0 : i32, i32
  }
  func.func @transform_4(%arg0: i32) -> (i32, i32) {
    %c0_i32 = arith.constant 0 : i32
    %c0_i32_0 = arith.constant 0 : i32
    %c0_i32_1 = arith.constant 0 : i32
    return %c0_i32, %c0_i32_0 : i32, i32
  }
  func.func @transform_5(%arg0: i32) -> (i32, i32) {
    %c0_i32 = arith.constant 0 : i32
    %c0_i32_0 = arith.constant 0 : i32
    %c0_i32_1 = arith.constant 0 : i32
    return %c0_i32, %c0_i32_0 : i32, i32
  }
  func.func @transform_6(%arg0: i32) -> (i32, i32) {
    %c0_i32 = arith.constant 0 : i32
    %c0_i32_0 = arith.constant 0 : i32
    return %c0_i32, %arg0 : i32, i32
  }
  func.func @transform_7(%arg0: i32) -> (i32, i32) {
    %c0_i32 = arith.constant 0 : i32
    %c0_i32_0 = arith.constant 0 : i32
    return %c0_i32, %arg0 : i32, i32
  }
}

</mosaic_0001>

<bundles_post_ra>
// kernel: basegnn_forward.1
= control target key start
LH: loop header
LB: loop body
LE: loop exit
PB: predicated region body
PF: predicated region fallthrough
CT: control target
= control target key end

     0   :  { %v4589_v2 = vmov 0.0   ;;  %s6932_s0 = inlined_call_operand.vmem [shape: f32[256,512], index: 0, kind: input, shape index: {}]   ;;  %s6933_s1 = inlined_call_operand.vmem [shape: f32[256,16], index: 1, kind: input, shape index: {}]   ;;  %s6934_s2 = inlined_call_operand.vmem [shape: f32[512,16], index: 2, kind: input, shape index: {}]   ;;  %s6935_s3 = inlined_call_operand.vmem [shape: f32[16,512], index: 3, kind: input, shape index: {}]   ;;  %s6936_s4 = inlined_call_operand.vmem [shape: f32[512,32], index: 4, kind: input, shape index: {}]   ;;  %s6937_s5 = inlined_call_operand.vmem [shape: f32[104,32], index: 5, kind: input, shape index: {}]   ;;  %s6938_s6 = inlined_call_operand.hbm [shape: f32[1,256], index: 6, kind: output, shape index: {0}]   ;;  %s6939_s7 = inlined_call_operand.vmem [shape: f32[16,256], index: 7, kind: output, shape index: {1}]  }
   0x1   :  { %v214_v0 = vld [vmem:[%s6934_s2 + $0x78] sm:$0xff]  ;;  %268 = vmatprep.subr.mxu0 %v4589_v2  ;;  %493 = vmatprep.subr.mxu1 %v4589_v2  ;;  %v213_v3 = vld [vmem:[%s6934_s2 + $0x70] sm:$0xff]  ;;  %v212_v5 = vld [vmem:[%s6934_s2 + $0x68] sm:$0xff] }
   0x2   :  { %v246_v1 = vld [vmem:[%s6934_s2 + $0x178] sm:$0xff]  ;;  %v245_v4 = vld [vmem:[%s6934_s2 + $0x170] sm:$0xff]  ;;  %269 = vmatpush1.msra.mxu0 %v214_v0  ;;  %v244_v6 = vld [vmem:[%s6934_s2 + $0x168] sm:$0xff] }
   0x3   :  { %494 = vmatpush1.msra.mxu1 %v246_v1  ;;  %270 = vmatprep.subr.mxu0 %v4589_v2  ;;  %v211_v7 = vld [vmem:[%s6934_s2 + $0x60] sm:$0xff]  ;;  %v210_v9 = vld [vmem:[%s6934_s2 + $0x58] sm:$0xff]  ;;  %v209_v11 = vld [vmem:[%s6934_s2 + $0x50] sm:$0xff] }
   0x4   :  { %495 = vmatprep.subr.mxu1 %v4589_v2  ;;  %271 = vmatpush1.msra.mxu0 %v213_v3  ;;  %v243_v8 = vld [vmem:[%s6934_s2 + $0x160] sm:$0xff]  ;;  %v242_v10 = vld [vmem:[%s6934_s2 + $0x158] sm:$0xff]  ;;  %v241_v12 = vld [vmem:[%s6934_s2 + $0x150] sm:$0xff] }
   0x5   :  { %496 = vmatpush1.msra.mxu1 %v245_v4  ;;  %272 = vmatprep.subr.mxu0 %v4589_v2  ;;  %v208_v13 = vld [vmem:[%s6934_s2 + $0x48] sm:$0xff]  ;;  %v207_v15 = vld [vmem:[%s6934_s2 + $0x40] sm:$0xff]  ;;  %v206_v17 = vld [vmem:[%s6934_s2 + $0x38] sm:$0xff] }
   0x6   :  { %497 = vmatprep.subr.mxu1 %v4589_v2  ;;  %273 = vmatpush1.msra.mxu0 %v212_v5  ;;  %v240_v14 = vld [vmem:[%s6934_s2 + $0x148] sm:$0xff]  ;;  %v239_v16 = vld [vmem:[%s6934_s2 + $0x140] sm:$0xff]  ;;  %v238_v18 = vld [vmem:[%s6934_s2 + $0x138] sm:$0xff] }
   0x7   :  { %498 = vmatpush1.msra.mxu1 %v244_v6  ;;  %274 = vmatprep.subr.mxu0 %v4589_v2  ;;  %v205_v19 = vld [vmem:[%s6934_s2 + $0x30] sm:$0xff]  ;;  %v204_v21 = vld [vmem:[%s6934_s2 + $0x28] sm:$0xff]  ;;  %v203_v23 = vld [vmem:[%s6934_s2 + $0x20] sm:$0xff] }
   0x8   :  { %499 = vmatprep.subr.mxu1 %v4589_v2  ;;  %275 = vmatpush1.msra.mxu0 %v211_v7  ;;  %v237_v20 = vld [vmem:[%s6934_s2 + $0x130] sm:$0xff]  ;;  %v236_v22 = vld [vmem:[%s6934_s2 + $0x128] sm:$0xff]  ;;  %v235_v24 = vld [vmem:[%s6934_s2 + $0x120] sm:$0xff] }
   0x9   :  { %500 = vmatpush1.msra.mxu1 %v243_v8  ;;  %276 = vmatprep.subr.mxu0 %v4589_v2  ;;  %v202_v25 = vld [vmem:[%s6934_s2 + $0x18] sm:$0xff]  ;;  %v201_v27 = vld [vmem:[%s6934_s2 + $0x10] sm:$0xff]  ;;  %v200_v29 = vld [vmem:[%s6934_s2 + $0x8] sm:$0xff] }
   0xa   :  { %501 = vmatprep.subr.mxu1 %v4589_v2  ;;  %277 = vmatpush1.msra.mxu0 %v210_v9  ;;  %v234_v26 = vld [vmem:[%s6934_s2 + $0x118] sm:$0xff]  ;;  %v233_v28 = vld [vmem:[%s6934_s2 + $0x110] sm:$0xff]  ;;  %v232_v30 = vld [vmem:[%s6934_s2 + $0x108] sm:$0xff] }
   0xb   :  { %502 = vmatpush1.msra.mxu1 %v242_v10  ;;  %278 = vmatprep.subr.mxu0 %v4589_v2  ;;  %v199_v31 = vld [vmem:[%s6934_s2] sm:$0xff]  ;;  %v230_v33 = vld [vmem:[%s6934_s2 + $0xf8] sm:$0xff]  ;;  %v229_v35 = vld [vmem:[%s6934_s2 + $0xf0] sm:$0xff] }
   0xc   :  { %503 = vmatprep.subr.mxu1 %v4589_v2  ;;  %279 = vmatpush1.msra.mxu0 %v209_v11  ;;  %v231_v32 = vld [vmem:[%s6934_s2 + $0x100] sm:$0xff]  ;;  %v262_v34 = vld [vmem:[%s6934_s2 + $0x1f8] sm:$0xff]  ;;  %v261_v36 = vld [vmem:[%s6934_s2 + $0x1f0] sm:$0xff] }
   0xd   :  { %504 = vmatpush1.msra.mxu1 %v241_v12  ;;  %280 = vmatprep.subr.mxu0 %v4589_v2  ;;  %v228_v37 = vld [vmem:[%s6934_s2 + $0xe8] sm:$0xff]  ;;  %v227_v39 = vld [vmem:[%s6934_s2 + $0xe0] sm:$0xff]  ;;  %v226_v41 = vld [vmem:[%s6934_s2 + $0xd8] sm:$0xff] }
   0xe   :  { %505 = vmatprep.subr.mxu1 %v4589_v2  ;;  %281 = vmatpush1.msra.mxu0 %v208_v13  ;;  %v260_v38 = vld [vmem:[%s6934_s2 + $0x1e8] sm:$0xff]  ;;  %v259_v40 = vld [vmem:[%s6934_s2 + $0x1e0] sm:$0xff]  ;;  %v258_v42 = vld [vmem:[%s6934_s2 + $0x1d8] sm:$0xff] }
   0xf   :  { %506 = vmatpush1.msra.mxu1 %v240_v14  ;;  %282 = vmatprep.subr.mxu0 %v4589_v2  ;;  %v225_v43 = vld [vmem:[%s6934_s2 + $0xd0] sm:$0xff]  ;;  %v224_v45 = vld [vmem:[%s6934_s2 + $0xc8] sm:$0xff]  ;;  %v223_v47 = vld [vmem:[%s6934_s2 + $0xc0] sm:$0xff] }
  0x10   :  { %507 = vmatprep.subr.mxu1 %v4589_v2  ;;  %283 = vmatpush1.msra.mxu0 %v207_v15  ;;  %v257_v44 = vld [vmem:[%s6934_s2 + $0x1d0] sm:$0xff]  ;;  %v256_v46 = vld [vmem:[%s6934_s2 + $0x1c8] sm:$0xff]  ;;  %v255_v48 = vld [vmem:[%s6934_s2 + $0x1c0] sm:$0xff] }
  0x11   :  { %508 = vmatpush1.msra.mxu1 %v239_v16  ;;  %284 = vmatprep.subr.mxu0 %v4589_v2  ;;  %v222_v49 = vld [vmem:[%s6934_s2 + $0xb8] sm:$0xff]  ;;  %v221_v51 = vld [vmem:[%s6934_s2 + $0xb0] sm:$0xff]  ;;  %v220_v53 = vld [vmem:[%s6934_s2 + $0xa8] sm:$0xff] }
  0x12   :  { %509 = vmatprep.subr.mxu1 %v4589_v2  ;;  %285 = vmatpush1.msra.mxu0 %v206_v17  ;;  %v254_v50 = vld [vmem:[%s6934_s2 + $0x1b8] sm:$0xff]  ;;  %v253_v52 = vld [vmem:[%s6934_s2 + $0x1b0] sm:$0xff]  ;;  %v252_v54 = vld [vmem:[%s6934_s2 + $0x1a8] sm:$0xff] }
  0x13   :  { %510 = vmatpush1.msra.mxu1 %v238_v18  ;;  %286 = vmatprep.subr.mxu0 %v4589_v2  ;;  %v219_v55 = vld [vmem:[%s6934_s2 + $0xa0] sm:$0xff]  ;;  %v218_v57 = vld [vmem:[%s6934_s2 + $0x98] sm:$0xff]  ;;  %v217_v59 = vld [vmem:[%s6934_s2 + $0x90] sm:$0xff] }
  0x14   :  { %511 = vmatprep.subr.mxu1 %v4589_v2  ;;  %287 = vmatpush1.msra.mxu0 %v205_v19  ;;  %v251_v56 = vld [vmem:[%s6934_s2 + $0x1a0] sm:$0xff]  ;;  %v250_v58 = vld [vmem:[%s6934_s2 + $0x198] sm:$0xff]  ;;  %v249_v60 = vld [vmem:[%s6934_s2 + $0x190] sm:$0xff] }
  0x15   :  { %512 = vmatpush1.msra.mxu1 %v237_v20  ;;  %288 = vmatprep.subr.mxu0 %v4589_v2  ;;  %v216_v61 = vld [vmem:[%s6934_s2 + $0x88] sm:$0xff]  ;;  %v215_v63 = vld [vmem:[%s6934_s2 + $0x80] sm:$0xff]  ;;  %v29_v3 = vld [vmem:[%s6932_s0 + $0x18] sm:$0xff] }
  0x16   :  { %513 = vmatprep.subr.mxu1 %v4589_v2  ;;  %289 = vmatpush1.msra.mxu0 %v204_v21  ;;  %v248_v62 = vld [vmem:[%s6934_s2 + $0x188] sm:$0xff]  ;;  %v247_v1 = vld [vmem:[%s6934_s2 + $0x180] sm:$0xff]  ;;  %v28_v5 = vld [vmem:[%s6932_s0 + $0x10] sm:$0xff] }
  0x17   :  { %514 = vmatpush1.msra.mxu1 %v236_v22  ;;  %290 = vmatprep.subr.mxu0 %v4589_v2  ;;  %v27_v0 = vld [vmem:[%s6932_s0 + $0x8] sm:$0xff]  ;;  %v26_v4 = vld [vmem:[%s6932_s0] sm:$0xff]  ;;  %v33_v7 = vld [vmem:[%s6932_s0 + $0x38] sm:$0xff] }
  0x18   :  { %515 = vmatprep.subr.mxu1 %v4589_v2  ;;  %291 = vmatpush1.msra.mxu0 %v203_v23  ;;  %v31_v6 = vld [vmem:[%s6932_s0 + $0x28] sm:$0xff]  ;;  %v4910_v8 = vld [vmem:[%s6937_s5 + $0x60] sm:$0xff] }
  0x19   :  { %516 = vmatpush1.msra.mxu1 %v235_v24  ;;  %292 = vmatprep.subr.mxu0 %v4589_v2 }
  0x1a   :  { %517 = vmatprep.subr.mxu1 %v4589_v2  ;;  %293 = vmatpush1.msra.mxu0 %v202_v25 }
  0x1b   :  { %518 = vmatpush1.msra.mxu1 %v234_v26  ;;  %294 = vmatprep.subr.mxu0 %v4589_v2 }
  0x1c   :  { %519 = vmatprep.subr.mxu1 %v4589_v2  ;;  %295 = vmatpush1.msra.mxu0 %v201_v27 }
  0x1d   :  { %520 = vmatpush1.msra.mxu1 %v233_v28  ;;  %296 = vmatprep.subr.mxu0 %v4589_v2 }
  0x1e   :  { %521 = vmatprep.subr.mxu1 %v4589_v2  ;;  %297 = vmatpush1.msra.mxu0 %v200_v29 }
  0x1f   :  { %522 = vmatpush1.msra.mxu1 %v232_v30  ;;  %298 = vmatprep.subr.mxu0 %v4589_v2 }
  0x20   :  { %523 = vmatprep.subr.mxu1 %v4589_v2  ;;  %299 = vmatpush1.msra.mxu0 %v199_v31 }
  0x21   :  { %524 = vmatpush1.msra.mxu1 %v231_v32  ;;  %300 = vmatprep.subr.mxu0 %v4589_v2 }
  0x22   :  { %525 = vmatprep.subr.mxu1 %v4589_v2  ;;  %301 = vmatpush2.msra.mxu0 %v230_v33 }
  0x23   :  { %526 = vmatpush2.msra.mxu1 %v262_v34  ;;  %302 = vmatprep.subr.mxu0 %v4589_v2 }
  0x24   :  { %527 = vmatprep.subr.mxu1 %v4589_v2  ;;  %303 = vmatpush2.msra.mxu0 %v229_v35 }
  0x25   :  { %528 = vmatpush2.msra.mxu1 %v261_v36  ;;  %304 = vmatprep.subr.mxu0 %v4589_v2 }
  0x26   :  { %529 = vmatprep.subr.mxu1 %v4589_v2  ;;  %305 = vmatpush2.msra.mxu0 %v228_v37 }
  0x27   :  { %530 = vmatpush2.msra.mxu1 %v260_v38  ;;  %306 = vmatprep.subr.mxu0 %v4589_v2 }
  0x28   :  { %531 = vmatprep.subr.mxu1 %v4589_v2  ;;  %307 = vmatpush2.msra.mxu0 %v227_v39 }
  0x29   :  { %532 = vmatpush2.msra.mxu1 %v259_v40  ;;  %308 = vmatprep.subr.mxu0 %v4589_v2 }
  0x2a   :  { %533 = vmatprep.subr.mxu1 %v4589_v2  ;;  %309 = vmatpush2.msra.mxu0 %v226_v41 }
  0x2b   :  { %534 = vmatpush2.msra.mxu1 %v258_v42  ;;  %310 = vmatprep.subr.mxu0 %v4589_v2 }
  0x2c   :  { %535 = vmatprep.subr.mxu1 %v4589_v2  ;;  %311 = vmatpush2.msra.mxu0 %v225_v43 }
  0x2d   :  { %536 = vmatpush2.msra.mxu1 %v257_v44  ;;  %312 = vmatprep.subr.mxu0 %v4589_v2 }
  0x2e   :  { %537 = vmatprep.subr.mxu1 %v4589_v2  ;;  %313 = vmatpush2.msra.mxu0 %v224_v45 }
  0x2f   :  { %538 = vmatpush2.msra.mxu1 %v256_v46  ;;  %314 = vmatprep.subr.mxu0 %v4589_v2 }
  0x30   :  { %539 = vmatprep.subr.mxu1 %v4589_v2  ;;  %315 = vmatpush2.msra.mxu0 %v223_v47 }
  0x31   :  { %540 = vmatpush2.msra.mxu1 %v255_v48  ;;  %316 = vmatprep.subr.mxu0 %v4589_v2 }
  0x32   :  { %541 = vmatprep.subr.mxu1 %v4589_v2  ;;  %317 = vmatpush2.msra.mxu0 %v222_v49 }
  0x33   :  { %542 = vmatpush2.msra.mxu1 %v254_v50  ;;  %318 = vmatprep.subr.mxu0 %v4589_v2 }
  0x34   :  { %543 = vmatprep.subr.mxu1 %v4589_v2  ;;  %319 = vmatpush2.msra.mxu0 %v221_v51 }
  0x35   :  { %544 = vmatpush2.msra.mxu1 %v253_v52  ;;  %320 = vmatprep.subr.mxu0 %v4589_v2 }
  0x36   :  { %545 = vmatprep.subr.mxu1 %v4589_v2  ;;  %321 = vmatpush2.msra.mxu0 %v220_v53 }
  0x37   :  { %546 = vmatpush2.msra.mxu1 %v252_v54  ;;  %322 = vmatprep.subr.mxu0 %v4589_v2 }
  0x38   :  { %547 = vmatprep.subr.mxu1 %v4589_v2  ;;  %323 = vmatpush2.msra.mxu0 %v219_v55 }
  0x39   :  { %548 = vmatpush2.msra.mxu1 %v251_v56  ;;  %324 = vmatprep.subr.mxu0 %v4589_v2 }
  0x3a   :  { %549 = vmatprep.subr.mxu1 %v4589_v2  ;;  %325 = vmatpush2.msra.mxu0 %v218_v57 }
  0x3b   :  { %550 = vmatpush2.msra.mxu1 %v250_v58  ;;  %326 = vmatprep.subr.mxu0 %v4589_v2 }
  0x3c   :  { %551 = vmatprep.subr.mxu1 %v4589_v2  ;;  %327 = vmatpush2.msra.mxu0 %v217_v59 }
  0x3d   :  { %552 = vmatpush2.msra.mxu1 %v249_v60  ;;  %328 = vmatprep.subr.mxu0 %v4589_v2 }
  0x3e   :  { %553 = vmatprep.subr.mxu1 %v4589_v2  ;;  %329 = vmatpush2.msra.mxu0 %v216_v61 }
  0x3f   :  { %554 = vmatpush2.msra.mxu1 %v248_v62  ;;  %330 = vmatprep.subr.mxu0 %v4589_v2 }
  0x40   :  { %555 = vmatprep.subr.mxu1 %v4589_v2  ;;  %331 = vmatpush2.msra.mxu0 %v215_v63 }
  0x41   :  { %332 = vmatprep.mubr.f32.mxu0 %v27_v0 }
  0x42   :  { %13 = vsyncpa [#allocation3], 0  ;;  %556 = vmatpush2.msra.mxu1 %v247_v1  ;;  %557 = vmatprep.mubr.f32.mxu1 %v29_v3  ;;  %v264_v9 = vrot.slane %v4910_v8, 7  ;;  %v30_v10 = vld [vmem:[%s6932_s0 + $0x20] sm:$0xff]  ;;  %v32_v11 = vld [vmem:[%s6932_s0 + $0x30] sm:$0xff]  ;;  %vm1018_vm0 = vcmask 130048  }
  0x43   :  { %333 = vmatmul.mubr.f32.vlgmr.msra.gmra.mxu0 %v26_v4  ;;  %558 = vmatmul.mubr.f32.vlgmr.msra.gmra.mxu1 %v28_v5  ;;  %v35_v12 = vld [vmem:[%s6932_s0 + $0x48] sm:$0xff]  ;;  %v37_v13 = vld [vmem:[%s6932_s0 + $0x58] sm:$0xff]  ;;  %v34_v14 = vld [vmem:[%s6932_s0 + $0x40] sm:$0xff]  ;;  %vm2275_vm1 = vcmask 261120   ;;  %s4592_s10 = smov [#allocation2]  }
  0x44   :  { %337 = vmatprep.mubr.f32.mxu0 %v31_v6  ;;  %562 = vmatprep.mubr.f32.mxu1 %v33_v7  ;;  %4302 = vpush %v264_v9  ;;  %v36_v15 = vld [vmem:[%s6932_s0 + $0x50] sm:$0xff]  ;;  %v39_v16 = vld [vmem:[%s6932_s0 + $0x68] sm:$0xff]  ;;  %v41_v17 = vld [vmem:[%s6932_s0 + $0x78] sm:$0xff]  ;;  %s3751_s11 = sshll.u32 %s4592_s10, 4  ;;  %s3752_s11 = int_to_ptr.vmem [resolvable:$true] %s3751_s11 }
  0x45   :  { %v38_v18 = vld [vmem:[%s6932_s0 + $0x60] sm:$0xff]  ;;  %v40_v19 = vld [vmem:[%s6932_s0 + $0x70] sm:$0xff]  ;;  %v43_v20 = vld [vmem:[%s6932_s0 + $0x88] sm:$0xff]  ;;  %p4572_p1 = scmp.lt.s32.totalorder %s3752_s11, %s3752_s11 }
  0x46   :  { %v45_v21 = vld [vmem:[%s6932_s0 + $0x98] sm:$0xff]  ;;  %v42_v22 = vld [vmem:[%s6932_s0 + $0x80] sm:$0xff]  ;;  %v44_v23 = vld [vmem:[%s6932_s0 + $0x90] sm:$0xff] }
  0x47   :  { %338 = vmatmul.mubr.f32.gmra.mxu0 %v30_v10  ;;  %563 = vmatmul.mubr.f32.gmra.mxu1 %v32_v11  ;;  %v47_v24 = vld [vmem:[%s6932_s0 + $0xa8] sm:$0xff]  ;;  %v49_v25 = vld [vmem:[%s6932_s0 + $0xb8] sm:$0xff]  ;;  %v46_v26 = vld [vmem:[%s6932_s0 + $0xa0] sm:$0xff] }
  0x48   :  { %342 = vmatprep.mubr.f32.mxu0 %v35_v12  ;;  %567 = vmatprep.mubr.f32.mxu1 %v37_v13  ;;  %v48_v27 = vld [vmem:[%s6932_s0 + $0xb0] sm:$0xff]  ;;  %v51_v28 = vld [vmem:[%s6932_s0 + $0xc8] sm:$0xff]  ;;  %v53_v29 = vld [vmem:[%s6932_s0 + $0xd8] sm:$0xff] }
  0x49   :  { %v50_v30 = vld [vmem:[%s6932_s0 + $0xc0] sm:$0xff]  ;;  %v52_v31 = vld [vmem:[%s6932_s0 + $0xd0] sm:$0xff]  ;;  %v55_v32 = vld [vmem:[%s6932_s0 + $0xe8] sm:$0xff] }
  0x4a   :  { %v57_v33 = vld [vmem:[%s6932_s0 + $0xf8] sm:$0xff]  ;;  %v54_v34 = vld [vmem:[%s6932_s0 + $0xe0] sm:$0xff]  ;;  %v56_v35 = vld [vmem:[%s6932_s0 + $0xf0] sm:$0xff] }
  0x4b   :  { %343 = vmatmul.mubr.f32.gmra.mxu0 %v34_v14  ;;  %568 = vmatmul.mubr.f32.gmra.mxu1 %v36_v15  ;;  %v59_v36 = vld [vmem:[%s6932_s0 + $0x108] sm:$0xff]  ;;  %v61_v37 = vld [vmem:[%s6932_s0 + $0x118] sm:$0xff]  ;;  %v58_v38 = vld [vmem:[%s6932_s0 + $0x100] sm:$0xff] }
  0x4c   :  { %347 = vmatprep.mubr.f32.mxu0 %v39_v16  ;;  %572 = vmatprep.mubr.f32.mxu1 %v41_v17  ;;  %v60_v39 = vld [vmem:[%s6932_s0 + $0x110] sm:$0xff]  ;;  %v63_v40 = vld [vmem:[%s6932_s0 + $0x128] sm:$0xff]  ;;  %v65_v41 = vld [vmem:[%s6932_s0 + $0x138] sm:$0xff] }
  0x4d   :  { %v62_v42 = vld [vmem:[%s6932_s0 + $0x120] sm:$0xff]  ;;  %v64_v43 = vld [vmem:[%s6932_s0 + $0x130] sm:$0xff]  ;;  %v67_v44 = vld [vmem:[%s6932_s0 + $0x148] sm:$0xff] }
  0x4e   :  { %v69_v45 = vld [vmem:[%s6932_s0 + $0x158] sm:$0xff]  ;;  %v66_v46 = vld [vmem:[%s6932_s0 + $0x140] sm:$0xff]  ;;  %v68_v47 = vld [vmem:[%s6932_s0 + $0x150] sm:$0xff] }
  0x4f   :  { %348 = vmatmul.mubr.f32.gmra.mxu0 %v38_v18  ;;  %573 = vmatmul.mubr.f32.gmra.mxu1 %v40_v19  ;;  %v71_v48 = vld [vmem:[%s6932_s0 + $0x168] sm:$0xff]  ;;  %v73_v49 = vld [vmem:[%s6932_s0 + $0x178] sm:$0xff]  ;;  %v70_v50 = vld [vmem:[%s6932_s0 + $0x160] sm:$0xff] }
  0x50   :  { %352 = vmatprep.mubr.f32.mxu0 %v43_v20  ;;  %577 = vmatprep.mubr.f32.mxu1 %v45_v21  ;;  %v72_v51 = vld [vmem:[%s6932_s0 + $0x170] sm:$0xff]  ;;  %v75_v52 = vld [vmem:[%s6932_s0 + $0x188] sm:$0xff]  ;;  %v77_v53 = vld [vmem:[%s6932_s0 + $0x198] sm:$0xff] }
  0x51   :  { %v74_v54 = vld [vmem:[%s6932_s0 + $0x180] sm:$0xff]  ;;  %v76_v55 = vld [vmem:[%s6932_s0 + $0x190] sm:$0xff]  ;;  %v79_v56 = vld [vmem:[%s6932_s0 + $0x1a8] sm:$0xff] }
  0x52   :  { %v81_v57 = vld [vmem:[%s6932_s0 + $0x1b8] sm:$0xff]  ;;  %v78_v58 = vld [vmem:[%s6932_s0 + $0x1a0] sm:$0xff]  ;;  %v80_v59 = vld [vmem:[%s6932_s0 + $0x1b0] sm:$0xff] }
  0x53   :  { %353 = vmatmul.mubr.f32.gmra.mxu0 %v42_v22  ;;  %578 = vmatmul.mubr.f32.gmra.mxu1 %v44_v23  ;;  %v83_v60 = vld [vmem:[%s6932_s0 + $0x1c8] sm:$0xff]  ;;  %v85_v61 = vld [vmem:[%s6932_s0 + $0x1d8] sm:$0xff]  ;;  %v82_v62 = vld [vmem:[%s6932_s0 + $0x1c0] sm:$0xff] }
  0x54   :  { %357 = vmatprep.mubr.f32.mxu0 %v47_v24  ;;  %582 = vmatprep.mubr.f32.mxu1 %v49_v25  ;;  %v84_v63 = vld [vmem:[%s6932_s0 + $0x1d0] sm:$0xff]  ;;  %v87_v0 = vld [vmem:[%s6932_s0 + $0x1e8] sm:$0xff]  ;;  %v89_v1 = vld [vmem:[%s6932_s0 + $0x1f8] sm:$0xff] }
  0x55   :  { %v86_v3 = vld [vmem:[%s6932_s0 + $0x1e0] sm:$0xff]  ;;  %v88_v4 = vld [vmem:[%s6932_s0 + $0x1f0] sm:$0xff]  ;;  %v91_v5 = vld [vmem:[%s6932_s0 + $0x208] sm:$0xff] }
  0x56   :  { %v93_v6 = vld [vmem:[%s6932_s0 + $0x218] sm:$0xff]  ;;  %v90_v7 = vld [vmem:[%s6932_s0 + $0x200] sm:$0xff]  ;;  %v92_v9 = vld [vmem:[%s6932_s0 + $0x210] sm:$0xff] }
  0x57   :  { %358 = vmatmul.mubr.f32.gmra.mxu0 %v46_v26  ;;  %583 = vmatmul.mubr.f32.gmra.mxu1 %v48_v27  ;;  %v95_v10 = vld [vmem:[%s6932_s0 + $0x228] sm:$0xff]  ;;  %v97_v11 = vld [vmem:[%s6932_s0 + $0x238] sm:$0xff]  ;;  %v94_v12 = vld [vmem:[%s6932_s0 + $0x220] sm:$0xff] }
  0x58   :  { %362 = vmatprep.mubr.f32.mxu0 %v51_v28  ;;  %587 = vmatprep.mubr.f32.mxu1 %v53_v29  ;;  %v96_v13 = vld [vmem:[%s6932_s0 + $0x230] sm:$0xff]  ;;  %v99_v14 = vld [vmem:[%s6932_s0 + $0x248] sm:$0xff]  ;;  %v101_v15 = vld [vmem:[%s6932_s0 + $0x258] sm:$0xff] }
  0x59   :  { %v98_v16 = vld [vmem:[%s6932_s0 + $0x240] sm:$0xff]  ;;  %v100_v17 = vld [vmem:[%s6932_s0 + $0x250] sm:$0xff]  ;;  %v103_v18 = vld [vmem:[%s6932_s0 + $0x268] sm:$0xff] }
  0x5a   :  { %v105_v19 = vld [vmem:[%s6932_s0 + $0x278] sm:$0xff]  ;;  %v102_v20 = vld [vmem:[%s6932_s0 + $0x260] sm:$0xff]  ;;  %v104_v21 = vld [vmem:[%s6932_s0 + $0x270] sm:$0xff] }
  0x5b   :  { %363 = vmatmul.mubr.f32.gmra.mxu0 %v50_v30  ;;  %588 = vmatmul.mubr.f32.gmra.mxu1 %v52_v31  ;;  %v107_v22 = vld [vmem:[%s6932_s0 + $0x288] sm:$0xff]  ;;  %v109_v23 = vld [vmem:[%s6932_s0 + $0x298] sm:$0xff]  ;;  %v106_v24 = vld [vmem:[%s6932_s0 + $0x280] sm:$0xff] }
  0x5c   :  { %367 = vmatprep.mubr.f32.mxu0 %v55_v32  ;;  %592 = vmatprep.mubr.f32.mxu1 %v57_v33  ;;  %v108_v25 = vld [vmem:[%s6932_s0 + $0x290] sm:$0xff]  ;;  %v111_v26 = vld [vmem:[%s6932_s0 + $0x2a8] sm:$0xff]  ;;  %v113_v27 = vld [vmem:[%s6932_s0 + $0x2b8] sm:$0xff] }
  0x5d   :  { %v110_v28 = vld [vmem:[%s6932_s0 + $0x2a0] sm:$0xff]  ;;  %v112_v29 = vld [vmem:[%s6932_s0 + $0x2b0] sm:$0xff]  ;;  %v115_v30 = vld [vmem:[%s6932_s0 + $0x2c8] sm:$0xff] }
  0x5e   :  { %v117_v31 = vld [vmem:[%s6932_s0 + $0x2d8] sm:$0xff]  ;;  %v114_v32 = vld [vmem:[%s6932_s0 + $0x2c0] sm:$0xff]  ;;  %v116_v33 = vld [vmem:[%s6932_s0 + $0x2d0] sm:$0xff] }
  0x5f   :  { %368 = vmatmul.mubr.f32.gmra.mxu0 %v54_v34  ;;  %593 = vmatmul.mubr.f32.gmra.mxu1 %v56_v35  ;;  %v119_v34 = vld [vmem:[%s6932_s0 + $0x2e8] sm:$0xff]  ;;  %v121_v35 = vld [vmem:[%s6932_s0 + $0x2f8] sm:$0xff] }
  0x60   :  { %372 = vmatprep.mubr.f32.mxu0 %v59_v36  ;;  %597 = vmatprep.mubr.f32.mxu1 %v61_v37  ;;  %v118_v36 = vld [vmem:[%s6932_s0 + $0x2e0] sm:$0xff]  ;;  %v120_v37 = vld [vmem:[%s6932_s0 + $0x2f0] sm:$0xff] }
  0x63   :  { %373 = vmatmul.mubr.f32.gmra.mxu0 %v58_v38  ;;  %598 = vmatmul.mubr.f32.gmra.mxu1 %v60_v39  ;;  %v123_v38 = vld [vmem:[%s6932_s0 + $0x308] sm:$0xff]  ;;  %v125_v39 = vld [vmem:[%s6932_s0 + $0x318] sm:$0xff] }
  0x64   :  { %377 = vmatprep.mubr.f32.mxu0 %v63_v40  ;;  %602 = vmatprep.mubr.f32.mxu1 %v65_v41  ;;  %v122_v40 = vld [vmem:[%s6932_s0 + $0x300] sm:$0xff]  ;;  %v124_v41 = vld [vmem:[%s6932_s0 + $0x310] sm:$0xff] }
  0x67   :  { %378 = vmatmul.mubr.f32.gmra.mxu0 %v62_v42  ;;  %603 = vmatmul.mubr.f32.gmra.mxu1 %v64_v43  ;;  %v127_v42 = vld [vmem:[%s6932_s0 + $0x328] sm:$0xff]  ;;  %v129_v43 = vld [vmem:[%s6932_s0 + $0x338] sm:$0xff] }
  0x68   :  { %382 = vmatprep.mubr.f32.mxu0 %v67_v44  ;;  %607 = vmatprep.mubr.f32.mxu1 %v69_v45  ;;  %v1015_v44 = vld [vmem:[%s6935_s3 + $0x28] sm:$0xff]  ;;  %v126_v45 = vld [vmem:[%s6932_s0 + $0x320] sm:$0xff] }
  0x69   :  { %4298 = vmatprep.subr.mxu1 %v1015_v44  ;;  %1143 = vmatprep.subr.mxu0 %v1015_v44 }
  0x6b   :  { %383 = vmatmul.mubr.f32.gmra.mxu0 %v66_v46  ;;  %608 = vmatmul.mubr.f32.gmra.mxu1 %v68_v47  ;;  %v128_v46 = vld [vmem:[%s6932_s0 + $0x330] sm:$0xff]  ;;  %v131_v47 = vld [vmem:[%s6932_s0 + $0x348] sm:$0xff] }
  0x6c   :  { %387 = vmatprep.mubr.f32.mxu0 %v71_v48  ;;  %612 = vmatprep.mubr.f32.mxu1 %v73_v49  ;;  %v133_v48 = vld [vmem:[%s6932_s0 + $0x358] sm:$0xff]  ;;  %v1014_v49 = vld [vmem:[%s6935_s3 + $0x20] sm:$0xff] }
  0x6d   :  { %4300 = vmatpush1.msra.mxu1 %v1014_v49  ;;  %1144 = vmatpush1.msra.mxu0 %v1014_v49 }
  0x6f   :  { %388 = vmatmul.mubr.f32.gmra.mxu0 %v70_v50  ;;  %613 = vmatmul.mubr.f32.gmra.mxu1 %v72_v51  ;;  %v130_v50 = vld [vmem:[%s6932_s0 + $0x340] sm:$0xff]  ;;  %v132_v51 = vld [vmem:[%s6932_s0 + $0x350] sm:$0xff] }
  0x70   :  { %392 = vmatprep.mubr.f32.mxu0 %v75_v52  ;;  %617 = vmatprep.mubr.f32.mxu1 %v77_v53  ;;  %v1011_v52 = vld [vmem:[%s6935_s3 + $0x8] sm:$0xff] }
  0x71   :  { %v135_v53 = vld [vmem:[%s6932_s0 + $0x368] sm:$0xff]  ;;  %1145 = vmatprep.subr.mxu0 %v1011_v52  ;;  %4299 = vmatprep.subr.mxu1 %v1011_v52 }
  0x73   :  { %393 = vmatmul.mubr.f32.gmra.mxu0 %v74_v54  ;;  %618 = vmatmul.mubr.f32.gmra.mxu1 %v76_v55  ;;  %v137_v54 = vld [vmem:[%s6932_s0 + $0x378] sm:$0xff]  ;;  %v1010_v55 = vld [vmem:[%s6935_s3] sm:$0xff] }
  0x74   :  { %397 = vmatprep.mubr.f32.mxu0 %v79_v56  ;;  %622 = vmatprep.mubr.f32.mxu1 %v81_v57  ;;  %v134_v56 = vld [vmem:[%s6932_s0 + $0x360] sm:$0xff]  ;;  %v136_v57 = vld [vmem:[%s6932_s0 + $0x370] sm:$0xff] }
  0x75   :  { %1146 = vmatpush1.msra.mxu0 %v1010_v55  ;;  %4301 = vmatpush1.msra.mxu1 %v1010_v55  ;;  %s4303_s16 = spop %4302 }
  0x76   :  { %1821 = vmatprep.subr.mxu0 %v4589_v2 }
  0x77   :  { %398 = vmatmul.mubr.f32.gmra.mxu0 %v78_v58  ;;  %623 = vmatmul.mubr.f32.gmra.mxu1 %v80_v59  ;;  %v139_v58 = vld [vmem:[%s6932_s0 + $0x388] sm:$0xff]  ;;  %v141_v59 = vld [vmem:[%s6932_s0 + $0x398] sm:$0xff] }
  0x78   :  { %402 = vmatprep.mubr.f32.mxu0 %v83_v60  ;;  %627 = vmatprep.mubr.f32.mxu1 %v85_v61  ;;  %v138_v60 = vld [vmem:[%s6932_s0 + $0x380] sm:$0xff]  ;;  %v140_v61 = vld [vmem:[%s6932_s0 + $0x390] sm:$0xff] }
  0x7b   :  { %403 = vmatmul.mubr.f32.gmra.mxu0 %v82_v62  ;;  %628 = vmatmul.mubr.f32.gmra.mxu1 %v84_v63  ;;  %v143_v62 = vld [vmem:[%s6932_s0 + $0x3a8] sm:$0xff]  ;;  %v145_v63 = vld [vmem:[%s6932_s0 + $0x3b8] sm:$0xff] }
  0x7c   :  { %407 = vmatprep.mubr.f32.mxu0 %v87_v0  ;;  %632 = vmatprep.mubr.f32.mxu1 %v89_v1  ;;  %v142_v0 = vld [vmem:[%s6932_s0 + $0x3a0] sm:$0xff]  ;;  %v144_v1 = vld [vmem:[%s6932_s0 + $0x3b0] sm:$0xff] }
  0x7f   :  { %408 = vmatmul.mubr.f32.gmra.mxu0 %v86_v3  ;;  %633 = vmatmul.mubr.f32.gmra.mxu1 %v88_v4  ;;  %v147_v3 = vld [vmem:[%s6932_s0 + $0x3c8] sm:$0xff]  ;;  %v149_v4 = vld [vmem:[%s6932_s0 + $0x3d8] sm:$0xff] }
  0x80   :  { %412 = vmatprep.mubr.f32.mxu0 %v91_v5  ;;  %637 = vmatprep.mubr.f32.mxu1 %v93_v6  ;;  %v146_v5 = vld [vmem:[%s6932_s0 + $0x3c0] sm:$0xff]  ;;  %v148_v6 = vld [vmem:[%s6932_s0 + $0x3d0] sm:$0xff] }
  0x83   :  { %413 = vmatmul.mubr.f32.gmra.mxu0 %v90_v7  ;;  %638 = vmatmul.mubr.f32.gmra.mxu1 %v92_v9  ;;  %v151_v7 = vld [vmem:[%s6932_s0 + $0x3e8] sm:$0xff]  ;;  %v153_v9 = vld [vmem:[%s6932_s0 + $0x3f8] sm:$0xff] }
  0x84   :  { %417 = vmatprep.mubr.f32.mxu0 %v95_v10  ;;  %642 = vmatprep.mubr.f32.mxu1 %v97_v11  ;;  %v150_v10 = vld [vmem:[%s6932_s0 + $0x3e0] sm:$0xff]  ;;  %v152_v11 = vld [vmem:[%s6932_s0 + $0x3f0] sm:$0xff] }
  0x87   :  { %418 = vmatmul.mubr.f32.gmra.mxu0 %v94_v12  ;;  %643 = vmatmul.mubr.f32.gmra.mxu1 %v96_v13  ;;  %v4590_v12 = vmov 1   ;;  %v5296_v13 = vstv %s4303_s16 }
  0x88   :  { %422 = vmatprep.mubr.f32.mxu0 %v99_v14  ;;  %647 = vmatprep.mubr.f32.mxu1 %v101_v15 }
  0x89   :  { %4308 = vset.pattern.permute.xlu1 %v4590_v12 }
  0x8a   :  { %3548 = vperm.xlu1 %4308, %v4910_v8  }
  0x8b   :  { %423 = vmatmul.mubr.f32.gmra.mxu0 %v98_v16  ;;  %648 = vmatmul.mubr.f32.gmra.mxu1 %v100_v17 }
  0x8c   :  { %427 = vmatprep.mubr.f32.mxu0 %v103_v18  ;;  %652 = vmatprep.mubr.f32.mxu1 %v105_v19 }
  0x8f   :  { %428 = vmatmul.mubr.f32.gmra.mxu0 %v102_v20  ;;  %653 = vmatmul.mubr.f32.gmra.mxu1 %v104_v21 }
  0x90   :  { %432 = vmatprep.mubr.f32.mxu0 %v107_v22  ;;  %657 = vmatprep.mubr.f32.mxu1 %v109_v23 }
  0x93   :  { %433 = vmatmul.mubr.f32.gmra.mxu0 %v106_v24  ;;  %658 = vmatmul.mubr.f32.gmra.mxu1 %v108_v25 }
  0x94   :  { %437 = vmatprep.mubr.f32.mxu0 %v111_v26  ;;  %662 = vmatprep.mubr.f32.mxu1 %v113_v27 }
  0x97   :  { %438 = vmatmul.mubr.f32.gmra.mxu0 %v110_v28  ;;  %663 = vmatmul.mubr.f32.gmra.mxu1 %v112_v29 }
  0x98   :  { %442 = vmatprep.mubr.f32.mxu0 %v115_v30  ;;  %667 = vmatprep.mubr.f32.mxu1 %v117_v31 }
  0x9b   :  { %443 = vmatmul.mubr.f32.gmra.mxu0 %v114_v32  ;;  %668 = vmatmul.mubr.f32.gmra.mxu1 %v116_v33 }
  0x9c   :  { %447 = vmatprep.mubr.f32.mxu0 %v119_v34  ;;  %672 = vmatprep.mubr.f32.mxu1 %v121_v35 }
  0x9f   :  { %448 = vmatmul.mubr.f32.gmra.mxu0 %v118_v36  ;;  %673 = vmatmul.mubr.f32.gmra.mxu1 %v120_v37 }
  0xa0   :  { %452 = vmatprep.mubr.f32.mxu0 %v123_v38  ;;  %677 = vmatprep.mubr.f32.mxu1 %v125_v39 }
  0xa3   :  { %453 = vmatmul.mubr.f32.gmra.mxu0 %v122_v40  ;;  %678 = vmatmul.mubr.f32.gmra.mxu1 %v124_v41 }
  0xa4   :  { %457 = vmatprep.mubr.f32.mxu0 %v127_v42  ;;  %682 = vmatprep.mubr.f32.mxu1 %v129_v43 }
  0xa7   :  { %458 = vmatmul.mubr.f32.gmra.mxu0 %v126_v45  ;;  %683 = vmatmul.mubr.f32.gmra.mxu1 %v128_v46 }
  0xa8   :  { %462 = vmatprep.mubr.f32.mxu0 %v131_v47  ;;  %687 = vmatprep.mubr.f32.mxu1 %v133_v48 }
  0xab   :  { %463 = vmatmul.mubr.f32.gmra.mxu0 %v130_v50  ;;  %688 = vmatmul.mubr.f32.gmra.mxu1 %v132_v51  ;;  %v1017_v50 = vld [vmem:[%s6935_s3 + $0x38] sm:$0xff] }
  0xac   :  { %467 = vmatprep.mubr.f32.mxu0 %v135_v53  ;;  %692 = vmatprep.mubr.f32.mxu1 %v137_v54 }
  0xad   :  { %1400 = vmatprep.subr.mxu1 %v1017_v50 }
  0xaf   :  { %468 = vmatmul.mubr.f32.gmra.mxu0 %v134_v56  ;;  %693 = vmatmul.mubr.f32.gmra.mxu1 %v136_v57 }
  0xb0   :  { %472 = vmatprep.mubr.f32.mxu0 %v139_v58  ;;  %697 = vmatprep.mubr.f32.mxu1 %v141_v59 }
  0xb3   :  { %473 = vmatmul.mubr.f32.gmra.mxu0 %v138_v60  ;;  %698 = vmatmul.mubr.f32.gmra.mxu1 %v140_v61 }
  0xb4   :  { %477 = vmatprep.mubr.f32.mxu0 %v143_v62  ;;  %702 = vmatprep.mubr.f32.mxu1 %v145_v63 }
  0xb7   :  { %478 = vmatmul.mubr.f32.gmra.mxu0 %v142_v0  ;;  %703 = vmatmul.mubr.f32.gmra.mxu1 %v144_v1 }
  0xb8   :  { %482 = vmatprep.mubr.f32.mxu0 %v147_v3  ;;  %707 = vmatprep.mubr.f32.mxu1 %v149_v4 }
  0xbb   :  { %483 = vmatmul.mubr.f32.gmra.mxu0 %v146_v5  ;;  %708 = vmatmul.mubr.f32.gmra.mxu1 %v148_v6 }
  0xbc   :  { %487 = vmatprep.mubr.f32.mxu0 %v151_v7  ;;  %712 = vmatprep.mubr.f32.mxu1 %v153_v9 }
  0xbf   :  { %488 = vmatmul.mubr.f32.gmra.mxu0 %v150_v10  ;;  %713 = vmatmul.mubr.f32.gmra.mxu1 %v152_v11 }
  0xc0   :  { %1179 = vmatprep.mubr.f32.mxu0 %v4589_v2  ;;  %1329 = vmatprep.mubr.f32.mxu1 %v4589_v2 }
 0x103   :  { %v334_v14 = vpop.f32.mrf.mxu0  ;;  %v559_v15 = vpop.f32.mrf.mxu1 }
 0x104   :  { %v335_v16 = vadd.f32 %v334_v14, %v5296_v13 }
 0x105   :  { %v336_v17 = vpop.f32.mrf.mxu0  ;;  %v561_v18 = vpop.f32.mrf.mxu1 }
 0x106   :  { %v560_v19 = vadd.f32 %v559_v15, %v335_v16 }
 0x107   :  { %v339_v20 = vpop.f32.mrf.mxu0  ;;  %v564_v21 = vpop.f32.mrf.mxu1 }
 0x108   :  { %v3763_v22 = vmul.f32 -1.442695, %v560_v19  ;;  %v340_v23 = vadd.f32 %v339_v20, %v5296_v13 }
 0x109   :  { %v341_v24 = vpop.f32.mrf.mxu0  ;;  %v566_v25 = vpop.f32.mrf.mxu1 }
 0x10a   :  { %4310 = vpow2.f32 %v3763_v22  ;;  %v565_v26 = vadd.f32 %v564_v21, %v340_v23  ;;  %v154_v23 = vld [vmem:[%s6933_s1] sm:$0xff] }
 0x10b   :  { %v344_v8 = vpop.f32.mrf.mxu0  ;;  %v569_v27 = vpop.f32.mrf.mxu1 }
 0x10c   :  { %v3764_v28 = vmul.f32 -1.442695, %v565_v26  ;;  %v345_v29 = vadd.f32 %v344_v8, %v5296_v13 }
 0x10d   :  { %v346_v30 = vpop.f32.mrf.mxu0  ;;  %v571_v31 = vpop.f32.mrf.mxu1 }
 0x10e   :  { %4312 = vpow2.f32 %v3764_v28  ;;  %v570_v32 = vadd.f32 %v569_v27, %v345_v29 }
 0x10f   :  { %v349_v33 = vpop.f32.mrf.mxu0  ;;  %v574_v34 = vpop.f32.mrf.mxu1 }
 0x110   :  { %v3765_v35 = vmul.f32 -1.442695, %v570_v32  ;;  %v350_v36 = vadd.f32 %v349_v33, %v5296_v13 }
 0x111   :  { %v351_v37 = vpop.f32.mrf.mxu0  ;;  %v576_v38 = vpop.f32.mrf.mxu1 }
 0x112   :  { %4314 = vpow2.f32 %v3765_v35  ;;  %v575_v39 = vadd.f32 %v574_v34, %v350_v36  ;;  %v155_v34 = vld [vmem:[%s6933_s1 + $0x8] sm:$0xff] }
 0x113   :  { %v354_v40 = vpop.f32.mrf.mxu0  ;;  %v579_v41 = vpop.f32.mrf.mxu1 }
 0x114   :  { %v3766_v42 = vmul.f32 -1.442695, %v575_v39  ;;  %v355_v43 = vadd.f32 %v354_v40, %v5296_v13 }
 0x115   :  { %v356_v44 = vpop.f32.mrf.mxu0  ;;  %v581_v45 = vpop.f32.mrf.mxu1 }
 0x116   :  { %4316 = vpow2.f32 %v3766_v42  ;;  %v580_v46 = vadd.f32 %v579_v41, %v355_v43 }
 0x117   :  { %v4311_v47 = vpop.eup %4310  ;;  %v359_v48 = vpop.f32.mrf.mxu0 }
 0x118   :  { %v584_v49 = vpop.f32.mrf.mxu1  ;;  %v814_v51 = vadd.f32 1.0, %v4311_v47  ;;  %v3767_v52 = vmul.f32 -1.442695, %v580_v46  ;;  %v360_v53 = vadd.f32 %v359_v48, %v5296_v13  ;;  %v156_v46 = vld [vmem:[%s6933_s1 + $0x10] sm:$0xff] }
 0x119   :  { %v361_v54 = vpop.f32.mrf.mxu0 }
 0x11a   :  { %v586_v55 = vpop.f32.mrf.mxu1  ;;  %4318 = vrcp.f32 %v814_v51  ;;  %v585_v56 = vadd.f32 %v584_v49, %v360_v53 }
 0x11b   :  { %v4313_v57 = vpop.eup %4312  ;;  %4320 = vpow2.f32 %v3767_v52  ;;  %v364_v58 = vpop.f32.mrf.mxu0  ;;  %v1772_v55 = vld [vmem:[%s6936_s4 + $0x78] sm:$0xff] }
 0x11c   :  { %v589_v59 = vpop.f32.mrf.mxu1  ;;  %v815_v60 = vadd.f32 1.0, %v4313_v57  ;;  %v3768_v61 = vmul.f32 -1.442695, %v585_v56  ;;  %v365_v62 = vadd.f32 %v364_v58, %v5296_v13 }
 0x11d   :  { %v366_v63 = vpop.f32.mrf.mxu0 }
 0x11e   :  { %v591_v0 = vpop.f32.mrf.mxu1  ;;  %4322 = vrcp.f32 %v815_v60  ;;  %v590_v1 = vadd.f32 %v589_v59, %v365_v62  ;;  %v157_v59 = vld [vmem:[%s6933_s1 + $0x18] sm:$0xff] }
 0x11f   :  { %v4315_v3 = vpop.eup %4314  ;;  %4324 = vpow2.f32 %v3768_v61  ;;  %v369_v4 = vpop.f32.mrf.mxu0  ;;  %v1771_v0 = vld [vmem:[%s6936_s4 + $0x70] sm:$0xff] }
 0x120   :  { %v594_v5 = vpop.f32.mrf.mxu1  ;;  %v816_v6 = vadd.f32 1.0, %v4315_v3  ;;  %v3769_v7 = vmul.f32 -1.442695, %v590_v1  ;;  %v370_v9 = vadd.f32 %v369_v4, %v5296_v13 }
 0x121   :  { %v371_v10 = vpop.f32.mrf.mxu0 }
 0x122   :  { %v596_v11 = vpop.f32.mrf.mxu1  ;;  %4326 = vrcp.f32 %v816_v6  ;;  %v595_v14 = vadd.f32 %v594_v5, %v370_v9  ;;  %v1770_v6 = vld [vmem:[%s6936_s4 + $0x68] sm:$0xff] }
 0x123   :  { %v4317_v15 = vpop.eup %4316  ;;  %4328 = vpow2.f32 %v3769_v7  ;;  %v374_v16 = vpop.f32.mrf.mxu0 }
 0x124   :  { %v599_v17 = vpop.f32.mrf.mxu1  ;;  %v817_v18 = vadd.f32 1.0, %v4317_v15  ;;  %v3770_v19 = vmul.f32 -1.442695, %v595_v14  ;;  %v375_v20 = vadd.f32 %v374_v16, %v5296_v13  ;;  %v158_v14 = vld [vmem:[%s6933_s1 + $0x20] sm:$0xff] }
 0x125   :  { %v376_v21 = vpop.f32.mrf.mxu0 }
 0x126   :  { %v601_v22 = vpop.f32.mrf.mxu1  ;;  %4330 = vrcp.f32 %v817_v18  ;;  %v600_v24 = vadd.f32 %v599_v17, %v375_v20  ;;  %v1769_v18 = vld [vmem:[%s6936_s4 + $0x60] sm:$0xff] }
 0x127   :  { %v4319_v25 = vpop.eup %4318  ;;  %4332 = vpow2.f32 %v3770_v19  ;;  %v379_v26 = vpop.f32.mrf.mxu0 }
 0x128   :  { %v604_v8 = vpop.f32.mrf.mxu1  ;;  %v4321_v27 = vpop.eup %4320  ;;  %v3771_v28 = vmul.f32 -1.442695, %v600_v24  ;;  %v380_v29 = vadd.f32 %v379_v26, %v5296_v13  ;;  %v5314_v30 = vmul.f32 %v4319_v25, %v154_v23  ;;  %v1768_v26 = vld [vmem:[%s6936_s4 + $0x58] sm:$0xff] }
 0x129   :  { %v818_v31 = vadd.f32 1.0, %v4321_v27  ;;  %v381_v32 = vpop.f32.mrf.mxu0  ;;  %v159_v27 = vld [vmem:[%s6933_s1 + $0x28] sm:$0xff] }
 0x12a   :  { %v606_v33 = vpop.f32.mrf.mxu1  ;;  %4334 = vpow2.f32 %v3771_v28  ;;  %v605_v35 = vadd.f32 %v604_v8, %v380_v29  ;;  %942 = vxpose.xlu0.b32.start [1/16] (narrow) %v5314_v30, 16  ;;  %3795 = vmatmul.mubr.msk.f32.vlgmr.msra.gmra.mxu0 %vm1018_vm0, %v5314_v30  ;;  %v1767_v32 = vld [vmem:[%s6936_s4 + $0x50] sm:$0xff] }
 0x12b   :  { %v4323_v36 = vpop.eup %4322  ;;  %4336 = vrcp.f32 %v818_v31  ;;  %v384_v37 = vpop.f32.mrf.mxu0  ;;  %1185 = vmatprep.mubr.f32.mxu0 %v4589_v2  ;;  %1822 = vmatpush1.msra.mxu0 %v1772_v55  ;;  %v1765_v55 = vld [vmem:[%s6936_s4 + $0x40] sm:$0xff] }
 0x12c   :  { %v609_v38 = vpop.f32.mrf.mxu1  ;;  %v4325_v39 = vpop.eup %4324  ;;  %v3772_v40 = vmul.f32 -1.442695, %v605_v35  ;;  %v385_v41 = vadd.f32 %v384_v37, %v5296_v13  ;;  %v5324_v42 = vmul.f32 %v4323_v36, %v155_v34  ;;  %1823 = vmatprep.subr.mxu0 %v4589_v2 }
 0x12d   :  { %v819_v43 = vadd.f32 1.0, %v4325_v39  ;;  %v386_v44 = vpop.f32.mrf.mxu0  ;;  %1824 = vmatpush1.msra.mxu0 %v1771_v0 }
 0x12e   :  { %v611_v45 = vpop.f32.mrf.mxu1  ;;  %4338 = vpow2.f32 %v3772_v40  ;;  %v610_v47 = vadd.f32 %v609_v38, %v385_v41  ;;  %943 = vxpose.xlu0.b32.cont [2/16] (narrow) %v5324_v42, 16  ;;  %3796 = vmatmul.mubr.msk.f32.gmra.mxu0 %vm1018_vm0, %v5324_v42  ;;  %v160_v41 = vld [vmem:[%s6933_s1 + $0x30] sm:$0xff] }
 0x12f   :  { %v4327_v48 = vpop.eup %4326  ;;  %4340 = vrcp.f32 %v819_v43  ;;  %v389_v49 = vpop.f32.mrf.mxu0  ;;  %1191 = vmatprep.mubr.f32.mxu0 %v4589_v2  ;;  %1825 = vmatprep.subr.mxu0 %v4589_v2  ;;  %v1766_v43 = vld [vmem:[%s6936_s4 + $0x48] sm:$0xff] }
 0x130   :  { %v614_v50 = vpop.f32.mrf.mxu1  ;;  %v4329_v51 = vpop.eup %4328  ;;  %v3773_v52 = vmul.f32 -1.442695, %v610_v47  ;;  %v390_v53 = vadd.f32 %v389_v49, %v5296_v13  ;;  %v5334_v54 = vmul.f32 %v4327_v48, %v156_v46  ;;  %1826 = vmatpush1.msra.mxu0 %v1770_v6 }
 0x131   :  { %v820_v56 = vadd.f32 1.0, %v4329_v51  ;;  %v391_v57 = vpop.f32.mrf.mxu0  ;;  %1827 = vmatprep.subr.mxu0 %v4589_v2 }
 0x132   :  { %v616_v58 = vpop.f32.mrf.mxu1  ;;  %4342 = vpow2.f32 %v3773_v52  ;;  %v615_v60 = vadd.f32 %v614_v50, %v390_v53  ;;  %944 = vxpose.xlu0.b32.cont [3/16] (narrow) %v5334_v54, 16  ;;  %3797 = vmatmul.mubr.msk.f32.gmra.mxu0 %vm1018_vm0, %v5334_v54  ;;  %v161_v57 = vld [vmem:[%s6933_s1 + $0x38] sm:$0xff] }
 0x133   :  { %v4331_v61 = vpop.eup %4330  ;;  %4344 = vrcp.f32 %v820_v56  ;;  %v394_v62 = vpop.f32.mrf.mxu0  ;;  %1197 = vmatprep.mubr.f32.mxu0 %v4589_v2  ;;  %1828 = vmatpush1.msra.mxu0 %v1769_v18 }
 0x134   :  { %v619_v63 = vpop.f32.mrf.mxu1  ;;  %v4333_v1 = vpop.eup %4332  ;;  %v3774_v3 = vmul.f32 -1.442695, %v615_v60  ;;  %v395_v4 = vadd.f32 %v394_v62, %v5296_v13  ;;  %v5351_v5 = vmul.f32 %v4331_v61, %v157_v59  ;;  %1829 = vmatprep.subr.mxu0 %v4589_v2  ;;  %v1764_v61 = vld [vmem:[%s6936_s4 + $0x38] sm:$0xff] }
 0x135   :  { %v821_v7 = vadd.f32 1.0, %v4333_v1  ;;  %v396_v9 = vpop.f32.mrf.mxu0  ;;  %1830 = vmatpush1.msra.mxu0 %v1768_v26 }
 0x136   :  { %v621_v10 = vpop.f32.mrf.mxu1  ;;  %4346 = vpow2.f32 %v3774_v3  ;;  %v620_v11 = vadd.f32 %v619_v63, %v395_v4  ;;  %945 = vxpose.xlu0.b32.cont [4/16] (narrow) %v5351_v5, 16  ;;  %3798 = vmatmul.mubr.msk.f32.gmra.mxu0 %vm1018_vm0, %v5351_v5 }
 0x137   :  { %v4335_v15 = vpop.eup %4334  ;;  %4348 = vrcp.f32 %v821_v7  ;;  %v399_v16 = vpop.f32.mrf.mxu0  ;;  %1203 = vmatprep.mubr.f32.mxu0 %v4589_v2  ;;  %1831 = vmatprep.subr.mxu0 %v4589_v2  ;;  %v162_v7 = vld [vmem:[%s6933_s1 + $0x40] sm:$0xff]  ;;  %v1763_v10 = vld [vmem:[%s6936_s4 + $0x30] sm:$0xff] }
 0x138   :  { %v624_v17 = vpop.f32.mrf.mxu1  ;;  %v4337_v19 = vpop.eup %4336  ;;  %v822_v20 = vadd.f32 1.0, %v4335_v15  ;;  %v3775_v21 = vmul.f32 -1.442695, %v620_v11  ;;  %v400_v22 = vadd.f32 %v399_v16, %v5296_v13  ;;  %1832 = vmatpush1.msra.mxu0 %v1767_v32 }
 0x139   :  { %v401_v23 = vpop.f32.mrf.mxu0  ;;  %v5369_v25 = vmul.f32 %v4337_v19, %v158_v14  ;;  %1833 = vmatprep.subr.mxu0 %v4589_v2 }
 0x13a   :  { %v626_v24 = vpop.f32.mrf.mxu1  ;;  %4350 = vrcp.f32 %v822_v20  ;;  %v625_v8 = vadd.f32 %v624_v17, %v400_v22  ;;  %1834 = vmatpush1.msra.mxu0 %v1766_v43  ;;  %v163_v23 = vld [vmem:[%s6933_s1 + $0x48] sm:$0xff] }
 0x13b   :  { %v4339_v28 = vpop.eup %4338  ;;  %4352 = vpow2.f32 %v3775_v21  ;;  %946 = vxpose.xlu0.b32.cont [5/16] (narrow) %v5369_v25, 16  ;;  %3799 = vmatmul.mubr.msk.f32.gmra.mxu0 %vm1018_vm0, %v5369_v25  ;;  %v404_v29 = vpop.f32.mrf.mxu0  ;;  %v1762_v24 = vld [vmem:[%s6936_s4 + $0x28] sm:$0xff] }
 0x13c   :  { %v629_v31 = vpop.f32.mrf.mxu1  ;;  %v4341_v33 = vpop.eup %4340  ;;  %v823_v34 = vadd.f32 1.0, %v4339_v28  ;;  %v3776_v35 = vmul.f32 -1.442695, %v625_v8  ;;  %v405_v36 = vadd.f32 %v404_v29, %v5296_v13  ;;  %1209 = vmatprep.mubr.f32.mxu0 %v4589_v2  ;;  %1835 = vmatprep.subr.mxu0 %v4589_v2  ;;  %v1761_v29 = vld [vmem:[%s6936_s4 + $0x20] sm:$0xff] }
 0x13d   :  { %v406_v37 = vpop.f32.mrf.mxu0  ;;  %v5386_v39 = vmul.f32 %v4341_v33, %v159_v27  ;;  %1836 = vmatpush1.msra.mxu0 %v1765_v55  ;;  %v165_v55 = vld [vmem:[%s6933_s1 + $0x58] sm:$0xff] }
 0x13e   :  { %v631_v38 = vpop.f32.mrf.mxu1  ;;  %4354 = vrcp.f32 %v823_v34  ;;  %v630_v40 = vadd.f32 %v629_v31, %v405_v36  ;;  %1837 = vmatprep.subr.mxu0 %v4589_v2 }
 0x13f   :  { %v4343_v44 = vpop.eup %4342  ;;  %4356 = vpow2.f32 %v3776_v35  ;;  %947 = vxpose.xlu0.b32.cont [6/16] (narrow) %v5386_v39, 16  ;;  %3800 = vmatmul.mubr.msk.f32.gmra.mxu0 %vm1018_vm0, %v5386_v39  ;;  %v409_v45 = vpop.f32.mrf.mxu0  ;;  %v164_v38 = vld [vmem:[%s6933_s1 + $0x50] sm:$0xff] }
 0x140   :  { %v634_v46 = vpop.f32.mrf.mxu1  ;;  %v4345_v47 = vpop.eup %4344  ;;  %v824_v48 = vadd.f32 1.0, %v4343_v44  ;;  %v3777_v49 = vmul.f32 -1.442695, %v630_v40  ;;  %v410_v50 = vadd.f32 %v409_v45, %v5296_v13  ;;  %1215 = vmatprep.mubr.f32.mxu0 %v4589_v2  ;;  %1838 = vmatpush1.msra.mxu0 %v1764_v61  ;;  %v1758_v61 = vld [vmem:[%s6936_s4 + $0x8] sm:$0xff] }
 0x141   :  { %v411_v51 = vpop.f32.mrf.mxu0  ;;  %v5401_v53 = vmul.f32 %v4345_v47, %v160_v41  ;;  %1839 = vmatprep.subr.mxu0 %v4589_v2  ;;  %v1760_v41 = vld [vmem:[%s6936_s4 + $0x18] sm:$0xff] }
 0x142   :  { %v636_v52 = vpop.f32.mrf.mxu1  ;;  %4358 = vrcp.f32 %v824_v48  ;;  %v635_v56 = vadd.f32 %v634_v46, %v410_v50  ;;  %1840 = vmatpush1.msra.mxu0 %v1763_v10  ;;  %v166_v10 = vld [vmem:[%s6933_s1 + $0x60] sm:$0xff] }
 0x143   :  { %v4347_v58 = vpop.eup %4346  ;;  %4360 = vpow2.f32 %v3777_v49  ;;  %948 = vxpose.xlu0.b32.cont [7/16] (narrow) %v5401_v53, 16  ;;  %3801 = vmatmul.mubr.msk.f32.gmra.mxu0 %vm1018_vm0, %v5401_v53  ;;  %v414_v59 = vpop.f32.mrf.mxu0 }
 0x144   :  { %v639_v60 = vpop.f32.mrf.mxu1  ;;  %v4349_v62 = vpop.eup %4348  ;;  %v825_v63 = vadd.f32 1.0, %v4347_v58  ;;  %v3778_v0 = vmul.f32 -1.442695, %v635_v56  ;;  %v415_v1 = vadd.f32 %v414_v59, %v5296_v13  ;;  %1221 = vmatprep.mubr.f32.mxu0 %v4589_v2  ;;  %1841 = vmatprep.subr.mxu0 %v4589_v2  ;;  %v1759_v56 = vld [vmem:[%s6936_s4 + $0x10] sm:$0xff] }
 0x145   :  { %v416_v3 = vpop.f32.mrf.mxu0  ;;  %v5418_v6 = vmul.f32 %v4349_v62, %v161_v57  ;;  %1842 = vmatpush1.msra.mxu0 %v1762_v24 }
 0x146   :  { %v641_v4 = vpop.f32.mrf.mxu1  ;;  %4362 = vrcp.f32 %v825_v63  ;;  %v640_v9 = vadd.f32 %v639_v60, %v415_v1  ;;  %1843 = vmatprep.subr.mxu0 %v4589_v2 }
 0x147   :  { %v4351_v11 = vpop.eup %4350  ;;  %4364 = vpow2.f32 %v3778_v0  ;;  %949 = vxpose.xlu0.b32.cont [8/16] (narrow) %v5418_v6, 16  ;;  %3802 = vmatmul.mubr.msk.f32.gmra.mxu0 %vm1018_vm0, %v5418_v6  ;;  %v419_v14 = vpop.f32.mrf.mxu0 }
 0x148   :  { %v644_v15 = vpop.f32.mrf.mxu1  ;;  %v4353_v16 = vpop.eup %4352  ;;  %v3779_v17 = vmul.f32 -1.442695, %v640_v9  ;;  %v420_v18 = vadd.f32 %v419_v14, %v5296_v13  ;;  %1227 = vmatprep.mubr.f32.mxu0 %v4589_v2  ;;  %v5432_v19 = vmul.f32 %v4351_v11, %v162_v7  ;;  %1844 = vmatpush1.msra.mxu0 %v1761_v29  ;;  %v1757_v11 = vld [vmem:[%s6936_s4] sm:$0xff] }
 0x149   :  { %v826_v20 = vadd.f32 1.0, %v4353_v16  ;;  %v421_v21 = vpop.f32.mrf.mxu0  ;;  %1845 = vmatprep.subr.mxu0 %v4589_v2 }
 0x14a   :  { %v646_v22 = vpop.f32.mrf.mxu1  ;;  %4366 = vpow2.f32 %v3779_v17  ;;  %v645_v26 = vadd.f32 %v644_v15, %v420_v18  ;;  %1846 = vmatpush1.msra.mxu0 %v1760_v41 }
 0x14b   :  { %v4355_v8 = vpop.eup %4354  ;;  %4368 = vrcp.f32 %v826_v20  ;;  %950 = vxpose.xlu0.b32.cont [9/16] (narrow) %v5432_v19, 16  ;;  %3803 = vmatmul.mubr.msk.f32.gmra.mxu0 %vm1018_vm0, %v5432_v19  ;;  %v424_v27 = vpop.f32.mrf.mxu0 }
 0x14c   :  { %v649_v28 = vpop.f32.mrf.mxu1  ;;  %v4357_v31 = vpop.eup %4356  ;;  %v3780_v32 = vmul.f32 -1.442695, %v645_v26  ;;  %v425_v33 = vadd.f32 %v424_v27, %v5296_v13  ;;  %1233 = vmatprep.mubr.f32.mxu0 %v4589_v2  ;;  %v5450_v34 = vmul.f32 %v4355_v8, %v163_v23  ;;  %1847 = vmatprep.subr.mxu0 %v4589_v2  ;;  %v1788_v26 = vld [vmem:[%s6936_s4 + $0xf8] sm:$0xff]  ;;  %v167_v27 = vld [vmem:[%s6933_s1 + $0x68] sm:$0xff] }
 0x14d   :  { %v827_v35 = vadd.f32 1.0, %v4357_v31  ;;  %v426_v36 = vpop.f32.mrf.mxu0  ;;  %1848 = vmatpush1.msra.mxu0 %v1759_v56 }
 0x14e   :  { %v651_v37 = vpop.f32.mrf.mxu1  ;;  %4370 = vpow2.f32 %v3780_v32  ;;  %v650_v40 = vadd.f32 %v649_v28, %v425_v33  ;;  %1849 = vmatprep.subr.mxu0 %v4589_v2  ;;  %v1787_v32 = vld [vmem:[%s6936_s4 + $0xf0] sm:$0xff] }
 0x14f   :  { %v4359_v43 = vpop.eup %4358  ;;  %4372 = vrcp.f32 %v827_v35  ;;  %951 = vxpose.xlu0.b32.cont [10/16] (narrow) %v5450_v34, 16  ;;  %3804 = vmatmul.mubr.msk.f32.gmra.mxu0 %vm1018_vm0, %v5450_v34  ;;  %v429_v44 = vpop.f32.mrf.mxu0 }
 0x150   :  { %v654_v45 = vpop.f32.mrf.mxu1  ;;  %v4361_v46 = vpop.eup %4360  ;;  %v3781_v47 = vmul.f32 -1.442695, %v650_v40  ;;  %v430_v48 = vadd.f32 %v429_v44, %v5296_v13  ;;  %1239 = vmatprep.mubr.f32.mxu0 %v4589_v2  ;;  %v5464_v49 = vmul.f32 %v4359_v43, %v164_v38  ;;  %1850 = vmatpush1.msra.mxu0 %v1758_v61  ;;  %v168_v44 = vld [vmem:[%s6933_s1 + $0x70] sm:$0xff]  ;;  %v169_v61 = vld [vmem:[%s6933_s1 + $0x78] sm:$0xff] }
 0x151   :  { %v828_v50 = vadd.f32 1.0, %v4361_v46  ;;  %v431_v51 = vpop.f32.mrf.mxu0  ;;  %1851 = vmatprep.subr.mxu0 %v4589_v2 }
 0x152   :  { %v656_v52 = vpop.f32.mrf.mxu1  ;;  %4374 = vpow2.f32 %v3781_v47  ;;  %v655_v57 = vadd.f32 %v654_v45, %v430_v48  ;;  %1852 = vmatpush1.msra.mxu0 %v1757_v11  ;;  %v1786_v45 = vld [vmem:[%s6936_s4 + $0xe8] sm:$0xff] }
 0x153   :  { %v4363_v58 = vpop.eup %4362  ;;  %4376 = vrcp.f32 %v828_v50  ;;  %952 = vxpose.xlu0.b32.cont [11/16] (narrow) %v5464_v49, 16  ;;  %3805 = vmatmul.mubr.msk.f32.gmra.mxu0 %vm1018_vm0, %v5464_v49  ;;  %v434_v59 = vpop.f32.mrf.mxu0 }
 0x154   :  { %v659_v60 = vpop.f32.mrf.mxu1  ;;  %v4365_v62 = vpop.eup %4364  ;;  %v3782_v63 = vmul.f32 -1.442695, %v655_v57  ;;  %v435_v0 = vadd.f32 %v434_v59, %v5296_v13  ;;  %1245 = vmatprep.mubr.f32.mxu0 %v4589_v2  ;;  %v5482_v1 = vmul.f32 %v4363_v58, %v165_v55  ;;  %1853 = vmatprep.subr.mxu0 %v4589_v2  ;;  %v1785_v59 = vld [vmem:[%s6936_s4 + $0xe0] sm:$0xff] }
 0x155   :  { %v829_v3 = vadd.f32 1.0, %v4365_v62  ;;  %v436_v4 = vpop.f32.mrf.mxu0  ;;  %1854 = vmatpush2.msra.mxu0 %v1788_v26 }
 0x156   :  { %v661_v7 = vpop.f32.mrf.mxu1  ;;  %4378 = vpow2.f32 %v3782_v63  ;;  %v660_v9 = vadd.f32 %v659_v60, %v435_v0  ;;  %1855 = vmatprep.subr.mxu0 %v4589_v2 }
 0x157   :  { %v4367_v14 = vpop.eup %4366  ;;  %4380 = vrcp.f32 %v829_v3  ;;  %953 = vxpose.xlu0.b32.cont [12/16] (narrow) %v5482_v1, 16  ;;  %3806 = vmatmul.mubr.msk.f32.gmra.mxu0 %vm1018_vm0, %v5482_v1  ;;  %v439_v15 = vpop.f32.mrf.mxu0  ;;  %v1784_v3 = vld [vmem:[%s6936_s4 + $0xd8] sm:$0xff] }
 0x158   :  { %v664_v16 = vpop.f32.mrf.mxu1  ;;  %v4369_v17 = vpop.eup %4368  ;;  %v830_v18 = vadd.f32 1.0, %v4367_v14  ;;  %v3783_v20 = vmul.f32 -1.442695, %v660_v9  ;;  %v440_v21 = vadd.f32 %v439_v15, %v5296_v13  ;;  %1251 = vmatprep.mubr.f32.mxu0 %v4589_v2  ;;  %1856 = vmatpush2.msra.mxu0 %v1787_v32  ;;  %v171_v32 = vld [vmem:[%s6933_s1 + $0x88] sm:$0xff] }
 0x159   :  { %v441_v22 = vpop.f32.mrf.mxu0  ;;  %v5497_v24 = vmul.f32 %v4369_v17, %v166_v10  ;;  %1857 = vmatprep.subr.mxu0 %v4589_v2 }
 0x15a   :  { %v666_v23 = vpop.f32.mrf.mxu1  ;;  %4382 = vrcp.f32 %v830_v18  ;;  %v665_v8 = vadd.f32 %v664_v16, %v440_v21  ;;  %1858 = vmatpush2.msra.mxu0 %v1786_v45  ;;  %v170_v16 = vld [vmem:[%s6933_s1 + $0x80] sm:$0xff]  ;;  %v1783_v18 = vld [vmem:[%s6936_s4 + $0xd0] sm:$0xff] }
 0x15b   :  { %v4371_v28 = vpop.eup %4370  ;;  %4384 = vpow2.f32 %v3783_v20  ;;  %954 = vxpose.xlu0.b32.cont [13/16] (narrow) %v5497_v24, 16  ;;  %3807 = vmatmul.mubr.msk.f32.gmra.mxu0 %vm1018_vm0, %v5497_v24  ;;  %v444_v29 = vpop.f32.mrf.mxu0 }
 0x15c   :  { %v669_v31 = vpop.f32.mrf.mxu1  ;;  %v4373_v33 = vpop.eup %4372  ;;  %v831_v35 = vadd.f32 1.0, %v4371_v28  ;;  %v3784_v36 = vmul.f32 -1.442695, %v665_v8  ;;  %v445_v37 = vadd.f32 %v444_v29, %v5296_v13  ;;  %1257 = vmatprep.mubr.f32.mxu0 %v4589_v2  ;;  %1859 = vmatprep.subr.mxu0 %v4589_v2 }
 0x15d   :  { %v446_v38 = vpop.f32.mrf.mxu0  ;;  %v5514_v41 = vmul.f32 %v4373_v33, %v167_v27  ;;  %1860 = vmatpush2.msra.mxu0 %v1785_v59  ;;  %v1782_v33 = vld [vmem:[%s6936_s4 + $0xc8] sm:$0xff] }
 0x15e   :  { %v671_v40 = vpop.f32.mrf.mxu1  ;;  %4386 = vrcp.f32 %v831_v35  ;;  %v670_v43 = vadd.f32 %v669_v31, %v445_v37  ;;  %1861 = vmatprep.subr.mxu0 %v4589_v2 }
 0x15f   :  { %v4375_v46 = vpop.eup %4374  ;;  %4388 = vpow2.f32 %v3784_v36  ;;  %955 = vxpose.xlu0.b32.cont [14/16] (narrow) %v5514_v41, 16  ;;  %3808 = vmatmul.mubr.msk.f32.gmra.mxu0 %vm1018_vm0, %v5514_v41  ;;  %v449_v47 = vpop.f32.mrf.mxu0  ;;  %v1781_v40 = vld [vmem:[%s6936_s4 + $0xc0] sm:$0xff] }
 0x160   :  { %v674_v48 = vpop.f32.mrf.mxu1  ;;  %v4377_v50 = vpop.eup %4376  ;;  %v832_v51 = vadd.f32 1.0, %v4375_v46  ;;  %v3785_v52 = vmul.f32 -1.442695, %v670_v43  ;;  %v450_v55 = vadd.f32 %v449_v47, %v5296_v13  ;;  %1263 = vmatprep.mubr.f32.mxu0 %v4589_v2  ;;  %1862 = vmatpush2.msra.mxu0 %v1784_v3 }
 0x161   :  { %v451_v56 = vpop.f32.mrf.mxu0  ;;  %v5529_v58 = vmul.f32 %v4377_v50, %v168_v44  ;;  %1863 = vmatprep.subr.mxu0 %v4589_v2 }
 0x162   :  { %v676_v57 = vpop.f32.mrf.mxu1  ;;  %4390 = vrcp.f32 %v832_v51  ;;  %v675_v60 = vadd.f32 %v674_v48, %v450_v55  ;;  %1864 = vmatpush2.msra.mxu0 %v1783_v18  ;;  %v172_v51 = vld [vmem:[%s6933_s1 + $0x90] sm:$0xff]  ;;  %v1777_v18 = vld [vmem:[%s6936_s4 + $0xa0] sm:$0xff] }
 0x163   :  { %v4379_v62 = vpop.eup %4378  ;;  %4392 = vpow2.f32 %v3785_v52  ;;  %956 = vxpose.xlu0.b32.cont [15/16] (narrow) %v5529_v58, 16  ;;  %3809 = vmatmul.mubr.msk.f32.gmra.mxu0 %vm1018_vm0, %v5529_v58  ;;  %v454_v63 = vpop.f32.mrf.mxu0  ;;  %v1780_v52 = vld [vmem:[%s6936_s4 + $0xb8] sm:$0xff] }
 0x164   :  { %v679_v0 = vpop.f32.mrf.mxu1  ;;  %v4381_v4 = vpop.eup %4380  ;;  %v833_v7 = vadd.f32 1.0, %v4379_v62  ;;  %v3786_v9 = vmul.f32 -1.442695, %v675_v60  ;;  %v455_v10 = vadd.f32 %v454_v63, %v5296_v13  ;;  %1269 = vmatprep.mubr.f32.mxu0 %v4589_v2  ;;  %1865 = vmatprep.subr.mxu0 %v4589_v2  ;;  %v1779_v60 = vld [vmem:[%s6936_s4 + $0xb0] sm:$0xff] }
 0x165   :  { %v456_v11 = vpop.f32.mrf.mxu0  ;;  %v5546_v15 = vmul.f32 %v4381_v4, %v169_v61  ;;  %1866 = vmatpush2.msra.mxu0 %v1782_v33 }
 0x166   :  { %v681_v14 = vpop.f32.mrf.mxu1  ;;  %4394 = vrcp.f32 %v833_v7  ;;  %v680_v17 = vadd.f32 %v679_v0, %v455_v10  ;;  %1867 = vmatprep.subr.mxu0 %v4589_v2  ;;  %v1778_v10 = vld [vmem:[%s6936_s4 + $0xa8] sm:$0xff] }
 0x167   :  { %v4383_v20 = vpop.eup %4382  ;;  %4396 = vpow2.f32 %v3786_v9  ;;  %957 = vxpose.xlu0.b32.end [16/16] (narrow) %v5546_v15, 16  ;;  %3810 = vmatmul.mubr.msk.f32.gmra.mxu0 %vm1018_vm0, %v5546_v15  ;;  %v459_v21 = vpop.f32.mrf.mxu0  ;;  %v173_v9 = vld [vmem:[%s6933_s1 + $0x98] sm:$0xff] }
 0x168   :  { %v684_v22 = vpop.f32.mrf.mxu1  ;;  %v4385_v23 = vpop.eup %4384  ;;  %v3787_v26 = vmul.f32 -1.442695, %v680_v17  ;;  %v460_v8 = vadd.f32 %v459_v21, %v5296_v13  ;;  %1275 = vmatprep.mubr.f32.mxu0 %v4589_v2  ;;  %v5560_v27 = vmul.f32 %v4383_v20, %v170_v16  ;;  %1868 = vmatpush2.msra.mxu0 %v1781_v40 }
 0x169   :  { %v834_v28 = vadd.f32 1.0, %v4385_v23  ;;  %v461_v29 = vpop.f32.mrf.mxu0  ;;  %1869 = vmatprep.subr.mxu0 %v4589_v2 }
 0x16a   :  { %v686_v31 = vpop.f32.mrf.mxu1  ;;  %4398 = vpow2.f32 %v3787_v26  ;;  %v685_v35 = vadd.f32 %v684_v22, %v460_v8  ;;  %974 = vxpose.xlu1.b32.start [1/16] (narrow) %v5560_v27, 16  ;;  %1870 = vmatpush2.msra.mxu0 %v1780_v52  ;;  %v1776_v29 = vld [vmem:[%s6936_s4 + $0x98] sm:$0xff]  ;;  %v1774_v52 = vld [vmem:[%s6936_s4 + $0x88] sm:$0xff] }
 0x16b   :  { %v4387_v36 = vpop.eup %4386  ;;  %4400 = vrcp.f32 %v834_v28  ;;  %3811 = vmatmul.mubr.msk.f32.gmra.mxu0 %vm1018_vm0, %v5560_v27  ;;  %v464_v37 = vpop.f32.mrf.mxu0  ;;  %1871 = vmatprep.subr.mxu0 %v4589_v2 }
 0x16c   :  { %v689_v38 = vpop.f32.mrf.mxu1  ;;  %v4389_v43 = vpop.eup %4388  ;;  %v3788_v44 = vmul.f32 -1.442695, %v685_v35  ;;  %v465_v45 = vadd.f32 %v464_v37, %v5296_v13  ;;  %1281 = vmatprep.mubr.f32.mxu0 %v4589_v2  ;;  %v5578_v46 = vmul.f32 %v4387_v36, %v171_v32  ;;  %1872 = vmatpush2.msra.mxu0 %v1779_v60  ;;  %v174_v32 = vld [vmem:[%s6933_s1 + $0xa0] sm:$0xff]  ;;  %v1775_v37 = vld [vmem:[%s6936_s4 + $0x90] sm:$0xff] }
 0x16d   :  { %v835_v47 = vadd.f32 1.0, %v4389_v43  ;;  %v466_v48 = vpop.f32.mrf.mxu0  ;;  %1873 = vmatprep.subr.mxu0 %v4589_v2 }
 0x16e   :  { %v691_v50 = vpop.f32.mrf.mxu1  ;;  %4402 = vpow2.f32 %v3788_v44  ;;  %v690_v55 = vadd.f32 %v689_v38, %v465_v45  ;;  %975 = vxpose.xlu1.b32.cont [2/16] (narrow) %v5578_v46, 16  ;;  %1874 = vmatpush2.msra.mxu0 %v1778_v10  ;;  %v176_v10 = vld [vmem:[%s6933_s1 + $0xb0] sm:$0xff] }
 0x16f   :  { %v4391_v56 = vpop.eup %4390  ;;  %4404 = vrcp.f32 %v835_v47  ;;  %3812 = vmatmul.mubr.msk.f32.gmra.mxu0 %vm1018_vm0, %v5578_v46  ;;  %v469_v57 = vpop.f32.mrf.mxu0  ;;  %1875 = vmatprep.subr.mxu0 %v4589_v2 }
 0x170   :  { %v694_v59 = vpop.f32.mrf.mxu1  ;;  %v4393_v61 = vpop.eup %4392  ;;  %v3789_v62 = vmul.f32 -1.442695, %v690_v55  ;;  %v470_v63 = vadd.f32 %v469_v57, %v5296_v13  ;;  %1287 = vmatprep.mubr.f32.mxu0 %v4589_v2  ;;  %v5596_v0 = vmul.f32 %v4391_v56, %v172_v51  ;;  %1876 = vmatpush2.msra.mxu0 %v1777_v18  ;;  %v175_v51 = vld [vmem:[%s6933_s1 + $0xa8] sm:$0xff] }
 0x171   :  { %v836_v3 = vadd.f32 1.0, %v4393_v61  ;;  %v471_v4 = vpop.f32.mrf.mxu0  ;;  %1877 = vmatprep.subr.mxu0 %v4589_v2 }
 0x172   :  { %v696_v7 = vpop.f32.mrf.mxu1  ;;  %4406 = vpow2.f32 %v3789_v62  ;;  %v695_v11 = vadd.f32 %v694_v59, %v470_v63  ;;  %976 = vxpose.xlu1.b32.cont [3/16] (narrow) %v5596_v0, 16  ;;  %1878 = vmatpush2.msra.mxu0 %v1776_v29  ;;  %v177_v29 = vld [vmem:[%s6933_s1 + $0xb8] sm:$0xff] }
 0x173   :  { %v4395_v14 = vpop.eup %4394  ;;  %4408 = vrcp.f32 %v836_v3  ;;  %3813 = vmatmul.mubr.msk.f32.gmra.mxu0 %vm1018_vm0, %v5596_v0  ;;  %v474_v16 = vpop.f32.mrf.mxu0  ;;  %1879 = vmatprep.subr.mxu0 %v4589_v2  ;;  %v1773_v7 = vld [vmem:[%s6936_s4 + $0x80] sm:$0xff] }
 0x174   :  { %v699_v17 = vpop.f32.mrf.mxu1  ;;  %v4397_v20 = vpop.eup %4396  ;;  %v3790_v21 = vmul.f32 -1.442695, %v695_v11  ;;  %v475_v22 = vadd.f32 %v474_v16, %v5296_v13  ;;  %1293 = vmatprep.mubr.f32.mxu0 %v4589_v2  ;;  %v5614_v23 = vmul.f32 %v4395_v14, %v173_v9  ;;  %1880 = vmatpush2.msra.mxu0 %v1775_v37 }
 0x175   :  { %v837_v26 = vadd.f32 1.0, %v4397_v20  ;;  %v476_v8 = vpop.f32.mrf.mxu0  ;;  %1881 = vmatprep.subr.mxu0 %v4589_v2 }
 0x176   :  { %v701_v28 = vpop.f32.mrf.mxu1  ;;  %4410 = vpow2.f32 %v3790_v21  ;;  %v700_v31 = vadd.f32 %v699_v17, %v475_v22  ;;  %977 = vxpose.xlu1.b32.cont [4/16] (narrow) %v5614_v23, 16  ;;  %1882 = vmatpush2.msra.mxu0 %v1774_v52 }
 0x177   :  { %v4399_v33 = vpop.eup %4398  ;;  %4412 = vrcp.f32 %v837_v26  ;;  %3814 = vmatmul.mubr.msk.f32.gmra.mxu0 %vm1018_vm0, %v5614_v23  ;;  %v479_v35 = vpop.f32.mrf.mxu0  ;;  %1883 = vmatprep.subr.mxu0 %v4589_v2 }
 0x178   :  { %v704_v36 = vpop.f32.mrf.mxu1  ;;  %v4401_v38 = vpop.eup %4400  ;;  %v838_v40 = vadd.f32 1.0, %v4399_v33  ;;  %v3791_v43 = vmul.f32 -1.442695, %v700_v31  ;;  %v480_v44 = vadd.f32 %v479_v35, %v5296_v13  ;;  %1299 = vmatprep.mubr.f32.mxu0 %v4589_v2  ;;  %1884 = vmatpush2.msra.mxu0 %v1773_v7 }
 0x179   :  { %v481_v45 = vpop.f32.mrf.mxu0  ;;  %v5632_v48 = vmul.f32 %v4401_v38, %v174_v32 }
 0x17a   :  { %v706_v47 = vpop.f32.mrf.mxu1  ;;  %4414 = vrcp.f32 %v838_v40  ;;  %v705_v50 = vadd.f32 %v704_v36, %v480_v44  ;;  %v178_v36 = vld [vmem:[%s6933_s1 + $0xc0] sm:$0xff]  ;;  %v179_v44 = vld [vmem:[%s6933_s1 + $0xc8] sm:$0xff] }
 0x17b   :  { %v4403_v55 = vpop.eup %4402  ;;  %4416 = vpow2.f32 %v3791_v43  ;;  %978 = vxpose.xlu1.b32.cont [5/16] (narrow) %v5632_v48, 16  ;;  %3815 = vmatmul.mubr.msk.f32.gmra.mxu0 %vm1018_vm0, %v5632_v48  ;;  %v484_v56 = vpop.f32.mrf.mxu0 }
 0x17c   :  { %v709_v57 = vpop.f32.mrf.mxu1  ;;  %v4405_v59 = vpop.eup %4404  ;;  %v839_v60 = vadd.f32 1.0, %v4403_v55  ;;  %v3792_v61 = vmul.f32 -1.442695, %v705_v50  ;;  %v485_v62 = vadd.f32 %v484_v56, %v5296_v13  ;;  %1305 = vmatprep.mubr.f32.mxu0 %v4589_v2  ;;  %v180_v55 = vld [vmem:[%s6933_s1 + $0xd0] sm:$0xff]  ;;  %v1013_v56 = vld [vmem:[%s6935_s3 + $0x18] sm:$0xff] }
 0x17d   :  { %v486_v63 = vpop.f32.mrf.mxu0  ;;  %v5647_v4 = vmul.f32 %v4405_v59, %v175_v51  ;;  %v1016_v51 = vld [vmem:[%s6935_s3 + $0x30] sm:$0xff] }
 0x17e   :  { %v711_v3 = vpop.f32.mrf.mxu1  ;;  %4418 = vrcp.f32 %v839_v60  ;;  %v710_v9 = vadd.f32 %v709_v57, %v485_v62  ;;  %v1012_v57 = vld [vmem:[%s6935_s3 + $0x10] sm:$0xff]  ;;  %v181_v63 = vld [vmem:[%s6933_s1 + $0xd8] sm:$0xff] }
 0x17f   :  { %v4407_v11 = vpop.eup %4406  ;;  %4420 = vpow2.f32 %v3792_v61  ;;  %979 = vxpose.xlu1.b32.cont [6/16] (narrow) %v5647_v4, 16  ;;  %3816 = vmatmul.mubr.msk.f32.gmra.mxu0 %vm1018_vm0, %v5647_v4  ;;  %v489_v14 = vpop.f32.mrf.mxu0 }
 0x180   :  { %v714_v16 = vpop.f32.mrf.mxu1  ;;  %v4409_v17 = vpop.eup %4408  ;;  %v840_v18 = vadd.f32 1.0, %v4407_v11  ;;  %v3793_v20 = vmul.f32 -1.442695, %v710_v9  ;;  %v490_v21 = vadd.f32 %v489_v14, %v5296_v13  ;;  %1311 = vmatprep.mubr.f32.mxu0 %v4589_v2 }
 0x181   :  { %v491_v22 = vpop.f32.mrf.mxu0  ;;  %v5661_v8 = vmul.f32 %v4409_v17, %v176_v10 }
 0x182   :  { %v716_v26 = vpop.f32.mrf.mxu1  ;;  %4422 = vrcp.f32 %v840_v18  ;;  %v715_v28 = vadd.f32 %v714_v16, %v490_v21  ;;  %v183_v16 = vld [vmem:[%s6933_s1 + $0xe8] sm:$0xff] }
 0x183   :  { %v4411_v31 = vpop.eup %4410  ;;  %4424 = vpow2.f32 %v3793_v20  ;;  %980 = vxpose.xlu1.b32.cont [7/16] (narrow) %v5661_v8, 16  ;;  %3817 = vmatmul.mubr.msk.f32.gmra.mxu0 %vm1018_vm0, %v5661_v8  ;;  %v184_v20 = vld [vmem:[%s6933_s1 + $0xf0] sm:$0xff]  ;;  %v185_v26 = vld [vmem:[%s6933_s1 + $0xf8] sm:$0xff] }
 0x184   :  { %v4413_v13 = vpop.eup %4412  ;;  %v841_v32 = vadd.f32 1.0, %v4411_v31  ;;  %v3794_v33 = vmul.f32 -1.442695, %v715_v28  ;;  %1317 = vmatprep.mubr.f32.mxu0 %v4589_v2  ;;  %v1804_v31 = vld [vmem:[%s6936_s4 + $0x178] sm:$0xff] }
 0x185   :  { %v5670_v35 = vmul.f32 %v4413_v13, %v177_v29  ;;  %v1803_v13 = vld [vmem:[%s6936_s4 + $0x170] sm:$0xff] }
 0x186   :  { %4426 = vrcp.f32 %v841_v32  ;;  %v1802_v32 = vld [vmem:[%s6936_s4 + $0x168] sm:$0xff] }
 0x187   :  { %v4415_v37 = vpop.eup %4414  ;;  %4428 = vpow2.f32 %v3794_v33  ;;  %981 = vxpose.xlu1.b32.cont [8/16] (narrow) %v5670_v35, 16  ;;  %3818 = vmatmul.mubr.msk.f32.gmra.mxu0 %vm1018_vm0, %v5670_v35  ;;  %v1800_v33 = vld [vmem:[%s6936_s4 + $0x158] sm:$0xff] }
 0x188   :  { %v4417_v38 = vpop.eup %4416  ;;  %1323 = vmatprep.mubr.f32.mxu0 %v4589_v2  ;;  %v5679_v40 = vmul.f32 %v4415_v37, %v178_v36  ;;  %v1798_v36 = vld [vmem:[%s6936_s4 + $0x148] sm:$0xff]  ;;  %v1796_v37 = vld [vmem:[%s6936_s4 + $0x138] sm:$0xff] }
 0x189   :  { %v842_v43 = vadd.f32 1.0, %v4417_v38  ;;  %v1794_v38 = vld [vmem:[%s6936_s4 + $0x128] sm:$0xff] }
 0x18b   :  { %v4419_v45 = vpop.eup %4418  ;;  %4430 = vrcp.f32 %v842_v43  ;;  %982 = vxpose.xlu1.b32.cont [9/16] (narrow) %v5679_v40, 16  ;;  %3819 = vmatmul.mubr.msk.f32.gmra.mxu0 %vm1018_vm0, %v5679_v40  ;;  %v1792_v43 = vld [vmem:[%s6936_s4 + $0x118] sm:$0xff] }
 0x18c   :  { %v4421_v47 = vpop.eup %4420  ;;  %v5687_v50 = vmul.f32 %v4419_v45, %v179_v44  ;;  %v1790_v44 = vld [vmem:[%s6936_s4 + $0x108] sm:$0xff]  ;;  %v1820_v45 = vld [vmem:[%s6936_s4 + $0x1f8] sm:$0xff] }
 0x18d   :  { %v843_v52 = vadd.f32 1.0, %v4421_v47  ;;  %v1818_v47 = vld [vmem:[%s6936_s4 + $0x1e8] sm:$0xff] }
 0x18e   :  { %3820 = vmatmul.mubr.msk.f32.vlgmr.msra.gmra.mxu1 %vm1018_vm0, %v5687_v50 }
 0x18f   :  { %v4423_v59 = vpop.eup %4422  ;;  %4432 = vrcp.f32 %v843_v52  ;;  %983 = vxpose.xlu1.b32.cont [10/16] (narrow) %v5687_v50, 16  ;;  %1401 = vmatpush1.msra.mxu1 %v1016_v51  ;;  %v1816_v51 = vld [vmem:[%s6936_s4 + $0x1d8] sm:$0xff]  ;;  %v1814_v52 = vld [vmem:[%s6936_s4 + $0x1c8] sm:$0xff] }
 0x190   :  { %v4425_v60 = vpop.eup %4424  ;;  %1335 = vmatprep.mubr.f32.mxu1 %v4589_v2  ;;  %v5705_v61 = vmul.f32 %v4423_v59, %v180_v55  ;;  %1402 = vmatprep.subr.mxu1 %v1013_v56  ;;  %v1812_v55 = vld [vmem:[%s6936_s4 + $0x1b8] sm:$0xff]  ;;  %v1810_v56 = vld [vmem:[%s6936_s4 + $0x1a8] sm:$0xff] }
 0x191   :  { %v844_v62 = vadd.f32 1.0, %v4425_v60  ;;  %1403 = vmatpush1.msra.mxu1 %v1012_v57  ;;  %4309 = vset.pattern.permute.xlu0 %v4590_v12  ;;  %v182_v12 = vld [vmem:[%s6933_s1 + $0xe0] sm:$0xff]  ;;  %v1808_v57 = vld [vmem:[%s6936_s4 + $0x198] sm:$0xff]  ;;  %v1806_v59 = vld [vmem:[%s6936_s4 + $0x188] sm:$0xff] }
 0x192   :  { %3821 = vmatmul.mubr.msk.f32.gmra.mxu1 %vm1018_vm0, %v5705_v61  ;;  %2046 = vmatprep.subr.mxu1 %v4589_v2 }
 0x193   :  { %v4427_v3 = vpop.eup %4426  ;;  %4434 = vrcp.f32 %v844_v62  ;;  %984 = vxpose.xlu1.b32.cont [11/16] (narrow) %v5705_v61, 16  ;;  %1341 = vmatprep.mubr.f32.mxu1 %v4589_v2 }
 0x194   :  { %v4429_v7 = vpop.eup %4428  ;;  %v5716_v9 = vmul.f32 %v4427_v3, %v181_v63  ;;  %v4439_v63 = vld [vmem:[%s6932_s0] sm:$0xff] }
 0x195   :  { %v845_v10 = vadd.f32 1.0, %v4429_v7 }
 0x196   :  { %3822 = vmatmul.mubr.msk.f32.gmra.mxu1 %vm1018_vm0, %v5716_v9 }
 0x197   :  { %4436 = vrcp.f32 %v845_v10  ;;  %985 = vxpose.xlu1.b32.cont [12/16] (narrow) %v5716_v9, 16  ;;  %1347 = vmatprep.mubr.f32.mxu1 %v4589_v2 }
 0x198   :  { %v4431_v11 = vpop.eup %4430 }
 0x199   :  { %v5725_v14 = vmul.f32 %v4431_v11, %v182_v12  ;;  %v4440_v12 = vld [vmem:[%s6932_s0 + $0x28] sm:$0xff] }
 0x19b   :  { %3823 = vmatmul.mubr.msk.f32.gmra.mxu1 %vm1018_vm0, %v5725_v14  ;;  %986 = vxpose.xlu1.b32.cont [13/16] (narrow) %v5725_v14, 16 }
 0x19c   :  { %v4433_v17 = vpop.eup %4432  ;;  %1353 = vmatprep.mubr.f32.mxu1 %v4589_v2 }
 0x19d   :  { %v5734_v18 = vmul.f32 %v4433_v17, %v183_v16  ;;  %v4441_v16 = vld [vmem:[%s6932_s0 + $0x20] sm:$0xff] }
 0x19f   :  { %3824 = vmatmul.mubr.msk.f32.gmra.mxu1 %vm1018_vm0, %v5734_v18  ;;  %987 = vxpose.xlu1.b32.cont [14/16] (narrow) %v5734_v18, 16 }
 0x1a0   :  { %v4435_v21 = vpop.eup %4434  ;;  %1359 = vmatprep.mubr.f32.mxu1 %v4589_v2 }
 0x1a1   :  { %v5743_v22 = vmul.f32 %v4435_v21, %v184_v20  ;;  %v4442_v21 = vld [vmem:[%s6932_s0 + $0x48] sm:$0xff] }
 0x1a3   :  { %3825 = vmatmul.mubr.msk.f32.gmra.mxu1 %vm1018_vm0, %v5743_v22  ;;  %988 = vxpose.xlu1.b32.cont [15/16] (narrow) %v5743_v22, 16 }
 0x1a4   :  { %v4437_v28 = vpop.eup %4436  ;;  %1365 = vmatprep.mubr.f32.mxu1 %v4589_v2 }
 0x1a5   :  { %v5752_v29 = vmul.f32 %v4437_v28, %v185_v26  ;;  %v4443_v28 = vld [vmem:[%s6932_s0 + $0x40] sm:$0xff] }
 0x1a7   :  { %3826 = vmatmul.mubr.msk.f32.gmra.mxu1 %vm1018_vm0, %v5752_v29  ;;  %989 = vxpose.xlu1.b32.end [16/16] (narrow) %v5752_v29, 16 }
 0x1a8   :  { %1436 = vmatprep.mubr.f32.mxu1 %v4589_v2 }
 0x1ab   :  { %3827 = vmatmul.mubr.msk.f32.vlgmr.msra.gmra.mxu1 %vm1018_vm0, %v5314_v30  ;;  %v1801_v30 = vld [vmem:[%s6936_s4 + $0x160] sm:$0xff] }
 0x1ac   :  { %1442 = vmatprep.mubr.f32.mxu1 %v4589_v2  ;;  %2047 = vmatpush1.msra.mxu1 %v1804_v31 }
 0x1ad   :  { %2048 = vmatprep.subr.mxu1 %v4589_v2 }
 0x1ae   :  { %2049 = vmatpush1.msra.mxu1 %v1803_v13 }
 0x1af   :  { %3828 = vmatmul.mubr.msk.f32.gmra.mxu1 %vm1018_vm0, %v5324_v42  ;;  %2050 = vmatprep.subr.mxu1 %v4589_v2  ;;  %v1799_v42 = vld [vmem:[%s6936_s4 + $0x150] sm:$0xff] }
 0x1b0   :  { %1448 = vmatprep.mubr.f32.mxu1 %v4589_v2  ;;  %2051 = vmatpush1.msra.mxu1 %v1802_v32  ;;  %v4444_v32 = vld [vmem:[%s6932_s0 + $0x68] sm:$0xff] }
 0x1b1   :  { %2052 = vmatprep.subr.mxu1 %v4589_v2 }
 0x1b2   :  { %2053 = vmatpush1.msra.mxu1 %v1801_v30 }
 0x1b3   :  { %3829 = vmatmul.mubr.msk.f32.gmra.mxu1 %vm1018_vm0, %v5334_v54  ;;  %2054 = vmatprep.subr.mxu1 %v4589_v2  ;;  %v1797_v54 = vld [vmem:[%s6936_s4 + $0x140] sm:$0xff] }
 0x1b4   :  { %1454 = vmatprep.mubr.f32.mxu1 %v4589_v2  ;;  %2055 = vmatpush1.msra.mxu1 %v1800_v33  ;;  %v4445_v33 = vld [vmem:[%s6932_s0 + $0x60] sm:$0xff] }
 0x1b5   :  { %2056 = vmatprep.subr.mxu1 %v4589_v2 }
 0x1b6   :  { %2057 = vmatpush1.msra.mxu1 %v1799_v42 }
 0x1b7   :  { %3830 = vmatmul.mubr.msk.f32.gmra.mxu1 %vm1018_vm0, %v5351_v5  ;;  %2058 = vmatprep.subr.mxu1 %v4589_v2  ;;  %v1795_v5 = vld [vmem:[%s6936_s4 + $0x130] sm:$0xff] }
 0x1b8   :  { %1460 = vmatprep.mubr.f32.mxu1 %v4589_v2  ;;  %2059 = vmatpush1.msra.mxu1 %v1798_v36 }
 0x1b9   :  { %2060 = vmatprep.subr.mxu1 %v4589_v2 }
 0x1ba   :  { %2061 = vmatpush1.msra.mxu1 %v1797_v54  ;;  %v4446_v54 = vld [vmem:[%s6932_s0 + $0x88] sm:$0xff] }
 0x1bb   :  { %3831 = vmatmul.mubr.msk.f32.gmra.mxu1 %vm1018_vm0, %v5369_v25  ;;  %2062 = vmatprep.subr.mxu1 %v4589_v2  ;;  %v1793_v25 = vld [vmem:[%s6936_s4 + $0x120] sm:$0xff] }
 0x1bc   :  { %1466 = vmatprep.mubr.f32.mxu1 %v4589_v2  ;;  %2063 = vmatpush1.msra.mxu1 %v1796_v37 }
 0x1bd   :  { %2064 = vmatprep.subr.mxu1 %v4589_v2 }
 0x1be   :  { %2065 = vmatpush1.msra.mxu1 %v1795_v5  ;;  %v4447_v5 = vld [vmem:[%s6932_s0 + $0x80] sm:$0xff] }
 0x1bf   :  { %3832 = vmatmul.mubr.msk.f32.gmra.mxu1 %vm1018_vm0, %v5386_v39  ;;  %2066 = vmatprep.subr.mxu1 %v4589_v2  ;;  %v1791_v39 = vld [vmem:[%s6936_s4 + $0x110] sm:$0xff] }
 0x1c0   :  { %1472 = vmatprep.mubr.f32.mxu1 %v4589_v2  ;;  %2067 = vmatpush1.msra.mxu1 %v1794_v38 }
 0x1c1   :  { %2068 = vmatprep.subr.mxu1 %v4589_v2 }
 0x1c2   :  { %2069 = vmatpush1.msra.mxu1 %v1793_v25 }
 0x1c3   :  { %3833 = vmatmul.mubr.msk.f32.gmra.mxu1 %vm1018_vm0, %v5401_v53  ;;  %2070 = vmatprep.subr.mxu1 %v4589_v2  ;;  %v1789_v53 = vld [vmem:[%s6936_s4 + $0x100] sm:$0xff] }
 0x1c4   :  { %1478 = vmatprep.mubr.f32.mxu1 %v4589_v2  ;;  %2071 = vmatpush1.msra.mxu1 %v1792_v43  ;;  %v4448_v43 = vld [vmem:[%s6932_s0 + $0xa8] sm:$0xff] }
 0x1c5   :  { %2072 = vmatprep.subr.mxu1 %v4589_v2 }
 0x1c6   :  { %2073 = vmatpush1.msra.mxu1 %v1791_v39 }
 0x1c7   :  { %3834 = vmatmul.mubr.msk.f32.gmra.mxu1 %vm1018_vm0, %v5418_v6  ;;  %2074 = vmatprep.subr.mxu1 %v4589_v2  ;;  %v1819_v6 = vld [vmem:[%s6936_s4 + $0x1f0] sm:$0xff] }
 0x1c8   :  { %1484 = vmatprep.mubr.f32.mxu1 %v4589_v2  ;;  %2075 = vmatpush1.msra.mxu1 %v1790_v44  ;;  %v4449_v44 = vld [vmem:[%s6932_s0 + $0xa0] sm:$0xff] }
 0x1c9   :  { %2076 = vmatprep.subr.mxu1 %v4589_v2 }
 0x1ca   :  { %2077 = vmatpush1.msra.mxu1 %v1789_v53 }
 0x1cb   :  { %3835 = vmatmul.mubr.msk.f32.gmra.mxu1 %vm1018_vm0, %v5432_v19  ;;  %2078 = vmatprep.subr.mxu1 %v4589_v2  ;;  %v1817_v19 = vld [vmem:[%s6936_s4 + $0x1e0] sm:$0xff] }
 0x1cc   :  { %1490 = vmatprep.mubr.f32.mxu1 %v4589_v2  ;;  %2079 = vmatpush2.msra.mxu1 %v1820_v45 }
 0x1cd   :  { %2080 = vmatprep.subr.mxu1 %v4589_v2 }
 0x1ce   :  { %2081 = vmatpush2.msra.mxu1 %v1819_v6  ;;  %v4450_v6 = vld [vmem:[%s6932_s0 + $0xc8] sm:$0xff] }
 0x1cf   :  { %3836 = vmatmul.mubr.msk.f32.gmra.mxu1 %vm1018_vm0, %v5450_v34  ;;  %2082 = vmatprep.subr.mxu1 %v4589_v2  ;;  %v1815_v34 = vld [vmem:[%s6936_s4 + $0x1d0] sm:$0xff] }
 0x1d0   :  { %1496 = vmatprep.mubr.f32.mxu1 %v4589_v2  ;;  %2083 = vmatpush2.msra.mxu1 %v1818_v47 }
 0x1d1   :  { %2084 = vmatprep.subr.mxu1 %v4589_v2 }
 0x1d2   :  { %2085 = vmatpush2.msra.mxu1 %v1817_v19  ;;  %v4451_v19 = vld [vmem:[%s6932_s0 + $0xc0] sm:$0xff] }
 0x1d3   :  { %3837 = vmatmul.mubr.msk.f32.gmra.mxu1 %vm1018_vm0, %v5464_v49  ;;  %2086 = vmatprep.subr.mxu1 %v4589_v2  ;;  %v1813_v49 = vld [vmem:[%s6936_s4 + $0x1c0] sm:$0xff] }
 0x1d4   :  { %1502 = vmatprep.mubr.f32.mxu1 %v4589_v2  ;;  %2087 = vmatpush2.msra.mxu1 %v1816_v51 }
 0x1d5   :  { %2088 = vmatprep.subr.mxu1 %v4589_v2 }
 0x1d6   :  { %2089 = vmatpush2.msra.mxu1 %v1815_v34 }
 0x1d7   :  { %3838 = vmatmul.mubr.msk.f32.gmra.mxu1 %vm1018_vm0, %v5482_v1  ;;  %2090 = vmatprep.subr.mxu1 %v4589_v2  ;;  %v1811_v1 = vld [vmem:[%s6936_s4 + $0x1b0] sm:$0xff] }
 0x1d8   :  { %1508 = vmatprep.mubr.f32.mxu1 %v4589_v2  ;;  %2091 = vmatpush2.msra.mxu1 %v1814_v52  ;;  %v4452_v52 = vld [vmem:[%s6932_s0 + $0xe8] sm:$0xff] }
 0x1d9   :  { %2092 = vmatprep.subr.mxu1 %v4589_v2 }
 0x1da   :  { %2093 = vmatpush2.msra.mxu1 %v1813_v49 }
 0x1db   :  { %3839 = vmatmul.mubr.msk.f32.gmra.mxu1 %vm1018_vm0, %v5497_v24  ;;  %2094 = vmatprep.subr.mxu1 %v4589_v2  ;;  %v1809_v24 = vld [vmem:[%s6936_s4 + $0x1a0] sm:$0xff] }
 0x1dc   :  { %1514 = vmatprep.mubr.f32.mxu1 %v4589_v2  ;;  %2095 = vmatpush2.msra.mxu1 %v1812_v55  ;;  %v4453_v55 = vld [vmem:[%s6932_s0 + $0xe0] sm:$0xff] }
 0x1dd   :  { %2096 = vmatprep.subr.mxu1 %v4589_v2 }
 0x1de   :  { %2097 = vmatpush2.msra.mxu1 %v1811_v1 }
 0x1df   :  { %3840 = vmatmul.mubr.msk.f32.gmra.mxu1 %vm1018_vm0, %v5514_v41  ;;  %2098 = vmatprep.subr.mxu1 %v4589_v2  ;;  %v1807_v41 = vld [vmem:[%s6936_s4 + $0x190] sm:$0xff] }
 0x1e0   :  { %1520 = vmatprep.mubr.f32.mxu1 %v4589_v2  ;;  %2099 = vmatpush2.msra.mxu1 %v1810_v56 }
 0x1e1   :  { %2100 = vmatprep.subr.mxu1 %v4589_v2 }
 0x1e2   :  { %2101 = vmatpush2.msra.mxu1 %v1809_v24  ;;  %v4454_v24 = vld [vmem:[%s6932_s0 + $0x108] sm:$0xff] }
 0x1e3   :  { %3841 = vmatmul.mubr.msk.f32.gmra.mxu1 %vm1018_vm0, %v5529_v58  ;;  %2102 = vmatprep.subr.mxu1 %v4589_v2 }
 0x1e4   :  { %1526 = vmatprep.mubr.f32.mxu1 %v4589_v2  ;;  %2103 = vmatpush2.msra.mxu1 %v1808_v57 }
 0x1e5   :  { %2104 = vmatprep.subr.mxu1 %v4589_v2 }
 0x1e6   :  { %2105 = vmatpush2.msra.mxu1 %v1807_v41  ;;  %v4455_v41 = vld [vmem:[%s6932_s0 + $0x100] sm:$0xff] }
 0x1e7   :  { %3842 = vmatmul.mubr.msk.f32.gmra.mxu1 %vm1018_vm0, %v5546_v15  ;;  %2106 = vmatprep.subr.mxu1 %v4589_v2  ;;  %v4438_v15 = vld [vmem:[%s6932_s0 + $0x8] sm:$0xff] }
 0x1e8   :  { %1532 = vmatprep.mubr.f32.mxu1 %v4589_v2  ;;  %2107 = vmatpush2.msra.mxu1 %v1806_v59 }
 0x1e9   :  { %2108 = vmatprep.subr.mxu1 %v4589_v2 }
 0x1ea   :  { %v1181_v58 = vpop.f32.mrf.mxu0 }
 0x1eb   :  { %3843 = vmatmul.mubr.msk.f32.gmra.mxu1 %vm1018_vm0, %v5560_v27  ;;  %v1629_v3 = vmul.f32 %v4439_v63, %v1181_v58  ;;  %v1805_v27 = vld [vmem:[%s6936_s4 + $0x180] sm:$0xff] }
 0x1ec   :  { %v1183_v60 = vpop.f32.mrf.mxu0  ;;  %1538 = vmatprep.mubr.f32.mxu1 %v4589_v2  ;;  %2109 = vmatpush2.msra.mxu1 %v1805_v27 }
 0x1ed   :  { %v1630_v62 = vmul.f32 %v4438_v15, %v1183_v60  ;;  %v4456_v60 = vld [vmem:[%s6932_s0 + $0x128] sm:$0xff] }
 0x1ee   :  { %v1187_v7 = vpop.f32.mrf.mxu0 }
 0x1ef   :  { %3844 = vmatmul.mubr.msk.f32.gmra.mxu1 %vm1018_vm0, %v5578_v46  ;;  %1885 = vmatprep.mubr.f32.mxu0 %v1630_v62  ;;  %v1633_v17 = vmul.f32 %v4441_v16, %v1187_v7  ;;  %v4457_v62 = vld [vmem:[%s6932_s0 + $0x120] sm:$0xff]  ;;  %v4458_v7 = vld [vmem:[%s6932_s0 + $0x148] sm:$0xff] }
 0x1f0   :  { %v1189_v10 = vpop.f32.mrf.mxu0  ;;  %1886 = vmatmul.mubr.f32.vlgmr.msra.gmra.mxu0 %v1629_v3  ;;  %1544 = vmatprep.mubr.f32.mxu1 %v4589_v2  ;;  %v4460_v16 = vld [vmem:[%s6932_s0 + $0x168] sm:$0xff] }
 0x1f1   :  { %v1634_v11 = vmul.f32 %v4440_v12, %v1189_v10  ;;  %v4459_v10 = vld [vmem:[%s6932_s0 + $0x140] sm:$0xff] }
 0x1f2   :  { %v1193_v20 = vpop.f32.mrf.mxu0 }
 0x1f3   :  { %3845 = vmatmul.mubr.msk.f32.gmra.mxu1 %vm1018_vm0, %v5596_v0  ;;  %1890 = vmatprep.mubr.f32.mxu0 %v1634_v11  ;;  %v1637_v31 = vmul.f32 %v4443_v28, %v1193_v20  ;;  %v4461_v20 = vld [vmem:[%s6932_s0 + $0x160] sm:$0xff] }
 0x1f4   :  { %v1195_v46 = vpop.f32.mrf.mxu0  ;;  %1891 = vmatmul.mubr.f32.gmra.mxu0 %v1633_v17  ;;  %1550 = vmatprep.mubr.f32.mxu1 %v4589_v2 }
 0x1f5   :  { %v1638_v26 = vmul.f32 %v4442_v21, %v1195_v46 }
 0x1f6   :  { %v1199_v13 = vpop.f32.mrf.mxu0 }
 0x1f7   :  { %3846 = vmatmul.mubr.msk.f32.gmra.mxu1 %vm1018_vm0, %v5614_v23  ;;  %1895 = vmatprep.mubr.f32.mxu0 %v1638_v26  ;;  %v1641_v42 = vmul.f32 %v4445_v33, %v1199_v13  ;;  %v4462_v26 = vld [vmem:[%s6932_s0 + $0x188] sm:$0xff]  ;;  %v4465_v33 = vld [vmem:[%s6932_s0 + $0x1a0] sm:$0xff] }
 0x1f8   :  { %v1201_v0 = vpop.f32.mrf.mxu0  ;;  %1896 = vmatmul.mubr.f32.gmra.mxu0 %v1637_v31  ;;  %1556 = vmatprep.mubr.f32.mxu1 %v4589_v2  ;;  %v4463_v31 = vld [vmem:[%s6932_s0 + $0x180] sm:$0xff] }
 0x1f9   :  { %v1642_v30 = vmul.f32 %v4444_v32, %v1201_v0  ;;  %v4464_v32 = vld [vmem:[%s6932_s0 + $0x1a8] sm:$0xff] }
 0x1fb   :  { %v1205_v36 = vpop.f32.mrf.mxu0  ;;  %3847 = vmatmul.mubr.msk.f32.gmra.mxu1 %vm1018_vm0, %v5632_v48  ;;  %1900 = vmatprep.mubr.f32.mxu0 %v1642_v30 }
 0x1fc   :  { %1901 = vmatmul.mubr.f32.gmra.mxu0 %v1641_v42  ;;  %1562 = vmatprep.mubr.f32.mxu1 %v4589_v2  ;;  %v1645_v38 = vmul.f32 %v4447_v5, %v1205_v36 }
 0x1fd   :  { %v1207_v23 = vpop.f32.mrf.mxu0 }
 0x1fe   :  { %v1646_v37 = vmul.f32 %v4446_v54, %v1207_v23  ;;  %v4466_v23 = vld [vmem:[%s6932_s0 + $0x1c8] sm:$0xff] }
 0x1ff   :  { %v1211_v25 = vpop.f32.mrf.mxu0  ;;  %3848 = vmatmul.mubr.msk.f32.gmra.mxu1 %vm1018_vm0, %v5647_v4 }
 0x200   :  { %1905 = vmatprep.mubr.f32.mxu0 %v1646_v37  ;;  %1568 = vmatprep.mubr.f32.mxu1 %v4589_v2  ;;  %v1649_v53 = vmul.f32 %v4449_v44, %v1211_v25  ;;  %v4467_v37 = vld [vmem:[%s6932_s0 + $0x1c0] sm:$0xff] }
 0x201   :  { %v1213_v48 = vpop.f32.mrf.mxu0  ;;  %1906 = vmatmul.mubr.f32.gmra.mxu0 %v1645_v38 }
 0x202   :  { %v1650_v39 = vmul.f32 %v4448_v43, %v1213_v48  ;;  %v4469_v48 = vld [vmem:[%s6932_s0 + $0x1e0] sm:$0xff] }
 0x203   :  { %v1217_v45 = vpop.f32.mrf.mxu0  ;;  %3849 = vmatmul.mubr.msk.f32.gmra.mxu1 %vm1018_vm0, %v5661_v8 }
 0x204   :  { %1910 = vmatprep.mubr.f32.mxu0 %v1650_v39  ;;  %1574 = vmatprep.mubr.f32.mxu1 %v4589_v2  ;;  %v1653_v51 = vmul.f32 %v4451_v19, %v1217_v45  ;;  %v4471_v45 = vld [vmem:[%s6932_s0 + $0x200] sm:$0xff]  ;;  %v4472_v19 = vld [vmem:[%s6932_s0 + $0x228] sm:$0xff] }
 0x205   :  { %v1219_v4 = vpop.f32.mrf.mxu0  ;;  %1911 = vmatmul.mubr.f32.gmra.mxu0 %v1649_v53 }
 0x206   :  { %v1654_v47 = vmul.f32 %v4450_v6, %v1219_v4 }
 0x207   :  { %v1223_v34 = vpop.f32.mrf.mxu0  ;;  %3850 = vmatmul.mubr.msk.f32.gmra.mxu1 %vm1018_vm0, %v5670_v35 }
 0x208   :  { %1915 = vmatprep.mubr.f32.mxu0 %v1654_v47  ;;  %1580 = vmatprep.mubr.f32.mxu1 %v4589_v2  ;;  %v1657_v1 = vmul.f32 %v4453_v55, %v1223_v34  ;;  %v4473_v34 = vld [vmem:[%s6932_s0 + $0x220] sm:$0xff]  ;;  %v4474_v55 = vld [vmem:[%s6932_s0 + $0x248] sm:$0xff] }
 0x209   :  { %v1225_v8 = vpop.f32.mrf.mxu0  ;;  %1916 = vmatmul.mubr.f32.gmra.mxu0 %v1653_v51 }
 0x20a   :  { %v1658_v49 = vmul.f32 %v4452_v52, %v1225_v8 }
 0x20b   :  { %v1229_v56 = vpop.f32.mrf.mxu0  ;;  %3851 = vmatmul.mubr.msk.f32.gmra.mxu1 %vm1018_vm0, %v5679_v40 }
 0x20c   :  { %1920 = vmatprep.mubr.f32.mxu0 %v1658_v49  ;;  %1586 = vmatprep.mubr.f32.mxu1 %v4589_v2  ;;  %v1661_v58 = vmul.f32 %v4455_v41, %v1229_v56  ;;  %v4475_v56 = vld [vmem:[%s6932_s0 + $0x240] sm:$0xff]  ;;  %v4476_v41 = vld [vmem:[%s6932_s0 + $0x268] sm:$0xff] }
 0x20d   :  { %v1231_v35 = vpop.f32.mrf.mxu0  ;;  %1921 = vmatmul.mubr.f32.gmra.mxu0 %v1657_v1 }
 0x20e   :  { %v1662_v57 = vmul.f32 %v4454_v24, %v1231_v35 }
 0x20f   :  { %v1235_v59 = vpop.f32.mrf.mxu0  ;;  %3852 = vmatmul.mubr.msk.f32.gmra.mxu1 %vm1018_vm0, %v5687_v50 }
 0x210   :  { %1925 = vmatprep.mubr.f32.mxu0 %v1662_v57  ;;  %1592 = vmatprep.mubr.f32.mxu1 %v4589_v2  ;;  %v1665_v63 = vmul.f32 %v4457_v62, %v1235_v59  ;;  %v4477_v59 = vld [vmem:[%s6932_s0 + $0x260] sm:$0xff]  ;;  %v4478_v62 = vld [vmem:[%s6932_s0 + $0x288] sm:$0xff] }
 0x211   :  { %v1237_v40 = vpop.f32.mrf.mxu0  ;;  %1926 = vmatmul.mubr.f32.gmra.mxu0 %v1661_v58 }
 0x212   :  { %v1666_v15 = vmul.f32 %v4456_v60, %v1237_v40 }
 0x213   :  { %v1241_v3 = vpop.f32.mrf.mxu0  ;;  %3853 = vmatmul.mubr.msk.f32.gmra.mxu1 %vm1018_vm0, %v5705_v61 }
 0x214   :  { %1930 = vmatprep.mubr.f32.mxu0 %v1666_v15  ;;  %1598 = vmatprep.mubr.f32.mxu1 %v4589_v2  ;;  %v1669_v12 = vmul.f32 %v4459_v10, %v1241_v3  ;;  %v4479_v3 = vld [vmem:[%s6932_s0 + $0x280] sm:$0xff]  ;;  %v4480_v10 = vld [vmem:[%s6932_s0 + $0x2a8] sm:$0xff] }
 0x215   :  { %v1243_v50 = vpop.f32.mrf.mxu0  ;;  %1931 = vmatmul.mubr.f32.gmra.mxu0 %v1665_v63 }
 0x216   :  { %v1670_v27 = vmul.f32 %v4458_v7, %v1243_v50 }
 0x217   :  { %v1247_v11 = vpop.f32.mrf.mxu0  ;;  %3854 = vmatmul.mubr.msk.f32.gmra.mxu1 %vm1018_vm0, %v5716_v9 }
 0x218   :  { %1935 = vmatprep.mubr.f32.mxu0 %v1670_v27  ;;  %1604 = vmatprep.mubr.f32.mxu1 %v4589_v2  ;;  %v1673_v46 = vmul.f32 %v4461_v20, %v1247_v11  ;;  %v4481_v11 = vld [vmem:[%s6932_s0 + $0x2a0] sm:$0xff]  ;;  %v4482_v20 = vld [vmem:[%s6932_s0 + $0x2c8] sm:$0xff] }
 0x219   :  { %v1249_v61 = vpop.f32.mrf.mxu0  ;;  %1936 = vmatmul.mubr.f32.gmra.mxu0 %v1669_v12 }
 0x21a   :  { %v1674_v17 = vmul.f32 %v4460_v16, %v1249_v61 }
 0x21b   :  { %v1253_v21 = vpop.f32.mrf.mxu0  ;;  %3855 = vmatmul.mubr.msk.f32.gmra.mxu1 %vm1018_vm0, %v5725_v14 }
 0x21c   :  { %1940 = vmatprep.mubr.f32.mxu0 %v1674_v17  ;;  %1610 = vmatprep.mubr.f32.mxu1 %v4589_v2  ;;  %v1677_v13 = vmul.f32 %v4463_v31, %v1253_v21  ;;  %v4483_v21 = vld [vmem:[%s6932_s0 + $0x2c0] sm:$0xff]  ;;  %v4484_v31 = vld [vmem:[%s6932_s0 + $0x2e8] sm:$0xff] }
 0x21d   :  { %v1255_v9 = vpop.f32.mrf.mxu0  ;;  %1941 = vmatmul.mubr.f32.gmra.mxu0 %v1673_v46 }
 0x21e   :  { %v1678_v28 = vmul.f32 %v4462_v26, %v1255_v9 }
 0x21f   :  { %v1259_v0 = vpop.f32.mrf.mxu0  ;;  %3856 = vmatmul.mubr.msk.f32.gmra.mxu1 %vm1018_vm0, %v5734_v18 }
 0x220   :  { %1945 = vmatprep.mubr.f32.mxu0 %v1678_v28  ;;  %1616 = vmatprep.mubr.f32.mxu1 %v4589_v2  ;;  %v1681_v42 = vmul.f32 %v4465_v33, %v1259_v0  ;;  %v4485_v0 = vld [vmem:[%s6932_s0 + $0x2e0] sm:$0xff]  ;;  %v4486_v33 = vld [vmem:[%s6932_s0 + $0x308] sm:$0xff] }
 0x221   :  { %v1261_v14 = vpop.f32.mrf.mxu0  ;;  %1946 = vmatmul.mubr.f32.gmra.mxu0 %v1677_v13 }
 0x222   :  { %v1682_v30 = vmul.f32 %v4464_v32, %v1261_v14 }
 0x223   :  { %v1265_v36 = vpop.f32.mrf.mxu0  ;;  %3857 = vmatmul.mubr.msk.f32.gmra.mxu1 %vm1018_vm0, %v5743_v22 }
 0x224   :  { %1950 = vmatprep.mubr.f32.mxu0 %v1682_v30  ;;  %1622 = vmatprep.mubr.f32.mxu1 %v4589_v2  ;;  %v1685_v5 = vmul.f32 %v4467_v37, %v1265_v36  ;;  %v4468_v2 = vld [vmem:[%s6932_s0 + $0x1e8] sm:$0xff] }
 0x225   :  { %v1267_v18 = vpop.f32.mrf.mxu0  ;;  %1951 = vmatmul.mubr.f32.gmra.mxu0 %v1681_v42  ;;  %v4488_v37 = vld [vmem:[%s6932_s0 + $0x328] sm:$0xff] }
 0x226   :  { %v1686_v54 = vmul.f32 %v4466_v23, %v1267_v18  ;;  %v4487_v18 = vld [vmem:[%s6932_s0 + $0x300] sm:$0xff] }
 0x227   :  { %v1271_v38 = vpop.f32.mrf.mxu0  ;;  %3858 = vmatmul.mubr.msk.f32.gmra.mxu1 %vm1018_vm0, %v5752_v29  ;;  %v4470_v29 = vld [vmem:[%s6932_s0 + $0x208] sm:$0xff] }
 0x228   :  { %1955 = vmatprep.mubr.f32.mxu0 %v1686_v54  ;;  %v1689_v43 = vmul.f32 %v4469_v48, %v1271_v38  ;;  %v4490_v48 = vld [vmem:[%s6932_s0 + $0x348] sm:$0xff] }
 0x229   :  { %v1273_v22 = vpop.f32.mrf.mxu0  ;;  %1956 = vmatmul.mubr.f32.gmra.mxu0 %v1685_v5 }
 0x22a   :  { %v1690_v25 = vmul.f32 %v4468_v2, %v1273_v22  ;;  %v4489_v22 = vld [vmem:[%s6932_s0 + $0x320] sm:$0xff] }
 0x22b   :  { %v1277_v39 = vpop.f32.mrf.mxu0 }
 0x22c   :  { %1960 = vmatprep.mubr.f32.mxu0 %v1690_v25  ;;  %v1693_v4 = vmul.f32 %v4471_v45, %v1277_v39  ;;  %v4492_v45 = vld [vmem:[%s6932_s0 + $0x368] sm:$0xff] }
 0x22d   :  { %v1279_v44 = vpop.f32.mrf.mxu0  ;;  %1961 = vmatmul.mubr.f32.gmra.mxu0 %v1689_v43 }
 0x22e   :  { %v1694_v53 = vmul.f32 %v4470_v29, %v1279_v44  ;;  %v4491_v44 = vld [vmem:[%s6932_s0 + $0x340] sm:$0xff] }
 0x22f   :  { %v1283_v6 = vpop.f32.mrf.mxu0 }
 0x230   :  { %1965 = vmatprep.mubr.f32.mxu0 %v1694_v53  ;;  %v1697_v8 = vmul.f32 %v4473_v34, %v1283_v6  ;;  %v4493_v6 = vld [vmem:[%s6932_s0 + $0x360] sm:$0xff]  ;;  %v4494_v34 = vld [vmem:[%s6932_s0 + $0x388] sm:$0xff] }
 0x231   :  { %v1285_v47 = vpop.f32.mrf.mxu0  ;;  %1966 = vmatmul.mubr.f32.gmra.mxu0 %v1693_v4 }
 0x232   :  { %v1698_v51 = vmul.f32 %v4472_v19, %v1285_v47 }
 0x233   :  { %v1289_v52 = vpop.f32.mrf.mxu0 }
 0x234   :  { %1970 = vmatprep.mubr.f32.mxu0 %v1698_v51  ;;  %v1701_v35 = vmul.f32 %v4475_v56, %v1289_v52  ;;  %v4495_v52 = vld [vmem:[%s6932_s0 + $0x380] sm:$0xff]  ;;  %v4496_v56 = vld [vmem:[%s6932_s0 + $0x3a8] sm:$0xff] }
 0x235   :  { %v1291_v49 = vpop.f32.mrf.mxu0  ;;  %1971 = vmatmul.mubr.f32.gmra.mxu0 %v1697_v8 }
 0x236   :  { %v1702_v1 = vmul.f32 %v4474_v55, %v1291_v49 }
 0x237   :  { %v1295_v24 = vpop.f32.mrf.mxu0 }
 0x238   :  { %1975 = vmatprep.mubr.f32.mxu0 %v1702_v1  ;;  %v1705_v40 = vmul.f32 %v4477_v59, %v1295_v24  ;;  %v4497_v24 = vld [vmem:[%s6932_s0 + $0x3a0] sm:$0xff]  ;;  %v4498_v59 = vld [vmem:[%s6932_s0 + $0x3c8] sm:$0xff] }
 0x239   :  { %v1297_v57 = vpop.f32.mrf.mxu0  ;;  %1976 = vmatmul.mubr.f32.gmra.mxu0 %v1701_v35 }
 0x23a   :  { %v1706_v58 = vmul.f32 %v4476_v41, %v1297_v57 }
 0x23b   :  { %v1301_v60 = vpop.f32.mrf.mxu0 }
 0x23c   :  { %1980 = vmatprep.mubr.f32.mxu0 %v1706_v58  ;;  %v1709_v50 = vmul.f32 %v4479_v3, %v1301_v60  ;;  %v4499_v60 = vld [vmem:[%s6932_s0 + $0x3c0] sm:$0xff]  ;;  %v4500_v3 = vld [vmem:[%s6932_s0 + $0x3e8] sm:$0xff] }
 0x23d   :  { %v1303_v15 = vpop.f32.mrf.mxu0  ;;  %1981 = vmatmul.mubr.f32.gmra.mxu0 %v1705_v40 }
 0x23e   :  { %v1710_v63 = vmul.f32 %v4478_v62, %v1303_v15 }
 0x23f   :  { %v1307_v7 = vpop.f32.mrf.mxu0 }
 0x240   :  { %1985 = vmatprep.mubr.f32.mxu0 %v1710_v63  ;;  %v1713_v61 = vmul.f32 %v4481_v11, %v1307_v7  ;;  %v4501_v7 = vld [vmem:[%s6932_s0 + $0x3e0] sm:$0xff]  ;;  %v4502_v11 = vld [vmem:[%s6932_s0 + $0x18] sm:$0xff] }
 0x241   :  { %v1309_v27 = vpop.f32.mrf.mxu0  ;;  %1986 = vmatmul.mubr.f32.gmra.mxu0 %v1709_v50 }
 0x242   :  { %v1714_v12 = vmul.f32 %v4480_v10, %v1309_v27 }
 0x243   :  { %v1313_v16 = vpop.f32.mrf.mxu0 }
 0x244   :  { %1990 = vmatprep.mubr.f32.mxu0 %v1714_v12  ;;  %v1717_v9 = vmul.f32 %v4483_v21, %v1313_v16  ;;  %v4503_v16 = vld [vmem:[%s6932_s0 + $0x10] sm:$0xff]  ;;  %v4504_v21 = vld [vmem:[%s6932_s0 + $0x38] sm:$0xff] }
 0x245   :  { %v1315_v17 = vpop.f32.mrf.mxu0  ;;  %1991 = vmatmul.mubr.f32.gmra.mxu0 %v1713_v61 }
 0x246   :  { %v1718_v46 = vmul.f32 %v4482_v20, %v1315_v17 }
 0x247   :  { %v1319_v26 = vpop.f32.mrf.mxu0 }
 0x248   :  { %1995 = vmatprep.mubr.f32.mxu0 %v1718_v46  ;;  %v1721_v14 = vmul.f32 %v4485_v0, %v1319_v26  ;;  %v4505_v26 = vld [vmem:[%s6932_s0 + $0x30] sm:$0xff] }
 0x249   :  { %v1321_v28 = vpop.f32.mrf.mxu0  ;;  %1996 = vmatmul.mubr.f32.gmra.mxu0 %v1717_v9 }
 0x24a   :  { %v1722_v13 = vmul.f32 %v4484_v31, %v1321_v28 }
 0x24b   :  { %v1325_v32 = vpop.f32.mrf.mxu0 }
 0x24c   :  { %2000 = vmatprep.mubr.f32.mxu0 %v1722_v13  ;;  %v1725_v23 = vmul.f32 %v4487_v18, %v1325_v32  ;;  %v189_v13 = vld [vmem:[%s6937_s5 + $0x18] sm:$0xff] }
 0x24d   :  { %v1327_v30 = vpop.f32.mrf.mxu0  ;;  %2001 = vmatmul.mubr.f32.gmra.mxu0 %v1721_v14  ;;  %4130 = vmatprep.subr.mxu0 %v189_v13  ;;  %v4506_v14 = vld [vmem:[%s6932_s0 + $0x58] sm:$0xff] }
 0x24e   :  { %v1726_v42 = vmul.f32 %v4486_v33, %v1327_v30  ;;  %v1331_v36 = vpop.f32.mrf.mxu1  ;;  %4131 = vmatpush3.msra.mxu0 %v189_v13  ;;  %v4507_v30 = vld [vmem:[%s6932_s0 + $0x50] sm:$0xff]  ;;  %v4508_v18 = vld [vmem:[%s6932_s0 + $0x78] sm:$0xff] }
 0x24f   :  { %v1729_v2 = vmul.f32 %v4489_v22, %v1331_v36  ;;  %v4510_v22 = vld [vmem:[%s6932_s0 + $0x98] sm:$0xff] }
 0x250   :  { %2005 = vmatprep.mubr.f32.mxu0 %v1726_v42  ;;  %v1333_v54 = vpop.f32.mrf.mxu1 }
 0x251   :  { %v1730_v5 = vmul.f32 %v4488_v37, %v1333_v54  ;;  %2006 = vmatmul.mubr.f32.gmra.mxu0 %v1725_v23  ;;  %v4509_v54 = vld [vmem:[%s6932_s0 + $0x70] sm:$0xff] }
 0x252   :  { %v1337_v38 = vpop.f32.mrf.mxu1 }
 0x253   :  { %2010 = vmatprep.mubr.f32.mxu0 %v1730_v5  ;;  %v1733_v29 = vmul.f32 %v4491_v44, %v1337_v38  ;;  %v4512_v44 = vld [vmem:[%s6932_s0 + $0xb8] sm:$0xff] }
 0x254   :  { %v1339_v25 = vpop.f32.mrf.mxu1 }
 0x255   :  { %v1734_v43 = vmul.f32 %v4490_v48, %v1339_v25  ;;  %2011 = vmatmul.mubr.f32.gmra.mxu0 %v1729_v2  ;;  %v4511_v25 = vld [vmem:[%s6932_s0 + $0x90] sm:$0xff] }
 0x256   :  { %v1343_v39 = vpop.f32.mrf.mxu1 }
 0x257   :  { %2015 = vmatprep.mubr.f32.mxu0 %v1734_v43  ;;  %v1737_v47 = vmul.f32 %v4493_v6, %v1343_v39 }
 0x258   :  { %v1345_v53 = vpop.f32.mrf.mxu1 }
 0x259   :  { %v1738_v4 = vmul.f32 %v4492_v45, %v1345_v53  ;;  %2016 = vmatmul.mubr.f32.gmra.mxu0 %v1733_v29  ;;  %v4513_v53 = vld [vmem:[%s6932_s0 + $0xb0] sm:$0xff] }
 0x25b   :  { %v1349_v19 = vpop.f32.mrf.mxu1  ;;  %2020 = vmatprep.mubr.f32.mxu0 %v1738_v4 }
 0x25c   :  { %v1741_v49 = vmul.f32 %v4495_v52, %v1349_v19 }
 0x25d   :  { %v1351_v51 = vpop.f32.mrf.mxu1  ;;  %2021 = vmatmul.mubr.f32.gmra.mxu0 %v1737_v47  ;;  %v4514_v47 = vld [vmem:[%s6932_s0 + $0xd8] sm:$0xff] }
 0x25e   :  { %v1742_v8 = vmul.f32 %v4494_v34, %v1351_v51  ;;  %v4515_v51 = vld [vmem:[%s6932_s0 + $0xd0] sm:$0xff] }
 0x25f   :  { %v1355_v55 = vpop.f32.mrf.mxu1 }
 0x260   :  { %2025 = vmatprep.mubr.f32.mxu0 %v1742_v8  ;;  %v1745_v57 = vmul.f32 %v4497_v24, %v1355_v55 }
 0x261   :  { %v1357_v1 = vpop.f32.mrf.mxu1  ;;  %2026 = vmatmul.mubr.f32.gmra.mxu0 %v1741_v49  ;;  %v4516_v49 = vld [vmem:[%s6932_s0 + $0xf8] sm:$0xff] }
 0x262   :  { %v1746_v35 = vmul.f32 %v4496_v56, %v1357_v1  ;;  %v4517_v1 = vld [vmem:[%s6932_s0 + $0xf0] sm:$0xff] }
 0x263   :  { %v1361_v41 = vpop.f32.mrf.mxu1 }
 0x264   :  { %2030 = vmatprep.mubr.f32.mxu0 %v1746_v35  ;;  %v1749_v15 = vmul.f32 %v4499_v60, %v1361_v41 }
 0x265   :  { %v1363_v58 = vpop.f32.mrf.mxu1  ;;  %2031 = vmatmul.mubr.f32.gmra.mxu0 %v1745_v57  ;;  %v4518_v57 = vld [vmem:[%s6932_s0 + $0x118] sm:$0xff] }
 0x266   :  { %v1750_v40 = vmul.f32 %v4498_v59, %v1363_v58  ;;  %v4519_v58 = vld [vmem:[%s6932_s0 + $0x110] sm:$0xff] }
 0x267   :  { %v1367_v62 = vpop.f32.mrf.mxu1 }
 0x268   :  { %2035 = vmatprep.mubr.f32.mxu0 %v1750_v40  ;;  %v1753_v27 = vmul.f32 %v4501_v7, %v1367_v62  ;;  %v188_v7 = vld [vmem:[%s6937_s5 + $0x10] sm:$0xff] }
 0x269   :  { %v1369_v63 = vpop.f32.mrf.mxu1  ;;  %2036 = vmatmul.mubr.f32.gmra.mxu0 %v1749_v15  ;;  %v4520_v15 = vld [vmem:[%s6932_s0 + $0x138] sm:$0xff]  ;;  %4132 = vmatprep.subr.mxu0 %v188_v7 }
 0x26a   :  { %v1754_v50 = vmul.f32 %v4500_v3, %v1369_v63  ;;  %v4521_v63 = vld [vmem:[%s6932_s0 + $0x130] sm:$0xff]  ;;  %4133 = vmatpush3.msra.mxu0 %v188_v7 }
 0x26b   :  { %v1438_v10 = vpop.f32.mrf.mxu1 }
 0x26c   :  { %2040 = vmatprep.mubr.f32.mxu0 %v1754_v50  ;;  %v1631_v17 = vmul.f32 %v4503_v16, %v1438_v10  ;;  %v4522_v10 = vld [vmem:[%s6932_s0 + $0x158] sm:$0xff] }
 0x26d   :  { %v1440_v12 = vpop.f32.mrf.mxu1  ;;  %2041 = vmatmul.mubr.f32.gmra.mxu0 %v1753_v27 }
 0x26e   :  { %v1632_v61 = vmul.f32 %v4502_v11, %v1440_v12  ;;  %v4523_v11 = vld [vmem:[%s6932_s0 + $0x150] sm:$0xff] }
 0x26f   :  { %v1444_v20 = vpop.f32.mrf.mxu1 }
 0x270   :  { %2110 = vmatprep.mubr.f32.mxu1 %v1632_v61  ;;  %v1635_v28 = vmul.f32 %v4505_v26, %v1444_v20  ;;  %v4524_v20 = vld [vmem:[%s6932_s0 + $0x178] sm:$0xff] }
 0x271   :  { %v1446_v46 = vpop.f32.mrf.mxu1  ;;  %2111 = vmatmul.mubr.f32.vlgmr.msra.gmra.mxu1 %v1631_v17 }
 0x272   :  { %v1636_v9 = vmul.f32 %v4504_v21, %v1446_v46  ;;  %v4525_v21 = vld [vmem:[%s6932_s0 + $0x170] sm:$0xff] }
 0x273   :  { %v1450_v31 = vpop.f32.mrf.mxu1 }
 0x274   :  { %2115 = vmatprep.mubr.f32.mxu1 %v1636_v9  ;;  %v1639_v33 = vmul.f32 %v4507_v30, %v1450_v31  ;;  %v4526_v31 = vld [vmem:[%s6932_s0 + $0x198] sm:$0xff] }
 0x275   :  { %v1452_v0 = vpop.f32.mrf.mxu1  ;;  %2116 = vmatmul.mubr.f32.gmra.mxu1 %v1635_v28 }
 0x276   :  { %v1640_v32 = vmul.f32 %v4506_v14, %v1452_v0  ;;  %v4527_v0 = vld [vmem:[%s6932_s0 + $0x190] sm:$0xff] }
 0x277   :  { %v1456_v42 = vpop.f32.mrf.mxu1 }
 0x278   :  { %2120 = vmatprep.mubr.f32.mxu1 %v1640_v32  ;;  %v1643_v37 = vmul.f32 %v4509_v54, %v1456_v42 }
 0x279   :  { %v1458_v36 = vpop.f32.mrf.mxu1  ;;  %2121 = vmatmul.mubr.f32.gmra.mxu1 %v1639_v33  ;;  %v4528_v33 = vld [vmem:[%s6932_s0 + $0x1b8] sm:$0xff] }
 0x27a   :  { %v1644_v23 = vmul.f32 %v4508_v18, %v1458_v36  ;;  %v4529_v36 = vld [vmem:[%s6932_s0 + $0x1b0] sm:$0xff] }
 0x27b   :  { %v1462_v5 = vpop.f32.mrf.mxu1 }
 0x27c   :  { %2125 = vmatprep.mubr.f32.mxu1 %v1644_v23  ;;  %v1647_v48 = vmul.f32 %v4511_v25, %v1462_v5 }
 0x27d   :  { %v1464_v38 = vpop.f32.mrf.mxu1  ;;  %2126 = vmatmul.mubr.f32.gmra.mxu1 %v1643_v37  ;;  %v4530_v37 = vld [vmem:[%s6932_s0 + $0x1d8] sm:$0xff] }
 0x27e   :  { %v1648_v2 = vmul.f32 %v4510_v22, %v1464_v38  ;;  %v4531_v38 = vld [vmem:[%s6932_s0 + $0x1d0] sm:$0xff] }
 0x27f   :  { %v1468_v43 = vpop.f32.mrf.mxu1 }
 0x280   :  { %2130 = vmatprep.mubr.f32.mxu1 %v1648_v2  ;;  %v1651_v45 = vmul.f32 %v4513_v53, %v1468_v43 }
 0x281   :  { %v1470_v39 = vpop.f32.mrf.mxu1  ;;  %2131 = vmatmul.mubr.f32.gmra.mxu1 %v1647_v48  ;;  %v4532_v48 = vld [vmem:[%s6932_s0 + $0x1f8] sm:$0xff] }
 0x282   :  { %v1652_v29 = vmul.f32 %v4512_v44, %v1470_v39  ;;  %v4533_v39 = vld [vmem:[%s6932_s0 + $0x1f0] sm:$0xff] }
 0x283   :  { %v1474_v4 = vpop.f32.mrf.mxu1 }
 0x284   :  { %2135 = vmatprep.mubr.f32.mxu1 %v1652_v29  ;;  %v1655_v34 = vmul.f32 %v4515_v51, %v1474_v4 }
 0x285   :  { %v1476_v6 = vpop.f32.mrf.mxu1  ;;  %2136 = vmatmul.mubr.f32.gmra.mxu1 %v1651_v45  ;;  %v4534_v45 = vld [vmem:[%s6932_s0 + $0x218] sm:$0xff] }
 0x286   :  { %v1656_v19 = vmul.f32 %v4514_v47, %v1476_v6  ;;  %v4535_v6 = vld [vmem:[%s6932_s0 + $0x210] sm:$0xff] }
 0x287   :  { %v1480_v8 = vpop.f32.mrf.mxu1 }
 0x288   :  { %2140 = vmatprep.mubr.f32.mxu1 %v1656_v19  ;;  %v1659_v56 = vmul.f32 %v4517_v1, %v1480_v8  ;;  %v4536_v8 = vld [vmem:[%s6932_s0 + $0x238] sm:$0xff] }
 0x289   :  { %v1482_v52 = vpop.f32.mrf.mxu1  ;;  %2141 = vmatmul.mubr.f32.gmra.mxu1 %v1655_v34 }
 0x28a   :  { %v1660_v55 = vmul.f32 %v4516_v49, %v1482_v52 }
 0x28b   :  { %v1486_v35 = vpop.f32.mrf.mxu1 }
 0x28c   :  { %2145 = vmatprep.mubr.f32.mxu1 %v1660_v55  ;;  %v1663_v59 = vmul.f32 %v4519_v58, %v1486_v35  ;;  %v4537_v55 = vld [vmem:[%s6932_s0 + $0x230] sm:$0xff]  ;;  %v187_v35 = vld [vmem:[%s6937_s5 + $0x8] sm:$0xff]  ;;  %v4538_v58 = vld [vmem:[%s6932_s0 + $0x258] sm:$0xff] }
 0x28d   :  { %v1488_v24 = vpop.f32.mrf.mxu1  ;;  %2146 = vmatmul.mubr.f32.gmra.mxu1 %v1659_v56  ;;  %4134 = vmatprep.subr.mxu0 %v187_v35 }
 0x28e   :  { %v1664_v41 = vmul.f32 %v4518_v57, %v1488_v24  ;;  %4135 = vmatpush3.msra.mxu0 %v187_v35 }
 0x28f   :  { %v1492_v40 = vpop.f32.mrf.mxu1 }
 0x290   :  { %2150 = vmatprep.mubr.f32.mxu1 %v1664_v41  ;;  %v1667_v3 = vmul.f32 %v4521_v63, %v1492_v40  ;;  %v186_v41 = vld [vmem:[%s6937_s5] sm:$0xff] }
 0x291   :  { %v1494_v60 = vpop.f32.mrf.mxu1  ;;  %2151 = vmatmul.mubr.f32.gmra.mxu1 %v1663_v59  ;;  %4136 = vmatprep.subr.mxu0 %v186_v41 }
 0x292   :  { %v1668_v62 = vmul.f32 %v4520_v15, %v1494_v60  ;;  %v4539_v60 = vld [vmem:[%s6932_s0 + $0x250] sm:$0xff]  ;;  %4137 = vmatpush3.msra.mxu0 %v186_v41 }
 0x293   :  { %v1498_v50 = vpop.f32.mrf.mxu1 }
 0x294   :  { %2155 = vmatprep.mubr.f32.mxu1 %v1668_v62  ;;  %v1671_v61 = vmul.f32 %v4523_v11, %v1498_v50  ;;  %v4540_v50 = vld [vmem:[%s6932_s0 + $0x278] sm:$0xff] }
 0x295   :  { %v1500_v27 = vpop.f32.mrf.mxu1  ;;  %2156 = vmatmul.mubr.f32.gmra.mxu1 %v1667_v3 }
 0x296   :  { %v1672_v12 = vmul.f32 %v4522_v10, %v1500_v27  ;;  %v4541_v10 = vld [vmem:[%s6932_s0 + $0x270] sm:$0xff] }
 0x297   :  { %v1504_v16 = vpop.f32.mrf.mxu1 }
 0x298   :  { %2160 = vmatprep.mubr.f32.mxu1 %v1672_v12  ;;  %v1675_v9 = vmul.f32 %v4525_v21, %v1504_v16  ;;  %v4543_v21 = vld [vmem:[%s6932_s0 + $0x290] sm:$0xff] }
 0x299   :  { %v1506_v17 = vpop.f32.mrf.mxu1  ;;  %2161 = vmatmul.mubr.f32.gmra.mxu1 %v1671_v61 }
 0x29a   :  { %v1676_v46 = vmul.f32 %v4524_v20, %v1506_v17  ;;  %v4542_v17 = vld [vmem:[%s6932_s0 + $0x298] sm:$0xff] }
 0x29b   :  { %v1510_v26 = vpop.f32.mrf.mxu1 }
 0x29c   :  { %2165 = vmatprep.mubr.f32.mxu1 %v1676_v46  ;;  %v1679_v14 = vmul.f32 %v4527_v0, %v1510_v26 }
 0x29d   :  { %v1512_v28 = vpop.f32.mrf.mxu1  ;;  %2166 = vmatmul.mubr.f32.gmra.mxu1 %v1675_v9 }
 0x29e   :  { %v1680_v13 = vmul.f32 %v4526_v31, %v1512_v28 }
 0x29f   :  { %v1516_v32 = vpop.f32.mrf.mxu1 }
 0x2a0   :  { %2170 = vmatprep.mubr.f32.mxu1 %v1680_v13  ;;  %v1683_v18 = vmul.f32 %v4529_v36, %v1516_v32  ;;  %v4544_v13 = vld [vmem:[%s6932_s0 + $0x2b8] sm:$0xff] }
 0x2a1   :  { %v1518_v30 = vpop.f32.mrf.mxu1  ;;  %2171 = vmatmul.mubr.f32.gmra.mxu1 %v1679_v14  ;;  %v4545_v14 = vld [vmem:[%s6932_s0 + $0x2b0] sm:$0xff] }
 0x2a2   :  { %v1684_v42 = vmul.f32 %v4528_v33, %v1518_v30 }
 0x2a3   :  { %v1522_v23 = vpop.f32.mrf.mxu1 }
 0x2a4   :  { %2175 = vmatprep.mubr.f32.mxu1 %v1684_v42  ;;  %v1687_v22 = vmul.f32 %v4531_v38, %v1522_v23 }
 0x2a5   :  { %v1524_v54 = vpop.f32.mrf.mxu1  ;;  %2176 = vmatmul.mubr.f32.gmra.mxu1 %v1683_v18  ;;  %v4546_v18 = vld [vmem:[%s6932_s0 + $0x2d8] sm:$0xff] }
 0x2a6   :  { %v1688_v5 = vmul.f32 %v4530_v37, %v1524_v54  ;;  %v4547_v54 = vld [vmem:[%s6932_s0 + $0x2d0] sm:$0xff] }
 0x2a7   :  { %v1528_v2 = vpop.f32.mrf.mxu1 }
 0x2a8   :  { %2180 = vmatprep.mubr.f32.mxu1 %v1688_v5  ;;  %v1691_v44 = vmul.f32 %v4533_v39, %v1528_v2 }
 0x2a9   :  { %v1530_v25 = vpop.f32.mrf.mxu1  ;;  %2181 = vmatmul.mubr.f32.gmra.mxu1 %v1687_v22 }
 0x2aa   :  { %v1692_v43 = vmul.f32 %v4532_v48, %v1530_v25  ;;  %v4548_v25 = vld [vmem:[%s6932_s0 + $0x2f8] sm:$0xff] }
 0x2ab   :  { %v1534_v29 = vpop.f32.mrf.mxu1 }
 0x2ac   :  { %2185 = vmatprep.mubr.f32.mxu1 %v1692_v43  ;;  %v1695_v47 = vmul.f32 %v4535_v6, %v1534_v29  ;;  %v4549_v43 = vld [vmem:[%s6932_s0 + $0x2f0] sm:$0xff] }
 0x2ad   :  { %v1536_v53 = vpop.f32.mrf.mxu1  ;;  %2186 = vmatmul.mubr.f32.gmra.mxu1 %v1691_v44 }
 0x2ae   :  { %v1696_v4 = vmul.f32 %v4534_v45, %v1536_v53 }
 0x2af   :  { %v1540_v19 = vpop.f32.mrf.mxu1 }
 0x2b0   :  { %2190 = vmatprep.mubr.f32.mxu1 %v1696_v4  ;;  %v6280_v51 = vpop.f32.mrf.mxu0  ;;  %v1699_v1 = vmul.f32 %v4537_v55, %v1540_v19  ;;  %v4550_v4 = vld [vmem:[%s6932_s0 + $0x318] sm:$0xff] }
 0x2b1   :  { %v1542_v34 = vpop.f32.mrf.mxu1  ;;  %2191 = vmatmul.mubr.f32.gmra.mxu1 %v1695_v47  ;;  %v4551_v47 = vld [vmem:[%s6932_s0 + $0x310] sm:$0xff]  ;;  %v4552_v55 = vld [vmem:[%s6932_s0 + $0x338] sm:$0xff] }
 0x2b2   :  { %v1700_v52 = vmul.f32 %v4536_v8, %v1542_v34  ;;  %v1889_v49 = vpop.f32.mrf.mxu0 }
 0x2b3   :  { %v1546_v56 = vpop.f32.mrf.mxu1 }
 0x2b4   :  { %2195 = vmatprep.mubr.f32.mxu1 %v1700_v52  ;;  %v6291_v24 = vpop.f32.mrf.mxu0  ;;  %v1703_v15 = vmul.f32 %v4539_v60, %v1546_v56  ;;  %v4553_v56 = vld [vmem:[%s6932_s0 + $0x330] sm:$0xff] }
 0x2b5   :  { %v1548_v57 = vpop.f32.mrf.mxu1  ;;  %2196 = vmatmul.mubr.f32.gmra.mxu1 %v1699_v1 }
 0x2b6   :  { %v1704_v59 = vmul.f32 %v4538_v58, %v1548_v57  ;;  %v1894_v40 = vpop.f32.mrf.mxu0 }
 0x2b7   :  { %v1552_v62 = vpop.f32.mrf.mxu1  ;;  %v4554_v40 = vld [vmem:[%s6932_s0 + $0x358] sm:$0xff] }
 0x2b8   :  { %2200 = vmatprep.mubr.f32.mxu1 %v1704_v59  ;;  %v6302_v63 = vpop.f32.mrf.mxu0  ;;  %v1707_v12 = vmul.f32 %v4541_v10, %v1552_v62  ;;  %v4556_v10 = vld [vmem:[%s6932_s0 + $0x378] sm:$0xff] }
 0x2b9   :  { %v1554_v3 = vpop.f32.mrf.mxu1  ;;  %2201 = vmatmul.mubr.f32.gmra.mxu1 %v1703_v15  ;;  %v4555_v15 = vld [vmem:[%s6932_s0 + $0x350] sm:$0xff] }
 0x2ba   :  { %v1708_v7 = vmul.f32 %v4540_v50, %v1554_v3  ;;  %v1899_v27 = vpop.f32.mrf.mxu0 }
 0x2bb   :  { %v1558_v11 = vpop.f32.mrf.mxu1 }
 0x2bc   :  { %2205 = vmatprep.mubr.f32.mxu1 %v1708_v7  ;;  %v6310_v61 = vpop.f32.mrf.mxu0  ;;  %v1711_v9 = vmul.f32 %v4543_v21, %v1558_v11  ;;  %v4557_v11 = vld [vmem:[%s6932_s0 + $0x370] sm:$0xff] }
 0x2bd   :  { %v1560_v16 = vpop.f32.mrf.mxu1  ;;  %2206 = vmatmul.mubr.f32.gmra.mxu1 %v1707_v12 }
 0x2be   :  { %v1712_v20 = vmul.f32 %v4542_v17, %v1560_v16  ;;  %v1904_v46 = vpop.f32.mrf.mxu0 }
 0x2bf   :  { %v1564_v26 = vpop.f32.mrf.mxu1 }
 0x2c0   :  { %2210 = vmatprep.mubr.f32.mxu1 %v1712_v20  ;;  %v1715_v32 = vmul.f32 %v4545_v14, %v1564_v26 }
 0x2c1   :  { %v1566_v28 = vpop.f32.mrf.mxu1  ;;  %v6318_v31 = vpop.f32.mrf.mxu0  ;;  %2211 = vmatmul.mubr.f32.gmra.mxu1 %v1711_v9  ;;  %v4558_v9 = vld [vmem:[%s6932_s0 + $0x398] sm:$0xff] }
 0x2c2   :  { %v1716_v0 = vmul.f32 %v4544_v13, %v1566_v28  ;;  %v4559_v28 = vld [vmem:[%s6932_s0 + $0x390] sm:$0xff] }
 0x2c3   :  { %v1570_v30 = vpop.f32.mrf.mxu1  ;;  %v1909_v33 = vpop.f32.mrf.mxu0 }
 0x2c4   :  { %2215 = vmatprep.mubr.f32.mxu1 %v1716_v0  ;;  %v1719_v37 = vmul.f32 %v4547_v54, %v1570_v30  ;;  %v4560_v33 = vld [vmem:[%s6932_s0 + $0x3b8] sm:$0xff] }
 0x2c5   :  { %v1572_v42 = vpop.f32.mrf.mxu1  ;;  %v6326_v36 = vpop.f32.mrf.mxu0  ;;  %2216 = vmatmul.mubr.f32.gmra.mxu1 %v1715_v32 }
 0x2c6   :  { %v1720_v23 = vmul.f32 %v4546_v18, %v1572_v42  ;;  %v4561_v18 = vld [vmem:[%s6932_s0 + $0x3b0] sm:$0xff] }
 0x2c7   :  { %v1576_v5 = vpop.f32.mrf.mxu1  ;;  %v1914_v38 = vpop.f32.mrf.mxu0 }
 0x2c8   :  { %2220 = vmatprep.mubr.f32.mxu1 %v1720_v23  ;;  %v1723_v39 = vmul.f32 %v4549_v43, %v1576_v5 }
 0x2c9   :  { %v1578_v22 = vpop.f32.mrf.mxu1  ;;  %v6334_v2 = vpop.f32.mrf.mxu0  ;;  %2221 = vmatmul.mubr.f32.gmra.mxu1 %v1719_v37 }
 0x2ca   :  { %v1724_v48 = vmul.f32 %v4548_v25, %v1578_v22  ;;  %v4562_v22 = vld [vmem:[%s6932_s0 + $0x3d8] sm:$0xff] }
 0x2cb   :  { %v1582_v44 = vpop.f32.mrf.mxu1  ;;  %v1919_v29 = vpop.f32.mrf.mxu0 }
 0x2cc   :  { %2225 = vmatprep.mubr.f32.mxu1 %v1724_v48  ;;  %v1727_v19 = vmul.f32 %v4551_v47, %v1582_v44  ;;  %v4563_v48 = vld [vmem:[%s6932_s0 + $0x3d0] sm:$0xff] }
 0x2cd   :  { %v1584_v53 = vpop.f32.mrf.mxu1  ;;  %v6342_v45 = vpop.f32.mrf.mxu0  ;;  %2226 = vmatmul.mubr.f32.gmra.mxu1 %v1723_v39  ;;  %v4565_v47 = vld [vmem:[%s6932_s0 + $0x3f0] sm:$0xff] }
 0x2ce   :  { %v1728_v6 = vmul.f32 %v4550_v4, %v1584_v53  ;;  %v4564_v4 = vld [vmem:[%s6932_s0 + $0x3f8] sm:$0xff] }
 0x2cf   :  { %v1588_v34 = vpop.f32.mrf.mxu1  ;;  %v1924_v8 = vpop.f32.mrf.mxu0 }
 0x2d0   :  { %2230 = vmatprep.mubr.f32.mxu1 %v1728_v6  ;;  %v1731_v35 = vmul.f32 %v4553_v56, %v1588_v34 }
 0x2d1   :  { %v1590_v52 = vpop.f32.mrf.mxu1  ;;  %v6350_v49 = vpop.f32.mrf.mxu0  ;;  %2231 = vmatmul.mubr.f32.gmra.mxu1 %v1727_v19 }
 0x2d2   :  { %v1732_v1 = vmul.f32 %v4552_v55, %v1590_v52 }
 0x2d3   :  { %v1594_v57 = vpop.f32.mrf.mxu1  ;;  %v1929_v41 = vpop.f32.mrf.mxu0 }
 0x2d4   :  { %2235 = vmatprep.mubr.f32.mxu1 %v1732_v1  ;;  %v1735_v62 = vmul.f32 %v4555_v15, %v1594_v57 }
 0x2d5   :  { %v1596_v58 = vpop.f32.mrf.mxu1  ;;  %v6358_v59 = vpop.f32.mrf.mxu0  ;;  %2236 = vmatmul.mubr.f32.gmra.mxu1 %v1731_v35 }
 0x2d6   :  { %v1736_v60 = vmul.f32 %v4554_v40, %v1596_v58 }
 0x2d7   :  { %v1600_v3 = vpop.f32.mrf.mxu1  ;;  %v1934_v50 = vpop.f32.mrf.mxu0 }
 0x2d8   :  { %2240 = vmatprep.mubr.f32.mxu1 %v1736_v60  ;;  %v1739_v16 = vmul.f32 %v4557_v11, %v1600_v3 }
 0x2d9   :  { %v1602_v7 = vpop.f32.mrf.mxu1  ;;  %v6366_v27 = vpop.f32.mrf.mxu0  ;;  %2241 = vmatmul.mubr.f32.gmra.mxu1 %v1735_v62 }
 0x2da   :  { %v1740_v12 = vmul.f32 %v4556_v10, %v1602_v7 }
 0x2db   :  { %v1606_v17 = vpop.f32.mrf.mxu1  ;;  %v1939_v20 = vpop.f32.mrf.mxu0 }
 0x2dc   :  { %2245 = vmatprep.mubr.f32.mxu1 %v1740_v12  ;;  %v1743_v13 = vmul.f32 %v4559_v28, %v1606_v17 }
 0x2dd   :  { %v1608_v46 = vpop.f32.mrf.mxu1  ;;  %v6374_v21 = vpop.f32.mrf.mxu0  ;;  %2246 = vmatmul.mubr.f32.gmra.mxu1 %v1739_v16 }
 0x2de   :  { %v1744_v26 = vmul.f32 %v4558_v9, %v1608_v46 }
 0x2df   :  { %v1612_v0 = vpop.f32.mrf.mxu1  ;;  %v1944_v14 = vpop.f32.mrf.mxu0 }
 0x2e0   :  { %2250 = vmatprep.mubr.f32.mxu1 %v1744_v26  ;;  %v1747_v23 = vmul.f32 %v4561_v18, %v1612_v0 }
 0x2e1   :  { %v1614_v32 = vpop.f32.mrf.mxu1  ;;  %v6382_v30 = vpop.f32.mrf.mxu0  ;;  %2251 = vmatmul.mubr.f32.gmra.mxu1 %v1743_v13 }
 0x2e2   :  { %v1748_v42 = vmul.f32 %v4560_v33, %v1614_v32 }
 0x2e3   :  { %v1618_v54 = vpop.f32.mrf.mxu1  ;;  %v1949_v37 = vpop.f32.mrf.mxu0 }
 0x2e4   :  { %2255 = vmatprep.mubr.f32.mxu1 %v1748_v42  ;;  %v1751_v43 = vmul.f32 %v4563_v48, %v1618_v54  ;;  %v193_v54 = vld [vmem:[%s6937_s5 + $0x38] sm:$0xff]  ;;  %v192_v37 = vld [vmem:[%s6937_s5 + $0x30] sm:$0xff] }
 0x2e5   :  { %v1620_v5 = vpop.f32.mrf.mxu1  ;;  %v6390_v38 = vpop.f32.mrf.mxu0  ;;  %2256 = vmatmul.mubr.f32.gmra.mxu1 %v1747_v23  ;;  %4186 = vmatprep.subr.mxu1 %v193_v54 }
 0x2e6   :  { %v1752_v25 = vmul.f32 %v4562_v22, %v1620_v5  ;;  %4187 = vmatpush3.msra.mxu1 %v193_v54 }
 0x2e7   :  { %v1624_v39 = vpop.f32.mrf.mxu1  ;;  %v1954_v44 = vpop.f32.mrf.mxu0  ;;  %4188 = vmatprep.subr.mxu1 %v192_v37 }
 0x2e8   :  { %2260 = vmatprep.mubr.f32.mxu1 %v1752_v25  ;;  %v1755_v19 = vmul.f32 %v4565_v47, %v1624_v39  ;;  %4189 = vmatpush3.msra.mxu1 %v192_v37 }
 0x2e9   :  { %v1626_v29 = vpop.f32.mrf.mxu1  ;;  %v6398_v53 = vpop.f32.mrf.mxu0  ;;  %2261 = vmatmul.mubr.f32.gmra.mxu1 %v1751_v43 }
 0x2ea   :  { %v1756_v6 = vmul.f32 %v4564_v4, %v1626_v29 }
 0x2eb   :  { %v1959_v34 = vpop.f32.mrf.mxu0 }
 0x2ec   :  { %2265 = vmatprep.mubr.f32.mxu1 %v1756_v6 }
 0x2ed   :  { %v6406_v8 = vpop.f32.mrf.mxu0  ;;  %2266 = vmatmul.mubr.f32.gmra.mxu1 %v1755_v19 }
 0x2ef   :  { %v1964_v52 = vpop.f32.mrf.mxu0 }
 0x2f1   :  { %v6408_v55 = vpop.f32.mrf.mxu0 }
 0x2f3   :  { %v1969_v1 = vpop.f32.mrf.mxu0 }
 0x2f5   :  { %v6410_v56 = vpop.f32.mrf.mxu0 }
 0x2f7   :  { %v1974_v35 = vpop.f32.mrf.mxu0 }
 0x2f9   :  { %v6412_v57 = vpop.f32.mrf.mxu0 }
 0x2fb   :  { %v1979_v41 = vpop.f32.mrf.mxu0 }
 0x2fd   :  { %v6414_v58 = vpop.f32.mrf.mxu0 }
 0x2ff   :  { %v1984_v40 = vpop.f32.mrf.mxu0 }
 0x301   :  { %v6416_v60 = vpop.f32.mrf.mxu0 }
 0x303   :  { %v1989_v15 = vpop.f32.mrf.mxu0 }
 0x305   :  { %v6418_v62 = vpop.f32.mrf.mxu0 }
 0x307   :  { %v1994_v3 = vpop.f32.mrf.mxu0 }
 0x309   :  { %v6420_v50 = vpop.f32.mrf.mxu0 }
 0x30b   :  { %v1999_v7 = vpop.f32.mrf.mxu0 }
 0x30d   :  { %v6422_v10 = vpop.f32.mrf.mxu0 }
 0x30f   :  { %v2004_v12 = vpop.f32.mrf.mxu0 }
 0x311   :  { %v6424_v11 = vpop.f32.mrf.mxu0 }
 0x313   :  { %v2009_v16 = vpop.f32.mrf.mxu0 }
 0x315   :  { %v6426_v17 = vpop.f32.mrf.mxu0 }
 0x317   :  { %v2014_v20 = vpop.f32.mrf.mxu0 }
 0x319   :  { %v6428_v46 = vpop.f32.mrf.mxu0 }
 0x31b   :  { %v2019_v9 = vpop.f32.mrf.mxu0 }
 0x31d   :  { %v6430_v26 = vpop.f32.mrf.mxu0 }
 0x31f   :  { %v2024_v28 = vpop.f32.mrf.mxu0 }
 0x321   :  { %v6432_v13 = vpop.f32.mrf.mxu0 }
 0x323   :  { %v2029_v0 = vpop.f32.mrf.mxu0 }
 0x325   :  { %v6434_v14 = vpop.f32.mrf.mxu0 }
 0x327   :  { %v2034_v32 = vpop.f32.mrf.mxu0 }
 0x329   :  { %v6436_v33 = vpop.f32.mrf.mxu0 }
 0x32b   :  { %v2039_v42 = vpop.f32.mrf.mxu0 }
 0x32d   :  { %v6438_v18 = vpop.f32.mrf.mxu0 }
 0x32f   :  { %v2044_v23 = vpop.f32.mrf.mxu0 }
 0x331   :  { %v2112_v5 = vpop.f32.mrf.mxu1 }
 0x332   :  { %v2113_v22 = vadd.f32 %v2112_v5, %v6280_v51 }
 0x333   :  { %v2114_v25 = vpop.f32.mrf.mxu1 }
 0x334   :  { %4138 = vmatprep.mubr.msk.f32.mxu0 %vm2275_vm1, %v2113_v22 }
 0x335   :  { %v2117_v48 = vpop.f32.mrf.mxu1 }
 0x336   :  { %v2118_v43 = vadd.f32 %v2117_v48, %v6291_v24 }
 0x337   :  { %v2119_v39 = vpop.f32.mrf.mxu1 }
 0x338   :  { %4139 = vmatmul.mubr.msk.f32.vlgmr.msra.gmra.mxu0 %vm2275_vm1, %v2118_v43 }
 0x339   :  { %v2122_v44 = vpop.f32.mrf.mxu1 }
 0x33a   :  { %v2123_v29 = vadd.f32 %v2122_v44, %v6302_v63 }
 0x33b   :  { %v2124_v4 = vpop.f32.mrf.mxu1 }
 0x33c   :  { %4141 = vmatprep.mubr.msk.f32.mxu0 %vm2275_vm1, %v2123_v29 }
 0x33d   :  { %v2127_v6 = vpop.f32.mrf.mxu1 }
 0x33e   :  { %v2128_v51 = vadd.f32 %v2127_v6, %v6310_v61 }
 0x33f   :  { %v2129_v47 = vpop.f32.mrf.mxu1 }
 0x340   :  { %4142 = vmatmul.mubr.msk.f32.gmra.mxu0 %vm2275_vm1, %v2128_v51  ;;  %v190_v51 = vld [vmem:[%s6937_s5 + $0x20] sm:$0xff] }
 0x341   :  { %v2132_v19 = vpop.f32.mrf.mxu1 }
 0x342   :  { %v2133_v34 = vadd.f32 %v2132_v19, %v6318_v31 }
 0x343   :  { %v2134_v52 = vpop.f32.mrf.mxu1 }
 0x344   :  { %4144 = vmatprep.mubr.msk.f32.mxu0 %vm2275_vm1, %v2133_v34 }
 0x345   :  { %v2137_v24 = vpop.f32.mrf.mxu1 }
 0x346   :  { %v2138_v1 = vadd.f32 %v2137_v24, %v6326_v36 }
 0x347   :  { %v2139_v35 = vpop.f32.mrf.mxu1 }
 0x348   :  { %4145 = vmatmul.mubr.msk.f32.gmra.mxu0 %vm2275_vm1, %v2138_v1 }
 0x349   :  { %v2142_v63 = vpop.f32.mrf.mxu1 }
 0x34a   :  { %v2143_v41 = vadd.f32 %v2142_v63, %v6334_v2 }
 0x34b   :  { %v2144_v40 = vpop.f32.mrf.mxu1 }
 0x34c   :  { %4147 = vmatprep.mubr.msk.f32.mxu0 %vm2275_vm1, %v2143_v41 }
 0x34d   :  { %v2147_v61 = vpop.f32.mrf.mxu1 }
 0x34e   :  { %v2148_v15 = vadd.f32 %v2147_v61, %v6342_v45 }
 0x34f   :  { %v2149_v3 = vpop.f32.mrf.mxu1 }
 0x350   :  { %4148 = vmatmul.mubr.msk.f32.gmra.mxu0 %vm2275_vm1, %v2148_v15 }
 0x351   :  { %v2152_v31 = vpop.f32.mrf.mxu1 }
 0x352   :  { %v2153_v7 = vadd.f32 %v2152_v31, %v6350_v49 }
 0x353   :  { %v2154_v12 = vpop.f32.mrf.mxu1 }
 0x354   :  { %4150 = vmatprep.mubr.msk.f32.mxu0 %vm2275_vm1, %v2153_v7 }
 0x355   :  { %v2157_v36 = vpop.f32.mrf.mxu1 }
 0x356   :  { %v2158_v16 = vadd.f32 %v2157_v36, %v6358_v59 }
 0x357   :  { %v2159_v20 = vpop.f32.mrf.mxu1 }
 0x358   :  { %4151 = vmatmul.mubr.msk.f32.gmra.mxu0 %vm2275_vm1, %v2158_v16 }
 0x359   :  { %v2162_v2 = vpop.f32.mrf.mxu1 }
 0x35a   :  { %v2163_v9 = vadd.f32 %v2162_v2, %v6366_v27 }
 0x35b   :  { %v2164_v28 = vpop.f32.mrf.mxu1 }
 0x35c   :  { %4153 = vmatprep.mubr.msk.f32.mxu0 %vm2275_vm1, %v2163_v9 }
 0x35d   :  { %v2167_v45 = vpop.f32.mrf.mxu1 }
 0x35e   :  { %v2168_v0 = vadd.f32 %v2167_v45, %v6374_v21 }
 0x35f   :  { %v2169_v32 = vpop.f32.mrf.mxu1 }
 0x360   :  { %4154 = vmatmul.mubr.msk.f32.gmra.mxu0 %vm2275_vm1, %v2168_v0 }
 0x361   :  { %v2172_v49 = vpop.f32.mrf.mxu1 }
 0x362   :  { %v2173_v42 = vadd.f32 %v2172_v49, %v6382_v30 }
 0x363   :  { %v2174_v23 = vpop.f32.mrf.mxu1 }
 0x364   :  { %4156 = vmatprep.mubr.msk.f32.mxu0 %vm2275_vm1, %v2173_v42 }
 0x365   :  { %v2177_v59 = vpop.f32.mrf.mxu1 }
 0x366   :  { %v2178_v54 = vadd.f32 %v2177_v59, %v6390_v38 }
 0x367   :  { %v2179_v37 = vpop.f32.mrf.mxu1 }
 0x368   :  { %4157 = vmatmul.mubr.msk.f32.gmra.mxu0 %vm2275_vm1, %v2178_v54 }
 0x369   :  { %v2182_v27 = vpop.f32.mrf.mxu1 }
 0x36a   :  { %v2183_v5 = vadd.f32 %v2182_v27, %v6398_v53 }
 0x36b   :  { %v2184_v22 = vpop.f32.mrf.mxu1 }
 0x36c   :  { %4159 = vmatprep.mubr.msk.f32.mxu0 %vm2275_vm1, %v2183_v5 }
 0x36d   :  { %v2187_v21 = vpop.f32.mrf.mxu1 }
 0x36e   :  { %v2188_v25 = vadd.f32 %v2187_v21, %v6406_v8  ;;  %v191_v8 = vld [vmem:[%s6937_s5 + $0x28] sm:$0xff] }
 0x36f   :  { %v2189_v48 = vpop.f32.mrf.mxu1  ;;  %4190 = vmatprep.subr.mxu1 %v191_v8 }
 0x370   :  { %4160 = vmatmul.mubr.msk.f32.gmra.mxu0 %vm2275_vm1, %v2188_v25  ;;  %4191 = vmatpush3.msra.mxu1 %v191_v8 }
 0x371   :  { %v2192_v30 = vpop.f32.mrf.mxu1  ;;  %4192 = vmatprep.subr.mxu1 %v190_v51 }
 0x372   :  { %v2193_v43 = vadd.f32 %v2192_v30, %v6408_v55  ;;  %4193 = vmatpush3.msra.mxu1 %v190_v51 }
 0x373   :  { %v2194_v39 = vpop.f32.mrf.mxu1 }
 0x374   :  { %4162 = vmatprep.mubr.msk.f32.mxu0 %vm2275_vm1, %v2193_v43 }
 0x375   :  { %v2197_v38 = vpop.f32.mrf.mxu1 }
 0x376   :  { %v2198_v44 = vadd.f32 %v2197_v38, %v6410_v56 }
 0x377   :  { %v2199_v29 = vpop.f32.mrf.mxu1 }
 0x378   :  { %4163 = vmatmul.mubr.msk.f32.gmra.mxu0 %vm2275_vm1, %v2198_v44 }
 0x379   :  { %v2202_v53 = vpop.f32.mrf.mxu1 }
 0x37a   :  { %v2203_v4 = vadd.f32 %v2202_v53, %v6412_v57 }
 0x37b   :  { %v2204_v6 = vpop.f32.mrf.mxu1 }
 0x37c   :  { %4165 = vmatprep.mubr.msk.f32.mxu0 %vm2275_vm1, %v2203_v4 }
 0x37d   :  { %v2207_v55 = vpop.f32.mrf.mxu1 }
 0x37e   :  { %v2208_v56 = vadd.f32 %v2207_v55, %v6414_v58 }
 0x37f   :  { %v2209_v47 = vpop.f32.mrf.mxu1 }
 0x380   :  { %4166 = vmatmul.mubr.msk.f32.gmra.mxu0 %vm2275_vm1, %v2208_v56 }
 0x381   :  { %v2212_v57 = vpop.f32.mrf.mxu1 }
 0x382   :  { %v2213_v19 = vadd.f32 %v2212_v57, %v6416_v60 }
 0x383   :  { %v2214_v34 = vpop.f32.mrf.mxu1 }
 0x384   :  { %4168 = vmatprep.mubr.msk.f32.mxu0 %vm2275_vm1, %v2213_v19 }
 0x385   :  { %v2217_v52 = vpop.f32.mrf.mxu1 }
 0x386   :  { %v2218_v24 = vadd.f32 %v2217_v52, %v6418_v62 }
 0x387   :  { %v2219_v1 = vpop.f32.mrf.mxu1 }
 0x388   :  { %4169 = vmatmul.mubr.msk.f32.gmra.mxu0 %vm2275_vm1, %v2218_v24 }
 0x389   :  { %v2222_v35 = vpop.f32.mrf.mxu1 }
 0x38a   :  { %v2223_v58 = vadd.f32 %v2222_v35, %v6420_v50 }
 0x38b   :  { %v2224_v63 = vpop.f32.mrf.mxu1 }
 0x38c   :  { %4171 = vmatprep.mubr.msk.f32.mxu0 %vm2275_vm1, %v2223_v58 }
 0x38d   :  { %v2227_v41 = vpop.f32.mrf.mxu1 }
 0x38e   :  { %v2228_v40 = vadd.f32 %v2227_v41, %v6422_v10 }
 0x38f   :  { %v2229_v61 = vpop.f32.mrf.mxu1 }
 0x390   :  { %4172 = vmatmul.mubr.msk.f32.gmra.mxu0 %vm2275_vm1, %v2228_v40 }
 0x391   :  { %v2232_v60 = vpop.f32.mrf.mxu1 }
 0x392   :  { %v2233_v15 = vadd.f32 %v2232_v60, %v6424_v11 }
 0x393   :  { %v2234_v3 = vpop.f32.mrf.mxu1 }
 0x394   :  { %4174 = vmatprep.mubr.msk.f32.mxu0 %vm2275_vm1, %v2233_v15 }
 0x395   :  { %v2237_v62 = vpop.f32.mrf.mxu1 }
 0x396   :  { %v2238_v31 = vadd.f32 %v2237_v62, %v6426_v17 }
 0x397   :  { %v2239_v7 = vpop.f32.mrf.mxu1 }
 0x398   :  { %4175 = vmatmul.mubr.msk.f32.gmra.mxu0 %vm2275_vm1, %v2238_v31 }
 0x399   :  { %v2242_v50 = vpop.f32.mrf.mxu1 }
 0x39a   :  { %v2243_v12 = vadd.f32 %v2242_v50, %v6428_v46 }
 0x39b   :  { %v2244_v36 = vpop.f32.mrf.mxu1 }
 0x39c   :  { %4177 = vmatprep.mubr.msk.f32.mxu0 %vm2275_vm1, %v2243_v12 }
 0x39d   :  { %v2247_v10 = vpop.f32.mrf.mxu1 }
 0x39e   :  { %v2248_v16 = vadd.f32 %v2247_v10, %v6430_v26 }
 0x39f   :  { %v2249_v20 = vpop.f32.mrf.mxu1 }
 0x3a0   :  { %4178 = vmatmul.mubr.msk.f32.gmra.mxu0 %vm2275_vm1, %v2248_v16 }
 0x3a1   :  { %v2252_v11 = vpop.f32.mrf.mxu1 }
 0x3a2   :  { %v2253_v2 = vadd.f32 %v2252_v11, %v6432_v13  ;;  %v2271_v13 = vlaneseq }
 0x3a3   :  { %v2254_v9 = vpop.f32.mrf.mxu1 }
 0x3a4   :  { %4180 = vmatprep.mubr.msk.f32.mxu0 %vm2275_vm1, %v2253_v2  ;;  %v6517_v23 = vshrl.u32 %v2271_v13, 7 }
 0x3a5   :  { %v2257_v17 = vpop.f32.mrf.mxu1 }
 0x3a6   :  { %v2258_v28 = vadd.f32 %v2257_v17, %v6434_v14  ;;  %v2273_v14 = vsub.s32 0, %v6517_v23  ;;  %v2631_v59 = vsub.s32 3, %v6517_v23 }
 0x3a7   :  { %v2259_v45 = vpop.f32.mrf.mxu1 }
 0x3a8   :  { %4181 = vmatmul.mubr.msk.f32.gmra.mxu0 %vm2275_vm1, %v2258_v28 }
 0x3a9   :  { %v2262_v46 = vpop.f32.mrf.mxu1 }
 0x3aa   :  { %v2263_v0 = vadd.f32 %v2262_v46, %v6436_v33  ;;  %v6524_v33 = vld [vmem:[%s6937_s5 + $0x60] sm:$0xff] }
 0x3ab   :  { %v2264_v32 = vpop.f32.mrf.mxu1  ;;  %v6527_v54 = vrot.slane %v6524_v33, %v2273_v14 }
 0x3ac   :  { %4183 = vmatprep.mubr.msk.f32.mxu0 %vm2275_vm1, %v2263_v0 }
 0x3ad   :  { %v2267_v26 = vpop.f32.mrf.mxu1 }
 0x3ae   :  { %v2268_v49 = vadd.f32 %v2267_v26, %v6438_v18  ;;  %v6530_v18 = vrot.slane %v6524_v33, %v2631_v59 }
 0x3af   :  { %v2269_v42 = vpop.f32.mrf.mxu1 }
 0x3b0   :  { %4184 = vmatmul.mubr.msk.f32.gmra.mxu0 %vm2275_vm1, %v2268_v49 }
 0x3f8   :  { %v4140_v37 = vpop.f32.mrf.mxu0 }
 0x3f9   :  { %v2444_v27 = vadd.f32 %v4140_v37, %v6527_v54 }
 0x3fa   :  { %v2438_v5 = vpop.f32.mrf.mxu0 }
 0x3fb   :  { %v2439_v22 = vadd.f32 %v2438_v5, %v6527_v54  ;;  %v2634_v21 = vmul.f32 %v6530_v18, %v2444_v27  ;;  %vm2598_vm2 = vcmp.gt.f32.partialorder %v2444_v27, 0.0 }
 0x3fd   :  { %vm2597_vm3 = vcmp.gt.f32.partialorder %v2439_v22, 0.0  ;;  %v2633_v25 = vmul.f32 %v6530_v18, %v2439_v22  ;;  %v2666_v30 = vsel %vm2598_vm2, %v2444_v27, %v2634_v21 }
 0x3ff   :  { %v2665_v48 = vsel %vm2597_vm3, %v2439_v22, %v2633_v25 }
 0x400   :  { %v4143_v43 = vpop.f32.mrf.mxu0  ;;  %4194 = vmatprep.mubr.msk.f32.mxu1 %vm2275_vm1, %v2665_v48 }
 0x401   :  { %v2454_v39 = vadd.f32 %v4143_v43, %v6527_v54  ;;  %4195 = vmatmul.mubr.msk.f32.vlgmr.msra.gmra.mxu1 %vm2275_vm1, %v2666_v30 }
 0x402   :  { %v2448_v38 = vpop.f32.mrf.mxu0 }
 0x403   :  { %v2449_v44 = vadd.f32 %v2448_v38, %v6527_v54  ;;  %v2636_v29 = vmul.f32 %v6530_v18, %v2454_v39  ;;  %vm2600_vm4 = vcmp.gt.f32.partialorder %v2454_v39, 0.0 }
 0x405   :  { %vm2599_vm5 = vcmp.gt.f32.partialorder %v2449_v44, 0.0  ;;  %v2635_v53 = vmul.f32 %v6530_v18, %v2449_v44  ;;  %v2668_v6 = vsel %vm2600_vm4, %v2454_v39, %v2636_v29 }
 0x407   :  { %v2667_v4 = vsel %vm2599_vm5, %v2449_v44, %v2635_v53 }
 0x408   :  { %v4146_v8 = vpop.f32.mrf.mxu0  ;;  %4197 = vmatprep.mubr.msk.f32.mxu1 %vm2275_vm1, %v2667_v4 }
 0x409   :  { %v2464_v55 = vadd.f32 %v4146_v8, %v6527_v54  ;;  %4198 = vmatmul.mubr.msk.f32.gmra.mxu1 %vm2275_vm1, %v2668_v6  ;;  %v197_v6 = vld [vmem:[%s6937_s5 + $0x58] sm:$0xff] }
 0x40a   :  { %v2458_v51 = vpop.f32.mrf.mxu0  ;;  %4242 = vmatprep.subr.mxu0 %v197_v6 }
 0x40b   :  { %v2459_v56 = vadd.f32 %v2458_v51, %v6527_v54  ;;  %v2638_v47 = vmul.f32 %v6530_v18, %v2464_v55  ;;  %vm2602_vm6 = vcmp.gt.f32.partialorder %v2464_v55, 0.0  ;;  %4243 = vmatpush3.msra.mxu0 %v197_v6  ;;  %v196_v51 = vld [vmem:[%s6937_s5 + $0x50] sm:$0xff]  ;;  %v3056_v6 = vsub.s32 4, %v6517_v23 }
 0x40c   :  { %4244 = vmatprep.subr.mxu0 %v196_v51 }
 0x40d   :  { %vm2601_vm7 = vcmp.gt.f32.partialorder %v2459_v56, 0.0  ;;  %v2637_v57 = vmul.f32 %v6530_v18, %v2459_v56  ;;  %v2670_v34 = vsel %vm2602_vm6, %v2464_v55, %v2638_v47  ;;  %4245 = vmatpush3.msra.mxu0 %v196_v51 }
 0x40f   :  { %v2669_v19 = vsel %vm2601_vm7, %v2459_v56, %v2637_v57  ;;  %v195_v57 = vld [vmem:[%s6937_s5 + $0x48] sm:$0xff] }
 0x410   :  { %v4149_v52 = vpop.f32.mrf.mxu0  ;;  %4200 = vmatprep.mubr.msk.f32.mxu1 %vm2275_vm1, %v2669_v19  ;;  %4246 = vmatprep.subr.mxu0 %v195_v57  ;;  %v194_v19 = vld [vmem:[%s6937_s5 + $0x40] sm:$0xff] }
 0x411   :  { %v2474_v24 = vadd.f32 %v4149_v52, %v6527_v54  ;;  %4201 = vmatmul.mubr.msk.f32.gmra.mxu1 %vm2275_vm1, %v2670_v34  ;;  %4247 = vmatpush3.msra.mxu0 %v195_v57 }
 0x412   :  { %v2468_v1 = vpop.f32.mrf.mxu0  ;;  %4248 = vmatprep.subr.mxu0 %v194_v19 }
 0x413   :  { %v2469_v35 = vadd.f32 %v2468_v1, %v6527_v54  ;;  %v2640_v58 = vmul.f32 %v6530_v18, %v2474_v24  ;;  %vm2604_vm8 = vcmp.gt.f32.partialorder %v2474_v24, 0.0  ;;  %4249 = vmatpush3.msra.mxu0 %v194_v19 }
 0x415   :  { %vm2603_vm9 = vcmp.gt.f32.partialorder %v2469_v35, 0.0  ;;  %v2639_v63 = vmul.f32 %v6530_v18, %v2469_v35  ;;  %v2672_v40 = vsel %vm2604_vm8, %v2474_v24, %v2640_v58 }
 0x417   :  { %v2671_v41 = vsel %vm2603_vm9, %v2469_v35, %v2639_v63 }
 0x418   :  { %v4152_v61 = vpop.f32.mrf.mxu0  ;;  %4203 = vmatprep.mubr.msk.f32.mxu1 %vm2275_vm1, %v2671_v41 }
 0x419   :  { %v2484_v60 = vadd.f32 %v4152_v61, %v6527_v54  ;;  %4204 = vmatmul.mubr.msk.f32.gmra.mxu1 %vm2275_vm1, %v2672_v40 }
 0x41a   :  { %v2478_v15 = vpop.f32.mrf.mxu0 }
 0x41b   :  { %v2479_v3 = vadd.f32 %v2478_v15, %v6527_v54  ;;  %v2642_v62 = vmul.f32 %v6530_v18, %v2484_v60  ;;  %vm2606_vm10 = vcmp.gt.f32.partialorder %v2484_v60, 0.0 }
 0x41d   :  { %vm2605_vm11 = vcmp.gt.f32.partialorder %v2479_v3, 0.0  ;;  %v2641_v31 = vmul.f32 %v6530_v18, %v2479_v3  ;;  %v2674_v50 = vsel %vm2606_vm10, %v2484_v60, %v2642_v62 }
 0x41f   :  { %v2673_v7 = vsel %vm2605_vm11, %v2479_v3, %v2641_v31 }
 0x420   :  { %v4155_v12 = vpop.f32.mrf.mxu0  ;;  %4206 = vmatprep.mubr.msk.f32.mxu1 %vm2275_vm1, %v2673_v7 }
 0x421   :  { %v2494_v36 = vadd.f32 %v4155_v12, %v6527_v54  ;;  %4207 = vmatmul.mubr.msk.f32.gmra.mxu1 %vm2275_vm1, %v2674_v50 }
 0x422   :  { %v2488_v10 = vpop.f32.mrf.mxu0 }
 0x423   :  { %v2489_v16 = vadd.f32 %v2488_v10, %v6527_v54  ;;  %v2644_v20 = vmul.f32 %v6530_v18, %v2494_v36  ;;  %vm2608_vm12 = vcmp.gt.f32.partialorder %v2494_v36, 0.0 }
 0x425   :  { %vm2607_vm13 = vcmp.gt.f32.partialorder %v2489_v16, 0.0  ;;  %v2643_v11 = vmul.f32 %v6530_v18, %v2489_v16  ;;  %v2676_v9 = vsel %vm2608_vm12, %v2494_v36, %v2644_v20 }
 0x427   :  { %v2675_v2 = vsel %vm2607_vm13, %v2489_v16, %v2643_v11 }
 0x428   :  { %v4158_v17 = vpop.f32.mrf.mxu0  ;;  %4209 = vmatprep.mubr.msk.f32.mxu1 %vm2275_vm1, %v2675_v2 }
 0x429   :  { %v2504_v28 = vadd.f32 %v4158_v17, %v6527_v54  ;;  %4210 = vmatmul.mubr.msk.f32.gmra.mxu1 %vm2275_vm1, %v2676_v9 }
 0x42a   :  { %v2498_v45 = vpop.f32.mrf.mxu0 }
 0x42b   :  { %v2499_v46 = vadd.f32 %v2498_v45, %v6527_v54  ;;  %v2646_v0 = vmul.f32 %v6530_v18, %v2504_v28  ;;  %vm2610_vm14 = vcmp.gt.f32.partialorder %v2504_v28, 0.0 }
 0x42d   :  { %vm2609_vm15 = vcmp.gt.f32.partialorder %v2499_v46, 0.0  ;;  %v2645_v32 = vmul.f32 %v6530_v18, %v2499_v46  ;;  %v2678_v49 = vsel %vm2610_vm14, %v2504_v28, %v2646_v0 }
 0x42f   :  { %v2677_v26 = vsel %vm2609_vm15, %v2499_v46, %v2645_v32 }
 0x430   :  { %v4161_v42 = vpop.f32.mrf.mxu0  ;;  %4212 = vmatprep.mubr.msk.f32.mxu1 %vm2275_vm1, %v2677_v26 }
 0x431   :  { %v2514_v14 = vadd.f32 %v4161_v42, %v6527_v54  ;;  %4213 = vmatmul.mubr.msk.f32.gmra.mxu1 %vm2275_vm1, %v2678_v49 }
 0x432   :  { %v2508_v59 = vpop.f32.mrf.mxu0 }
 0x433   :  { %v2509_v37 = vadd.f32 %v2508_v59, %v6527_v54  ;;  %v2648_v27 = vmul.f32 %v6530_v18, %v2514_v14  ;;  %vm2612_vm0 = vcmp.gt.f32.partialorder %v2514_v14, 0.0 }
 0x435   :  { %vm2611_vm2 = vcmp.gt.f32.partialorder %v2509_v37, 0.0  ;;  %v2647_v5 = vmul.f32 %v6530_v18, %v2509_v37  ;;  %v2680_v21 = vsel %vm2612_vm0, %v2514_v14, %v2648_v27 }
 0x437   :  { %v2679_v22 = vsel %vm2611_vm2, %v2509_v37, %v2647_v5 }
 0x438   :  { %v4164_v25 = vpop.f32.mrf.mxu0  ;;  %4215 = vmatprep.mubr.msk.f32.mxu1 %vm2275_vm1, %v2679_v22 }
 0x439   :  { %v2524_v48 = vadd.f32 %v4164_v25, %v6527_v54  ;;  %4216 = vmatmul.mubr.msk.f32.gmra.mxu1 %vm2275_vm1, %v2680_v21 }
 0x43a   :  { %v2518_v30 = vpop.f32.mrf.mxu0 }
 0x43b   :  { %v2519_v43 = vadd.f32 %v2518_v30, %v6527_v54  ;;  %v2650_v39 = vmul.f32 %v6530_v18, %v2524_v48  ;;  %vm2614_vm3 = vcmp.gt.f32.partialorder %v2524_v48, 0.0 }
 0x43d   :  { %vm2613_vm4 = vcmp.gt.f32.partialorder %v2519_v43, 0.0  ;;  %v2649_v38 = vmul.f32 %v6530_v18, %v2519_v43  ;;  %v2682_v29 = vsel %vm2614_vm3, %v2524_v48, %v2650_v39 }
 0x43f   :  { %v2681_v44 = vsel %vm2613_vm4, %v2519_v43, %v2649_v38 }
 0x440   :  { %v4167_v53 = vpop.f32.mrf.mxu0  ;;  %4218 = vmatprep.mubr.msk.f32.mxu1 %vm2275_vm1, %v2681_v44 }
 0x441   :  { %v2534_v4 = vadd.f32 %v4167_v53, %v6527_v54  ;;  %4219 = vmatmul.mubr.msk.f32.gmra.mxu1 %vm2275_vm1, %v2682_v29 }
 0x442   :  { %v2528_v8 = vpop.f32.mrf.mxu0 }
 0x443   :  { %v2529_v55 = vadd.f32 %v2528_v8, %v6527_v54  ;;  %v2652_v56 = vmul.f32 %v6530_v18, %v2534_v4  ;;  %vm2616_vm5 = vcmp.gt.f32.partialorder %v2534_v4, 0.0 }
 0x445   :  { %vm2615_vm6 = vcmp.gt.f32.partialorder %v2529_v55, 0.0  ;;  %v2651_v47 = vmul.f32 %v6530_v18, %v2529_v55  ;;  %v2684_v52 = vsel %vm2616_vm5, %v2534_v4, %v2652_v56  ;;  %v2699_v4 = vsub.s32 1, %v6517_v23 }
 0x447   :  { %v2683_v34 = vsel %vm2615_vm6, %v2529_v55, %v2651_v47  ;;  %v6643_v8 = vrot.slane %v6524_v33, %v2699_v4 }
 0x448   :  { %v4170_v24 = vpop.f32.mrf.mxu0  ;;  %4221 = vmatprep.mubr.msk.f32.mxu1 %vm2275_vm1, %v2683_v34 }
 0x449   :  { %v2544_v1 = vadd.f32 %v4170_v24, %v6527_v54  ;;  %4222 = vmatmul.mubr.msk.f32.gmra.mxu1 %vm2275_vm1, %v2684_v52 }
 0x44a   :  { %v2538_v35 = vpop.f32.mrf.mxu0 }
 0x44b   :  { %v2539_v58 = vadd.f32 %v2538_v35, %v6527_v54  ;;  %v2654_v63 = vmul.f32 %v6530_v18, %v2544_v1  ;;  %vm2618_vm7 = vcmp.gt.f32.partialorder %v2544_v1, 0.0 }
 0x44d   :  { %vm2617_vm8 = vcmp.gt.f32.partialorder %v2539_v58, 0.0  ;;  %v2653_v41 = vmul.f32 %v6530_v18, %v2539_v58  ;;  %v2686_v61 = vsel %vm2618_vm7, %v2544_v1, %v2654_v63 }
 0x44f   :  { %v2685_v40 = vsel %vm2617_vm8, %v2539_v58, %v2653_v41 }
 0x450   :  { %v4173_v60 = vpop.f32.mrf.mxu0  ;;  %4224 = vmatprep.mubr.msk.f32.mxu1 %vm2275_vm1, %v2685_v40 }
 0x451   :  { %v2554_v15 = vadd.f32 %v4173_v60, %v6527_v54  ;;  %4225 = vmatmul.mubr.msk.f32.gmra.mxu1 %vm2275_vm1, %v2686_v61 }
 0x452   :  { %v2548_v3 = vpop.f32.mrf.mxu0 }
 0x453   :  { %v2549_v62 = vadd.f32 %v2548_v3, %v6527_v54  ;;  %v2656_v31 = vmul.f32 %v6530_v18, %v2554_v15  ;;  %vm2620_vm9 = vcmp.gt.f32.partialorder %v2554_v15, 0.0 }
 0x455   :  { %vm2619_vm10 = vcmp.gt.f32.partialorder %v2549_v62, 0.0  ;;  %v2655_v7 = vmul.f32 %v6530_v18, %v2549_v62  ;;  %v2688_v12 = vsel %vm2620_vm9, %v2554_v15, %v2656_v31 }
 0x457   :  { %v2687_v50 = vsel %vm2619_vm10, %v2549_v62, %v2655_v7 }
 0x458   :  { %v4176_v36 = vpop.f32.mrf.mxu0  ;;  %4227 = vmatprep.mubr.msk.f32.mxu1 %vm2275_vm1, %v2687_v50 }
 0x459   :  { %v2564_v10 = vadd.f32 %v4176_v36, %v6527_v54  ;;  %4228 = vmatmul.mubr.msk.f32.gmra.mxu1 %vm2275_vm1, %v2688_v12 }
 0x45a   :  { %v2558_v16 = vpop.f32.mrf.mxu0 }
 0x45b   :  { %v2559_v20 = vadd.f32 %v2558_v16, %v6527_v54  ;;  %v2658_v11 = vmul.f32 %v6530_v18, %v2564_v10  ;;  %vm2622_vm11 = vcmp.gt.f32.partialorder %v2564_v10, 0.0 }
 0x45d   :  { %vm2621_vm12 = vcmp.gt.f32.partialorder %v2559_v20, 0.0  ;;  %v2657_v2 = vmul.f32 %v6530_v18, %v2559_v20  ;;  %v2690_v17 = vsel %vm2622_vm11, %v2564_v10, %v2658_v11 }
 0x45f   :  { %v2689_v9 = vsel %vm2621_vm12, %v2559_v20, %v2657_v2 }
 0x460   :  { %v4179_v28 = vpop.f32.mrf.mxu0  ;;  %4230 = vmatprep.mubr.msk.f32.mxu1 %vm2275_vm1, %v2689_v9 }
 0x461   :  { %v2574_v45 = vadd.f32 %v4179_v28, %v6527_v54  ;;  %4231 = vmatmul.mubr.msk.f32.gmra.mxu1 %vm2275_vm1, %v2690_v17 }
 0x462   :  { %v2568_v46 = vpop.f32.mrf.mxu0 }
 0x463   :  { %v2569_v0 = vadd.f32 %v2568_v46, %v6527_v54  ;;  %v2660_v32 = vmul.f32 %v6530_v18, %v2574_v45  ;;  %vm2624_vm13 = vcmp.gt.f32.partialorder %v2574_v45, 0.0 }
 0x465   :  { %vm2623_vm14 = vcmp.gt.f32.partialorder %v2569_v0, 0.0  ;;  %v2659_v26 = vmul.f32 %v6530_v18, %v2569_v0  ;;  %v2692_v42 = vsel %vm2624_vm13, %v2574_v45, %v2660_v32 }
 0x467   :  { %v2691_v49 = vsel %vm2623_vm14, %v2569_v0, %v2659_v26 }
 0x468   :  { %v4182_v14 = vpop.f32.mrf.mxu0  ;;  %4233 = vmatprep.mubr.msk.f32.mxu1 %vm2275_vm1, %v2691_v49 }
 0x469   :  { %v2584_v59 = vadd.f32 %v4182_v14, %v6527_v54  ;;  %4234 = vmatmul.mubr.msk.f32.gmra.mxu1 %vm2275_vm1, %v2692_v42 }
 0x46a   :  { %v2578_v37 = vpop.f32.mrf.mxu0 }
 0x46b   :  { %v2579_v27 = vadd.f32 %v2578_v37, %v6527_v54  ;;  %v2662_v5 = vmul.f32 %v6530_v18, %v2584_v59  ;;  %vm2626_vm15 = vcmp.gt.f32.partialorder %v2584_v59, 0.0 }
 0x46d   :  { %vm2625_vm0 = vcmp.gt.f32.partialorder %v2579_v27, 0.0  ;;  %v2661_v22 = vmul.f32 %v6530_v18, %v2579_v27  ;;  %v2694_v25 = vsel %vm2626_vm15, %v2584_v59, %v2662_v5 }
 0x46f   :  { %v2693_v21 = vsel %vm2625_vm0, %v2579_v27, %v2661_v22 }
 0x470   :  { %v4185_v48 = vpop.f32.mrf.mxu0  ;;  %4236 = vmatprep.mubr.msk.f32.mxu1 %vm2275_vm1, %v2693_v21 }
 0x471   :  { %v2594_v30 = vadd.f32 %v4185_v48, %v6527_v54  ;;  %4237 = vmatmul.mubr.msk.f32.gmra.mxu1 %vm2275_vm1, %v2694_v25 }
 0x472   :  { %v2588_v43 = vpop.f32.mrf.mxu0 }
 0x473   :  { %v2589_v39 = vadd.f32 %v2588_v43, %v6527_v54  ;;  %v2664_v38 = vmul.f32 %v6530_v18, %v2594_v30  ;;  %vm2628_vm2 = vcmp.gt.f32.partialorder %v2594_v30, 0.0  ;;  %v6646_v54 = vrot.slane %v6524_v33, %v3056_v6 }
 0x475   :  { %vm2627_vm3 = vcmp.gt.f32.partialorder %v2589_v39, 0.0  ;;  %v2663_v44 = vmul.f32 %v6530_v18, %v2589_v39  ;;  %v2696_v53 = vsel %vm2628_vm2, %v2594_v30, %v2664_v38 }
 0x477   :  { %v2695_v29 = vsel %vm2627_vm3, %v2589_v39, %v2663_v44 }
 0x478   :  { %4239 = vmatprep.mubr.msk.f32.mxu1 %vm2275_vm1, %v2695_v29 }
 0x479   :  { %4240 = vmatmul.mubr.msk.f32.gmra.mxu1 %vm2275_vm1, %v2696_v53 }
 0x4c1   :  { %v4196_v55 = vpop.f32.mrf.mxu1 }
 0x4c2   :  { %v2869_v51 = vadd.f32 %v4196_v55, %v6643_v8 }
 0x4c3   :  { %v2863_v18 = vpop.f32.mrf.mxu1 }
 0x4c4   :  { %v2864_v56 = vadd.f32 %v2863_v18, %v6643_v8  ;;  %v3059_v47 = vmul.f32 %v6646_v54, %v2869_v51  ;;  %vm3023_vm4 = vcmp.gt.f32.partialorder %v2869_v51, 0.0 }
 0x4c6   :  { %vm3022_vm5 = vcmp.gt.f32.partialorder %v2864_v56, 0.0  ;;  %v3058_v57 = vmul.f32 %v6646_v54, %v2864_v56  ;;  %v3091_v34 = vsel %vm3023_vm4, %v2869_v51, %v3059_v47 }
 0x4c8   :  { %v3090_v19 = vsel %vm3022_vm5, %v2864_v56, %v3058_v57 }
 0x4c9   :  { %v4199_v52 = vpop.f32.mrf.mxu1  ;;  %4250 = vmatprep.mubr.msk.f32.mxu0 %vm2275_vm1, %v3090_v19 }
 0x4ca   :  { %v2879_v24 = vadd.f32 %v4199_v52, %v6643_v8  ;;  %4251 = vmatmul.mubr.msk.f32.vlgmr.msra.gmra.mxu0 %vm2275_vm1, %v3091_v34 }
 0x4cb   :  { %v2873_v1 = vpop.f32.mrf.mxu1 }
 0x4cc   :  { %v2874_v35 = vadd.f32 %v2873_v1, %v6643_v8  ;;  %v3061_v58 = vmul.f32 %v6646_v54, %v2879_v24  ;;  %vm3025_vm6 = vcmp.gt.f32.partialorder %v2879_v24, 0.0 }
 0x4ce   :  { %vm3024_vm7 = vcmp.gt.f32.partialorder %v2874_v35, 0.0  ;;  %v3060_v63 = vmul.f32 %v6646_v54, %v2874_v35  ;;  %v3093_v40 = vsel %vm3025_vm6, %v2879_v24, %v3061_v58 }
 0x4d0   :  { %v3092_v41 = vsel %vm3024_vm7, %v2874_v35, %v3060_v63 }
 0x4d1   :  { %v4202_v61 = vpop.f32.mrf.mxu1  ;;  %4253 = vmatprep.mubr.msk.f32.mxu0 %vm2275_vm1, %v3092_v41 }
 0x4d2   :  { %v2889_v60 = vadd.f32 %v4202_v61, %v6643_v8  ;;  %4254 = vmatmul.mubr.msk.f32.gmra.mxu0 %vm2275_vm1, %v3093_v40 }
 0x4d3   :  { %v2883_v15 = vpop.f32.mrf.mxu1 }
 0x4d4   :  { %v2884_v3 = vadd.f32 %v2883_v15, %v6643_v8  ;;  %v3063_v62 = vmul.f32 %v6646_v54, %v2889_v60  ;;  %vm3027_vm8 = vcmp.gt.f32.partialorder %v2889_v60, 0.0 }
 0x4d6   :  { %vm3026_vm9 = vcmp.gt.f32.partialorder %v2884_v3, 0.0  ;;  %v3062_v31 = vmul.f32 %v6646_v54, %v2884_v3  ;;  %v3095_v50 = vsel %vm3027_vm8, %v2889_v60, %v3063_v62 }
 0x4d8   :  { %v3094_v7 = vsel %vm3026_vm9, %v2884_v3, %v3062_v31 }
 0x4d9   :  { %v4205_v12 = vpop.f32.mrf.mxu1  ;;  %4256 = vmatprep.mubr.msk.f32.mxu0 %vm2275_vm1, %v3094_v7 }
 0x4da   :  { %v2899_v36 = vadd.f32 %v4205_v12, %v6643_v8  ;;  %4257 = vmatmul.mubr.msk.f32.gmra.mxu0 %vm2275_vm1, %v3095_v50 }
 0x4db   :  { %v2893_v10 = vpop.f32.mrf.mxu1 }
 0x4dc   :  { %v2894_v16 = vadd.f32 %v2893_v10, %v6643_v8  ;;  %v3065_v20 = vmul.f32 %v6646_v54, %v2899_v36  ;;  %vm3029_vm10 = vcmp.gt.f32.partialorder %v2899_v36, 0.0 }
 0x4de   :  { %vm3028_vm11 = vcmp.gt.f32.partialorder %v2894_v16, 0.0  ;;  %v3064_v11 = vmul.f32 %v6646_v54, %v2894_v16  ;;  %v3097_v9 = vsel %vm3029_vm10, %v2899_v36, %v3065_v20 }
 0x4e0   :  { %v3096_v2 = vsel %vm3028_vm11, %v2894_v16, %v3064_v11 }
 0x4e1   :  { %v4208_v17 = vpop.f32.mrf.mxu1  ;;  %4259 = vmatprep.mubr.msk.f32.mxu0 %vm2275_vm1, %v3096_v2 }
 0x4e2   :  { %v2909_v28 = vadd.f32 %v4208_v17, %v6643_v8  ;;  %4260 = vmatmul.mubr.msk.f32.gmra.mxu0 %vm2275_vm1, %v3097_v9 }
 0x4e3   :  { %v2903_v45 = vpop.f32.mrf.mxu1 }
 0x4e4   :  { %v2904_v46 = vadd.f32 %v2903_v45, %v6643_v8  ;;  %v3067_v0 = vmul.f32 %v6646_v54, %v2909_v28  ;;  %vm3031_vm12 = vcmp.gt.f32.partialorder %v2909_v28, 0.0 }
 0x4e6   :  { %vm3030_vm13 = vcmp.gt.f32.partialorder %v2904_v46, 0.0  ;;  %v3066_v32 = vmul.f32 %v6646_v54, %v2904_v46  ;;  %v3099_v49 = vsel %vm3031_vm12, %v2909_v28, %v3067_v0 }
 0x4e8   :  { %v3098_v26 = vsel %vm3030_vm13, %v2904_v46, %v3066_v32 }
 0x4e9   :  { %v4211_v42 = vpop.f32.mrf.mxu1  ;;  %4262 = vmatprep.mubr.msk.f32.mxu0 %vm2275_vm1, %v3098_v26 }
 0x4ea   :  { %v2919_v14 = vadd.f32 %v4211_v42, %v6643_v8  ;;  %4263 = vmatmul.mubr.msk.f32.gmra.mxu0 %vm2275_vm1, %v3099_v49 }
 0x4eb   :  { %v2913_v59 = vpop.f32.mrf.mxu1 }
 0x4ec   :  { %v2914_v37 = vadd.f32 %v2913_v59, %v6643_v8  ;;  %v3069_v27 = vmul.f32 %v6646_v54, %v2919_v14  ;;  %vm3033_vm14 = vcmp.gt.f32.partialorder %v2919_v14, 0.0 }
 0x4ee   :  { %vm3032_vm15 = vcmp.gt.f32.partialorder %v2914_v37, 0.0  ;;  %v3068_v5 = vmul.f32 %v6646_v54, %v2914_v37  ;;  %v3101_v21 = vsel %vm3033_vm14, %v2919_v14, %v3069_v27 }
 0x4f0   :  { %v3100_v22 = vsel %vm3032_vm15, %v2914_v37, %v3068_v5 }
 0x4f1   :  { %v4214_v25 = vpop.f32.mrf.mxu1  ;;  %4265 = vmatprep.mubr.msk.f32.mxu0 %vm2275_vm1, %v3100_v22 }
 0x4f2   :  { %v2929_v48 = vadd.f32 %v4214_v25, %v6643_v8  ;;  %4266 = vmatmul.mubr.msk.f32.gmra.mxu0 %vm2275_vm1, %v3101_v21 }
 0x4f3   :  { %v2923_v30 = vpop.f32.mrf.mxu1 }
 0x4f4   :  { %v2924_v43 = vadd.f32 %v2923_v30, %v6643_v8  ;;  %v3071_v39 = vmul.f32 %v6646_v54, %v2929_v48  ;;  %vm3035_vm0 = vcmp.gt.f32.partialorder %v2929_v48, 0.0 }
 0x4f6   :  { %vm3034_vm2 = vcmp.gt.f32.partialorder %v2924_v43, 0.0  ;;  %v3070_v38 = vmul.f32 %v6646_v54, %v2924_v43  ;;  %v3103_v29 = vsel %vm3035_vm0, %v2929_v48, %v3071_v39 }
 0x4f8   :  { %v3102_v44 = vsel %vm3034_vm2, %v2924_v43, %v3070_v38 }
 0x4f9   :  { %v4217_v53 = vpop.f32.mrf.mxu1  ;;  %4268 = vmatprep.mubr.msk.f32.mxu0 %vm2275_vm1, %v3102_v44 }
 0x4fa   :  { %v2939_v4 = vadd.f32 %v4217_v53, %v6643_v8  ;;  %4269 = vmatmul.mubr.msk.f32.gmra.mxu0 %vm2275_vm1, %v3103_v29 }
 0x4fb   :  { %v2933_v6 = vpop.f32.mrf.mxu1 }
 0x4fc   :  { %v2934_v55 = vadd.f32 %v2933_v6, %v6643_v8  ;;  %v3073_v51 = vmul.f32 %v6646_v54, %v2939_v4  ;;  %vm3037_vm3 = vcmp.gt.f32.partialorder %v2939_v4, 0.0 }
 0x4fe   :  { %vm3036_vm4 = vcmp.gt.f32.partialorder %v2934_v55, 0.0  ;;  %v3072_v18 = vmul.f32 %v6646_v54, %v2934_v55  ;;  %v3105_v47 = vsel %vm3037_vm3, %v2939_v4, %v3073_v51 }
 0x500   :  { %v3104_v56 = vsel %vm3036_vm4, %v2934_v55, %v3072_v18 }
 0x501   :  { %v4220_v57 = vpop.f32.mrf.mxu1  ;;  %4271 = vmatprep.mubr.msk.f32.mxu0 %vm2275_vm1, %v3104_v56 }
 0x502   :  { %v2949_v19 = vadd.f32 %v4220_v57, %v6643_v8  ;;  %4272 = vmatmul.mubr.msk.f32.gmra.mxu0 %vm2275_vm1, %v3105_v47 }
 0x503   :  { %v2943_v34 = vpop.f32.mrf.mxu1 }
 0x504   :  { %v2944_v52 = vadd.f32 %v2943_v34, %v6643_v8  ;;  %v3075_v24 = vmul.f32 %v6646_v54, %v2949_v19  ;;  %vm3039_vm5 = vcmp.gt.f32.partialorder %v2949_v19, 0.0 }
 0x506   :  { %vm3038_vm6 = vcmp.gt.f32.partialorder %v2944_v52, 0.0  ;;  %v3074_v1 = vmul.f32 %v6646_v54, %v2944_v52  ;;  %v3107_v58 = vsel %vm3039_vm5, %v2949_v19, %v3075_v24 }
 0x508   :  { %v3106_v35 = vsel %vm3038_vm6, %v2944_v52, %v3074_v1 }
 0x509   :  { %v4223_v63 = vpop.f32.mrf.mxu1  ;;  %4274 = vmatprep.mubr.msk.f32.mxu0 %vm2275_vm1, %v3106_v35 }
 0x50a   :  { %v2959_v41 = vadd.f32 %v4223_v63, %v6643_v8  ;;  %4275 = vmatmul.mubr.msk.f32.gmra.mxu0 %vm2275_vm1, %v3107_v58 }
 0x50b   :  { %v2953_v40 = vpop.f32.mrf.mxu1 }
 0x50c   :  { %v2954_v61 = vadd.f32 %v2953_v40, %v6643_v8  ;;  %v3077_v60 = vmul.f32 %v6646_v54, %v2959_v41  ;;  %vm3041_vm7 = vcmp.gt.f32.partialorder %v2959_v41, 0.0 }
 0x50e   :  { %vm3040_vm8 = vcmp.gt.f32.partialorder %v2954_v61, 0.0  ;;  %v3076_v15 = vmul.f32 %v6646_v54, %v2954_v61  ;;  %v3109_v62 = vsel %vm3041_vm7, %v2959_v41, %v3077_v60 }
 0x510   :  { %v3108_v3 = vsel %vm3040_vm8, %v2954_v61, %v3076_v15  ;;  %v3550_v15 = vrot.slane %v6524_v33, 6 }
 0x511   :  { %v4226_v31 = vpop.f32.mrf.mxu1  ;;  %4277 = vmatprep.mubr.msk.f32.mxu0 %vm2275_vm1, %v3108_v3 }
 0x512   :  { %v2969_v7 = vadd.f32 %v4226_v31, %v6643_v8  ;;  %4278 = vmatmul.mubr.msk.f32.gmra.mxu0 %vm2275_vm1, %v3109_v62  ;;  %4128 = vmatprep.mubr.msk.f32.mxu1 %vm2275_vm1, %v3550_v15 }
 0x513   :  { %v2963_v50 = vpop.f32.mrf.mxu1 }
 0x514   :  { %v2964_v12 = vadd.f32 %v2963_v50, %v6643_v8  ;;  %v3079_v36 = vmul.f32 %v6646_v54, %v2969_v7  ;;  %vm3043_vm9 = vcmp.gt.f32.partialorder %v2969_v7, 0.0 }
 0x516   :  { %vm3042_vm10 = vcmp.gt.f32.partialorder %v2964_v12, 0.0  ;;  %v3078_v10 = vmul.f32 %v6646_v54, %v2964_v12  ;;  %v3111_v20 = vsel %vm3043_vm9, %v2969_v7, %v3079_v36 }
 0x518   :  { %v3110_v16 = vsel %vm3042_vm10, %v2964_v12, %v3078_v10 }
 0x519   :  { %v4229_v11 = vpop.f32.mrf.mxu1  ;;  %4280 = vmatprep.mubr.msk.f32.mxu0 %vm2275_vm1, %v3110_v16 }
 0x51a   :  { %v2979_v2 = vadd.f32 %v4229_v11, %v6643_v8  ;;  %4281 = vmatmul.mubr.msk.f32.gmra.mxu0 %vm2275_vm1, %v3111_v20 }
 0x51b   :  { %v2973_v9 = vpop.f32.mrf.mxu1 }
 0x51c   :  { %v2974_v17 = vadd.f32 %v2973_v9, %v6643_v8  ;;  %v3081_v28 = vmul.f32 %v6646_v54, %v2979_v2  ;;  %vm3045_vm11 = vcmp.gt.f32.partialorder %v2979_v2, 0.0 }
 0x51e   :  { %vm3044_vm12 = vcmp.gt.f32.partialorder %v2974_v17, 0.0  ;;  %v3080_v45 = vmul.f32 %v6646_v54, %v2974_v17  ;;  %v3113_v0 = vsel %vm3045_vm11, %v2979_v2, %v3081_v28 }
 0x520   :  { %v3112_v46 = vsel %vm3044_vm12, %v2974_v17, %v3080_v45 }
 0x521   :  { %v4232_v32 = vpop.f32.mrf.mxu1  ;;  %4283 = vmatprep.mubr.msk.f32.mxu0 %vm2275_vm1, %v3112_v46 }
 0x522   :  { %v2989_v26 = vadd.f32 %v4232_v32, %v6643_v8  ;;  %4284 = vmatmul.mubr.msk.f32.gmra.mxu0 %vm2275_vm1, %v3113_v0  ;;  %v3124_v0 = vsub.s32 2, %v6517_v23 }
 0x523   :  { %v2983_v49 = vpop.f32.mrf.mxu1 }
 0x524   :  { %v2984_v42 = vadd.f32 %v2983_v49, %v6643_v8  ;;  %v3083_v14 = vmul.f32 %v6646_v54, %v2989_v26  ;;  %vm3047_vm13 = vcmp.gt.f32.partialorder %v2989_v26, 0.0  ;;  %v6790_v49 = vrot.slane %v6524_v33, %v3124_v0 }
 0x526   :  { %vm3046_vm14 = vcmp.gt.f32.partialorder %v2984_v42, 0.0  ;;  %v3082_v59 = vmul.f32 %v6646_v54, %v2984_v42  ;;  %v3115_v27 = vsel %vm3047_vm13, %v2989_v26, %v3083_v14 }
 0x528   :  { %v3114_v37 = vsel %vm3046_vm14, %v2984_v42, %v3082_v59  ;;  %v3481_v42 = vsub.s32 5, %v6517_v23 }
 0x529   :  { %v4235_v5 = vpop.f32.mrf.mxu1  ;;  %4286 = vmatprep.mubr.msk.f32.mxu0 %vm2275_vm1, %v3114_v37 }
 0x52a   :  { %v2999_v22 = vadd.f32 %v4235_v5, %v6643_v8  ;;  %4287 = vmatmul.mubr.msk.f32.gmra.mxu0 %vm2275_vm1, %v3115_v27  ;;  %v6795_v37 = vrot.slane %v6524_v33, %v3481_v42  ;;  %v4591_v33 = vmov 1966171168  }
 0x52b   :  { %v2993_v21 = vpop.f32.mrf.mxu1 }
 0x52c   :  { %v2994_v25 = vadd.f32 %v2993_v21, %v6643_v8  ;;  %v3085_v48 = vmul.f32 %v6646_v54, %v2999_v22  ;;  %vm3049_vm15 = vcmp.gt.f32.partialorder %v2999_v22, 0.0 }
 0x52e   :  { %vm3048_vm0 = vcmp.gt.f32.partialorder %v2994_v25, 0.0  ;;  %v3084_v30 = vmul.f32 %v6646_v54, %v2994_v25  ;;  %v3117_v39 = vsel %vm3049_vm15, %v2999_v22, %v3085_v48 }
 0x530   :  { %v3116_v43 = vsel %vm3048_vm0, %v2994_v25, %v3084_v30 }
 0x531   :  { %v4238_v38 = vpop.f32.mrf.mxu1  ;;  %4289 = vmatprep.mubr.msk.f32.mxu0 %vm2275_vm1, %v3116_v43 }
 0x532   :  { %v3009_v44 = vadd.f32 %v4238_v38, %v6643_v8  ;;  %4290 = vmatmul.mubr.msk.f32.gmra.mxu0 %vm2275_vm1, %v3117_v39 }
 0x533   :  { %v3003_v29 = vpop.f32.mrf.mxu1 }
 0x534   :  { %v3004_v53 = vadd.f32 %v3003_v29, %v6643_v8  ;;  %v3087_v4 = vmul.f32 %v6646_v54, %v3009_v44  ;;  %vm3051_vm2 = vcmp.gt.f32.partialorder %v3009_v44, 0.0 }
 0x536   :  { %vm3050_vm3 = vcmp.gt.f32.partialorder %v3004_v53, 0.0  ;;  %v3086_v6 = vmul.f32 %v6646_v54, %v3004_v53  ;;  %v3119_v51 = vsel %vm3051_vm2, %v3009_v44, %v3087_v4 }
 0x538   :  { %v3118_v55 = vsel %vm3050_vm3, %v3004_v53, %v3086_v6 }
 0x539   :  { %v4241_v18 = vpop.f32.mrf.mxu1  ;;  %4292 = vmatprep.mubr.msk.f32.mxu0 %vm2275_vm1, %v3118_v55 }
 0x53a   :  { %v3019_v56 = vadd.f32 %v4241_v18, %v6643_v8  ;;  %4293 = vmatmul.mubr.msk.f32.gmra.mxu0 %vm2275_vm1, %v3119_v51 }
 0x53b   :  { %v3013_v47 = vpop.f32.mrf.mxu1 }
 0x53c   :  { %v3014_v57 = vadd.f32 %v3013_v47, %v6643_v8  ;;  %v3089_v19 = vmul.f32 %v6646_v54, %v3019_v56  ;;  %vm3053_vm4 = vcmp.gt.f32.partialorder %v3019_v56, 0.0 }
 0x53e   :  { %vm3052_vm5 = vcmp.gt.f32.partialorder %v3014_v57, 0.0  ;;  %v3088_v34 = vmul.f32 %v6646_v54, %v3014_v57  ;;  %v3121_v24 = vsel %vm3053_vm4, %v3019_v56, %v3089_v19 }
 0x540   :  { %v3120_v52 = vsel %vm3052_vm5, %v3014_v57, %v3088_v34 }
 0x541   :  { %4295 = vmatprep.mubr.msk.f32.mxu0 %vm2275_vm1, %v3120_v52 }
 0x542   :  { %4296 = vmatmul.mubr.msk.f32.gmra.mxu0 %vm2275_vm1, %v3121_v24 }
 0x58a   :  { %v6744_v1 = vpop.f32.mrf.mxu0 }
 0x58c   :  { %v6746_v35 = vpop.f32.mrf.mxu0 }
 0x592   :  { %v6748_v58 = vpop.f32.mrf.mxu0 }
 0x594   :  { %v6750_v63 = vpop.f32.mrf.mxu0 }
 0x59a   :  { %v6752_v8 = vpop.f32.mrf.mxu0 }
 0x59c   :  { %v6754_v41 = vpop.f32.mrf.mxu0 }
 0x5a2   :  { %v6756_v40 = vpop.f32.mrf.mxu0 }
 0x5a4   :  { %v6758_v54 = vpop.f32.mrf.mxu0 }
 0x5aa   :  { %v6760_v61 = vpop.f32.mrf.mxu0 }
 0x5ab   :  { %v3334_v42 = vadd.f32 %v6760_v61, %v6790_v49 }
 0x5ac   :  { %v6762_v60 = vpop.f32.mrf.mxu0 }
 0x5ad   :  { %v3329_v61 = vadd.f32 %v6762_v60, %v6790_v49  ;;  %vm3456_vm4 = vcmp.gt.f32.partialorder %v3334_v42, 0.0 }
 0x5b2   :  { %v4267_v3 = vpop.f32.mrf.mxu0 }
 0x5b3   :  { %v3344_v34 = vadd.f32 %v4267_v3, %v6790_v49 }
 0x5b4   :  { %v6768_v62 = vpop.f32.mrf.mxu0 }
 0x5b5   :  { %vm3458_vm15 = vcmp.gt.f32.partialorder %v3344_v34, 0.0 }
 0x5ba   :  { %v4270_v31 = vpop.f32.mrf.mxu0 }
 0x5bb   :  { %v3354_v44 = vadd.f32 %v4270_v31, %v6790_v49 }
 0x5bc   :  { %v3348_v7 = vpop.f32.mrf.mxu0 }
 0x5bd   :  { %v3496_v51 = vmul.f32 %v6795_v37, %v3354_v44  ;;  %v3349_v18 = vadd.f32 %v3348_v7, %v6790_v49  ;;  %vm3460_vm11 = vcmp.gt.f32.partialorder %v3354_v44, 0.0 }
 0x5bf   :  { %v3528_v52 = vsel %vm3460_vm11, %v3354_v44, %v3496_v51  ;;  %v3495_v24 = vmul.f32 %v6795_v37, %v3349_v18  ;;  %vm3459_vm13 = vcmp.gt.f32.partialorder %v3349_v18, 0.0 }
 0x5c1   :  { %v3527_v3 = vsel %vm3459_vm13, %v3349_v18, %v3495_v24 }
 0x5c2   :  { %v4273_v50 = vpop.f32.mrf.mxu0 }
 0x5c3   :  { %v3364_v14 = vadd.f32 %v4273_v50, %v6790_v49 }
 0x5c4   :  { %v3358_v12 = vpop.f32.mrf.mxu0 }
 0x5c5   :  { %vm3462_vm6 = vcmp.gt.f32.partialorder %v3364_v14, 0.0  ;;  %v3498_v22 = vmul.f32 %v6795_v37, %v3364_v14  ;;  %v3359_v21 = vadd.f32 %v3358_v12, %v6790_v49  ;;  %v3494_v12 = vmul.f32 %v6795_v37, %v3344_v34 }
 0x5c7   :  { %v3530_v29 = vsel %vm3462_vm6, %v3364_v14, %v3498_v22  ;;  %v3497_v53 = vmul.f32 %v6795_v37, %v3359_v21  ;;  %vm3461_vm9 = vcmp.gt.f32.partialorder %v3359_v21, 0.0  ;;  %v3526_v14 = vsel %vm3458_vm15, %v3344_v34, %v3494_v12 }
 0x5c8   :  { %vm3455_vm6 = vcmp.gt.f32.partialorder %v3329_v61, 0.0 }
 0x5c9   :  { %v3529_v56 = vsel %vm3461_vm9, %v3359_v21, %v3497_v53 }
 0x5ca   :  { %v6770_v36 = vpop.f32.mrf.mxu0 }
 0x5cc   :  { %v6772_v10 = vpop.f32.mrf.mxu0 }
 0x5d2   :  { %v6774_v16 = vpop.f32.mrf.mxu0 }
 0x5d4   :  { %v6776_v20 = vpop.f32.mrf.mxu0 }
 0x5da   :  { %v6778_v11 = vpop.f32.mrf.mxu0 }
 0x5dc   :  { %v6780_v2 = vpop.f32.mrf.mxu0 }
 0x5e2   :  { %v6782_v9 = vpop.f32.mrf.mxu0 }
 0x5e3   :  { %v3404_v21 = vadd.f32 %v6782_v9, %v6790_v49 }
 0x5e4   :  { %v6784_v17 = vpop.f32.mrf.mxu0 }
 0x5e5   :  { %v3506_v60 = vmul.f32 %v6795_v37, %v3404_v21  ;;  %v3399_v9 = vadd.f32 %v6784_v17, %v6790_v49 }
 0x5e7   :  { %v3505_v53 = vmul.f32 %v6795_v37, %v3399_v9  ;;  %vm3469_vm9 = vcmp.gt.f32.partialorder %v3399_v9, 0.0 }
 0x5e9   :  { %v3537_v51 = vsel %vm3469_vm9, %v3399_v9, %v3505_v53 }
 0x5ea   :  { %v4288_v28 = vpop.f32.mrf.mxu0 }
 0x5eb   :  { %v3414_v0 = vadd.f32 %v4288_v28, %v6790_v49 }
 0x5ec   :  { %v6786_v45 = vpop.f32.mrf.mxu0 }
 0x5ed   :  { %v3409_v28 = vadd.f32 %v6786_v45, %v6790_v49  ;;  %vm3472_vm3 = vcmp.gt.f32.partialorder %v3414_v0, 0.0 }
 0x5ef   :  { %vm3471_vm5 = vcmp.gt.f32.partialorder %v3409_v28, 0.0 }
 0x5f2   :  { %v4291_v46 = vpop.f32.mrf.mxu0 }
 0x5f3   :  { %v3424_v47 = vadd.f32 %v4291_v46, %v6790_v49  ;;  %v3339_v46 = vadd.f32 %v6768_v62, %v6790_v49  ;;  %v3508_v62 = vmul.f32 %v6795_v37, %v3414_v0 }
 0x5f4   :  { %v3418_v32 = vpop.f32.mrf.mxu0 }
 0x5f5   :  { %v3510_v31 = vmul.f32 %v6795_v37, %v3424_v47  ;;  %v3419_v7 = vadd.f32 %v3418_v32, %v6790_v49  ;;  %vm3474_vm14 = vcmp.gt.f32.partialorder %v3424_v47, 0.0  ;;  %vm3457_vm2 = vcmp.gt.f32.partialorder %v3339_v46, 0.0 }
 0x5f6   :  { %v3540_v45 = vsel %vm3472_vm3, %v3414_v0, %v3508_v62 }
 0x5f7   :  { %v3542_v32 = vsel %vm3474_vm14, %v3424_v47, %v3510_v31  ;;  %vm3473_vm0 = vcmp.gt.f32.partialorder %v3419_v7, 0.0  ;;  %v3384_v47 = vadd.f32 %v6774_v16, %v6790_v49  ;;  %v3379_v16 = vadd.f32 %v6776_v20, %v6790_v49 }
 0x5f9   :  { %vm3466_vm15 = vcmp.gt.f32.partialorder %v3384_v47, 0.0  ;;  %v3501_v12 = vmul.f32 %v6795_v37, %v3379_v16 }
 0x5fa   :  { %v4294_v26 = vpop.f32.mrf.mxu0 }
 0x5fb   :  { %v3434_v48 = vadd.f32 %v4294_v26, %v6790_v49  ;;  %v3509_v26 = vmul.f32 %v6795_v37, %v3419_v7 }
 0x5fc   :  { %v3428_v59 = vpop.f32.mrf.mxu0 }
 0x5fd   :  { %v3512_v4 = vmul.f32 %v6795_v37, %v3434_v48  ;;  %v3429_v6 = vadd.f32 %v3428_v59, %v6790_v49  ;;  %vm3476_vm10 = vcmp.gt.f32.partialorder %v3434_v48, 0.0  ;;  %v3493_v59 = vmul.f32 %v6795_v37, %v3339_v46 }
 0x5ff   :  { %v3511_v57 = vmul.f32 %v6795_v37, %v3429_v6  ;;  %v3544_v19 = vsel %vm3476_vm10, %v3434_v48, %v3512_v4  ;;  %vm3475_vm12 = vcmp.gt.f32.partialorder %v3429_v6, 0.0  ;;  %v3525_v22 = vsel %vm3457_vm2, %v3339_v46, %v3493_v59 }
 0x600   :  { %v3324_v48 = vadd.f32 %v6756_v40, %v6790_v49  ;;  %v3319_v40 = vadd.f32 %v6758_v54, %v6790_v49  ;;  %v3314_v4 = vadd.f32 %v6752_v8, %v6790_v49  ;;  %v3309_v8 = vadd.f32 %v6754_v41, %v6790_v49 }
 0x601   :  { %v3543_v50 = vsel %vm3475_vm12, %v3429_v6, %v3511_v57  ;;  %v3502_v41 = vmul.f32 %v6795_v37, %v3384_v47  ;;  %vm3465_vm2 = vcmp.gt.f32.partialorder %v3379_v16, 0.0  ;;  %v3294_v46 = vadd.f32 %v6744_v1, %v6790_v49 }
 0x602   :  { %v4297_v27 = vpop.f32.mrf.mxu0  ;;  %vm3453_vm10 = vcmp.gt.f32.partialorder %v3319_v40, 0.0  ;;  %v3488_v18 = vmul.f32 %v6795_v37, %v3314_v4  ;;  %vm3452_vm12 = vcmp.gt.f32.partialorder %v3314_v4, 0.0  ;;  %vm3451_vm14 = vcmp.gt.f32.partialorder %v3309_v8, 0.0 }
 0x603   :  { %v3444_v5 = vadd.f32 %v4297_v27, %v6790_v49  ;;  %v3541_v27 = vsel %vm3473_vm0, %v3419_v7, %v3509_v26  ;;  %v3534_v20 = vsel %vm3466_vm15, %v3384_v47, %v3502_v41  ;;  %v3533_v26 = vsel %vm3465_vm2, %v3379_v16, %v3501_v12 }
 0x604   :  { %v3438_v25 = vpop.f32.mrf.mxu0  ;;  %v3520_v34 = vsel %vm3452_vm12, %v3314_v4, %v3488_v18  ;;  %v3289_v1 = vadd.f32 %v6746_v35, %v6790_v49 }
 0x605   :  { %vm3478_vm7 = vcmp.gt.f32.partialorder %v3444_v5, 0.0  ;;  %v3514_v30 = vmul.f32 %v6795_v37, %v3444_v5  ;;  %v3439_v43 = vadd.f32 %v3438_v25, %v6790_v49  ;;  %v3507_v25 = vmul.f32 %v6795_v37, %v3409_v28 }
 0x606   :  { %v3483_v62 = vmul.f32 %v6795_v37, %v3289_v1 }
 0x607   :  { %vm3477_vm8 = vcmp.gt.f32.partialorder %v3439_v43, 0.0  ;;  %v3513_v39 = vmul.f32 %v6795_v37, %v3439_v43  ;;  %v3546_v38 = vsel %vm3478_vm7, %v3444_v5, %v3514_v30  ;;  %v3492_v5 = vmul.f32 %v6795_v37, %v3334_v42 }
 0x608   :  { %4096 = vmatprep.subr.msk.mxu1 %vm2275_vm1, %v3546_v38  ;;  %vm3470_vm7 = vcmp.gt.f32.partialorder %v3404_v21, 0.0  ;;  %v3490_v38 = vmul.f32 %v6795_v37, %v3324_v48 }
 0x609   :  { %4097 = vmatpush3.xpose.msk.msra.mxu1 %vm2275_vm1, %v3530_v29  ;;  %v3545_v55 = vsel %vm3477_vm8, %v3439_v43, %v3513_v39  ;;  %v3524_v30 = vsel %vm3456_vm4, %v3334_v42, %v3492_v5  ;;  %v3491_v43 = vmul.f32 %v6795_v37, %v3329_v61  ;;  %v3539_v39 = vsel %vm3471_vm5, %v3409_v28, %v3507_v25  ;;  %v958_v5 = vpop.trf.xlu0 }
 0x60a   :  { %4098 = vmatprep.subr.msk.mxu1 %vm2275_vm1, %v3545_v55  ;;  %vm3454_vm8 = vcmp.gt.f32.partialorder %v3324_v48, 0.0  ;;  %v3394_v29 = vadd.f32 %v6778_v11, %v6790_v49  ;;  %v3538_v17 = vsel %vm3470_vm7, %v3404_v21, %v3506_v60  ;;  %v3489_v55 = vmul.f32 %v6795_v37, %v3319_v40  ;;  %1006 = vst [vmem:[%s6939_s7] sm:$0xff] %v958_v5 }
 0x60b   :  { %v3523_v44 = vsel %vm3455_vm6, %v3329_v61, %v3491_v43  ;;  %v3522_v6 = vsel %vm3454_vm8, %v3324_v48, %v3490_v38  ;;  %v3389_v11 = vadd.f32 %v6780_v2, %v6790_v49  ;;  %vm3448_vm5 = vcmp.gt.f32.partialorder %v3294_v46, 0.0 }
 0x60c   :  { %v3504_v54 = vmul.f32 %v6795_v37, %v3394_v29  ;;  %vm3468_vm11 = vcmp.gt.f32.partialorder %v3394_v29, 0.0  ;;  %vm3447_vm7 = vcmp.gt.f32.partialorder %v3289_v1, 0.0 }
 0x60d   :  { %4099 = vmatpush3.xpose.msk.msra.mxu1 %vm2275_vm1, %v3529_v56  ;;  %v3521_v56 = vsel %vm3453_vm10, %v3319_v40, %v3489_v55  ;;  %v3503_v57 = vmul.f32 %v6795_v37, %v3389_v11  ;;  %vm3467_vm13 = vcmp.gt.f32.partialorder %v3389_v11, 0.0  ;;  %v3515_v35 = vsel %vm3447_vm7, %v3289_v1, %v3483_v62  ;;  %v959_v61 = vpop.trf.xlu0 }
 0x60e   :  { %4100 = vmatprep.subr.msk.mxu1 %vm2275_vm1, %v3544_v19  ;;  %v3536_v2 = vsel %vm3468_vm11, %v3394_v29, %v3504_v54  ;;  %v3304_v19 = vadd.f32 %v6748_v58, %v6790_v49  ;;  %v3299_v58 = vadd.f32 %v6750_v63, %v6790_v49  ;;  %1008 = vst [vmem:[%s6939_s7 + $0x10] sm:$0xff] %v959_v61 }
 0x60f   :  { %v3535_v24 = vsel %vm3467_vm13, %v3389_v11, %v3503_v57 }
 0x610   :  { %v3486_v31 = vmul.f32 %v6795_v37, %v3304_v19  ;;  %vm3450_vm0 = vcmp.gt.f32.partialorder %v3304_v19, 0.0  ;;  %v3485_v0 = vmul.f32 %v6795_v37, %v3299_v58  ;;  %vm3449_vm3 = vcmp.gt.f32.partialorder %v3299_v58, 0.0 }
 0x611   :  { %4101 = vmatpush3.xpose.msk.msra.mxu1 %vm2275_vm1, %v3528_v52  ;;  %v3487_v52 = vmul.f32 %v6795_v37, %v3309_v8 }
 0x612   :  { %4102 = vmatprep.subr.msk.mxu1 %vm2275_vm1, %v3543_v50  ;;  %v3374_v50 = vadd.f32 %v6770_v36, %v6790_v49  ;;  %v3369_v36 = vadd.f32 %v6772_v10, %v6790_v49  ;;  %v3517_v42 = vsel %vm3449_vm3, %v3299_v58, %v3485_v0  ;;  %v3549_v49 = vpop.permute.xlu1 %3548 }
 0x613   :  { %v3519_v7 = vsel %vm3451_vm14, %v3309_v8, %v3487_v52  ;;  %v3551_v25 = vrot.slane %v3549_v49, 7 }
 0x614   :  { %v3500_v63 = vmul.f32 %v6795_v37, %v3374_v50  ;;  %vm3464_vm4 = vcmp.gt.f32.partialorder %v3374_v50, 0.0  ;;  %vm3463_vm6 = vcmp.gt.f32.partialorder %v3369_v36, 0.0 }
 0x615   :  { %4103 = vmatpush3.xpose.msk.msra.mxu1 %vm2275_vm1, %v3527_v3  ;;  %v3518_v3 = vsel %vm3450_vm0, %v3304_v19, %v3486_v31 }
 0x616   :  { %4104 = vmatprep.subr.msk.mxu1 %vm2275_vm1, %v3542_v32  ;;  %v3484_v32 = vmul.f32 %v6795_v37, %v3294_v46  ;;  %v3532_v59 = vsel %vm3464_vm4, %v3374_v50, %v3500_v63 }
 0x618   :  { %v3516_v10 = vsel %vm3448_vm5, %v3294_v46, %v3484_v32 }
 0x619   :  { %4105 = vmatpush3.xpose.msk.msra.mxu1 %vm2275_vm1, %v3526_v14  ;;  %v3499_v14 = vmul.f32 %v6795_v37, %v3369_v36 }
 0x61a   :  { %4106 = vmatprep.subr.msk.mxu1 %vm2275_vm1, %v3541_v27  ;;  %v990_v27 = vpop.trf.xlu1 }
 0x61b   :  { %v3531_v28 = vsel %vm3463_vm6, %v3369_v36, %v3499_v14  ;;  %1007 = vst [vmem:[%s6939_s7 + $0x8] sm:$0xff] %v990_v27 }
 0x61d   :  { %4107 = vmatpush3.xpose.msk.msra.mxu1 %vm2275_vm1, %v3525_v22 }
 0x61e   :  { %4108 = vmatprep.subr.msk.mxu1 %vm2275_vm1, %v3540_v45  ;;  %v991_v37 = vpop.trf.xlu1 }
 0x61f   :  { %1009 = vst [vmem:[%s6939_s7 + $0x18] sm:$0xff] %v991_v37  ;;  %s4567_s7 = scalar_lea.vmem %s3752_s11, 32 }
 0x620   :  { %p4568_p0 = scmp.ne.s32.totalorder %s3752_s11, %s4567_s7  ;;  %p4573_p2 = scmp.lt.s32.totalorder %s4567_s7, %s4567_s7 }
 0x621   :  { %4109 = vmatpush3.xpose.msk.msra.mxu1 %vm2275_vm1, %v3524_v30 }
 0x622   :  { %4110 = vmatprep.subr.msk.mxu1 %vm2275_vm1, %v3539_v39  ;;  %p4574_p3 = por %p4573_p2, %p4572_p1 }
 0x624   :  { %p4575_p4 = pnand %p4574_p3, %p4568_p0 }
 0x625   :  { %4111 = vmatpush3.xpose.msk.msra.mxu1 %vm2275_vm1, %v3523_v44 }
 0x626   :  { %4112 = vmatprep.subr.msk.mxu1 %vm2275_vm1, %v3538_v17 }
 0x629   :  { %4113 = vmatpush3.xpose.msk.msra.mxu1 %vm2275_vm1, %v3522_v6 }
 0x62a   :  { %4114 = vmatprep.subr.msk.mxu1 %vm2275_vm1, %v3537_v51 }
 0x62d   :  { %4115 = vmatpush3.xpose.msk.msra.mxu1 %vm2275_vm1, %v3521_v56 }
 0x62e   :  { %4116 = vmatprep.subr.msk.mxu1 %vm2275_vm1, %v3536_v2 }
 0x631   :  { %4117 = vmatpush3.xpose.msk.msra.mxu1 %vm2275_vm1, %v3520_v34 }
 0x632   :  { %4118 = vmatprep.subr.msk.mxu1 %vm2275_vm1, %v3535_v24 }
 0x635   :  { %4119 = vmatpush3.xpose.msk.msra.mxu1 %vm2275_vm1, %v3519_v7 }
 0x636   :  { %4120 = vmatprep.subr.msk.mxu1 %vm2275_vm1, %v3534_v20 }
 0x639   :  { %4121 = vmatpush3.xpose.msk.msra.mxu1 %vm2275_vm1, %v3518_v3 }
 0x63a   :  { %4122 = vmatprep.subr.msk.mxu1 %vm2275_vm1, %v3533_v26 }
 0x63d   :  { %4123 = vmatpush3.xpose.msk.msra.mxu1 %vm2275_vm1, %v3517_v42 }
 0x63e   :  { %4124 = vmatprep.subr.msk.mxu1 %vm2275_vm1, %v3532_v59 }
 0x641   :  { %4125 = vmatpush3.xpose.msk.msra.mxu1 %vm2275_vm1, %v3516_v10 }
 0x642   :  { %4126 = vmatprep.subr.msk.mxu1 %vm2275_vm1, %v3531_v28 }
 0x645   :  { %4127 = vmatpush3.xpose.msk.msra.mxu1 %vm2275_vm1, %v3515_v35 }
 0x648   :  { %4129 = vmatmul.mubr.msk.f32.vlgmr.msra.gmra.mxu1 %vm2275_vm1, %v3550_v15  ;;  %v3726_v15 = vunpack.c.l.s4 %v4591_v33  ;;  %vm3742_vm1 = vcmp.lt.s32.totalorder %v2271_v13, 256 }
 0x64a   :  { %v3727_v22 = vunpack.c.0.s8 %v3726_v15 }
 0x64c   :  { %v3730_v43 = vsub.s32 %v3727_v22, %v6517_v23 }
 0x708   :  { %v3717_v21 = vpop.f32.mrf.mxu1 }
 0x709   :  { %v3718_v48 = vadd.f32 %v3717_v21, %v3551_v25 }
 0x70a   :  { %v3719_v45 = vpop.f32.mrf.mxu1 }
 0x70b   :  { %v3720_v30 = vadd.f32 %v3719_v45, %v3551_v25 }
 0x70d   :  { %v3724_v60 = vcombine.low %v3718_v48, %v3720_v30 }
 0x70f   :  { %v3731_v9 = vrot.slane %v3724_v60, %v3730_v43 }
 0x711   :  { %v3738_v39 = vrot.slane %v3731_v9, %v3730_v43 }
 0x713   :  { %3744 = vst.msk [vmem:[#allocation2] sm:$0x3] %vm3742_vm1, %v3738_v39 }
 0x714   :  { %4578 = shalt.err (!%p4575_p4)
}
 0x715   :  { %3754 = dma.vmem_to_hbm [thread:$0]  %s3752_s11, 32, %s6938_s6, [#allocation3]  }
 0x716   :  { %4587 = dma.done.wait [#allocation3], 32  }
 0x717   :  { %4588 = vsyncadd [#allocation3], 4294967264 }
 0x718   :  { %3762 = vsyncpa [#allocation3], 1 }

</bundles_post_ra>
